<compile_context>
chip_gen: v5e
topology: v5e:2x2
jax: 0.10.0
libtpu: 0.0.40
codegen_flags: <defaults>
</compile_context>

<pallas_src>
import functools

import jax
import jax.numpy as jnp
from jax.experimental import pallas as pl
from jax.experimental.pallas import tpu as pltpu

_SQRT_2_OVER_PI = 0.7978845608028654


def _gelu_tanh(v):
    # tanh-approximate GELU; EUP-friendly.
    return 0.5 * v * (1.0 + jnp.tanh(_SQRT_2_OVER_PI * (v + 0.044715 * v * v * v)))


def _round_up(v, m):
    return (v + m - 1) // m * m


def _pick_block_b(b):
    for cand in range(min(4, b), 0, -1):
        if b % cand == 0:
            return cand
    return 1


def _gin_core(x_c, src, idx_t, w, b, eps, *, out_dtype, mxu_dtype, grouped):
    """Fused GIN body for one image.

    x_c   : (C_in, T)    center-node features for this target tile
    src   : (C_in, Nr)   gather source (== x slab when y is None)
    idx_t : (K, T) int32 neighbor indices (transposed, lane-dense)
    w     : (C_out, C_in) dense block-diagonal weight, or
            (G, C_out/G, C_in/G) per-group weights
    b     : (C_out, 1)   conv bias (f32)
    eps   : scalar f32
    """
    nr = src.shape[1]
    k = idx_t.shape[0]
    # f32 operands are the accurate / v5e-friendly path; bf16 is the fast path.
    prec = jax.lax.Precision.HIGHEST if mxu_dtype == jnp.float32 else None

    # Transposed one-hot neighbor-count matrix A[m, n] = #{k : idx[n, k] == m},
    # built lane-dense (targets on lanes) against a sublane iota over sources.
    # Initialized from the first compare (saves one full Nr x T pass).
    iota_m = jax.lax.broadcasted_iota(jnp.int32, (nr, 1), 0)
    a = (idx_t[0:1, :] == iota_m).astype(mxu_dtype)
    for kk in range(1, k):
        a = a + (idx_t[kk:kk + 1, :] == iota_m).astype(mxu_dtype)

    # Gather + neighbor-sum as a canonical MXU matmul: xj[c,n] = sum_m src[c,m]*A[m,n]
    xj = jax.lax.dot_general(
        src.astype(mxu_dtype), a,
        dimension_numbers=(((1,), (0,)), ((), ())),
        preferred_element_type=jnp.float32,
        precision=prec)                                          # (C_in, T)

    h = (1.0 + eps) * x_c.astype(jnp.float32) + xj               # f32 VPU path

    if grouped:
        # Per-group matmuls: avoid the 4x zero FLOPs of the dense block-diagonal
        # weight at large channel counts.
        g, _, c_in_g = w.shape
        t = h.shape[-1]
        hg = h.reshape(g, c_in_g, t).astype(mxu_dtype)
        outs = [
            jax.lax.dot_general(
                w[gi].astype(mxu_dtype), hg[gi],
                dimension_numbers=(((1,), (0,)), ((), ())),
                preferred_element_type=jnp.float32,
                precision=prec)
            for gi in range(g)
        ]
        out = jnp.concatenate(outs, axis=0) + b                  # (C_out, T)
    else:
        out = jnp.dot(w.astype(mxu_dtype), h.astype(mxu_dtype),
                      preferred_element_type=jnp.float32,
                      precision=prec) + b                        # (C_out, T)

    return _gelu_tanh(out).astype(out_dtype)


def _gin_kernel_self(x_ref, idx_ref, w_ref, b_ref, eps_ref, o_ref, *,
                     mxu_dtype, grouped):
    """y is None: gather source == x. x_ref holds the full per-image node slab
    (constant index_map over the N-tile axis -> DMA'd once per batch block);
    the center tile is sliced out of it in-kernel."""
    tile_n = o_ref.shape[-1]
    col0 = pl.multiple_of(pl.program_id(1) * tile_n, tile_n)
    w = w_ref[...]
    b = b_ref[...]
    eps = eps_ref[0]
    for ib in range(o_ref.shape[0]):                 # small static batch block
        src = x_ref[ib]                              # (C_in, Nr_pad)
        x_c = x_ref[ib, :, pl.ds(col0, tile_n)]      # (C_in, T) center tile
        o_ref[ib] = _gin_core(x_c, src, idx_ref[ib], w, b, eps,
                              out_dtype=o_ref.dtype, mxu_dtype=mxu_dtype,
                              grouped=grouped)


def _gin_kernel_xy(x_ref, y_ref, idx_ref, w_ref, b_ref, eps_ref, o_ref, *,
                   mxu_dtype, grouped):
    """Explicit gather source y: x is tiled over N, y is the full source slab."""
    w = w_ref[...]
    b = b_ref[...]
    eps = eps_ref[0]
    for ib in range(o_ref.shape[0]):
        o_ref[ib] = _gin_core(x_ref[ib], y_ref[ib], idx_ref[ib], w, b, eps,
                              out_dtype=o_ref.dtype, mxu_dtype=mxu_dtype,
                              grouped=grouped)


def _expand_grouped_weight(weight, groups):
    """(C_out, C_in // groups) grouped-conv weight -> dense block-diagonal (C_out, C_in)."""
    c_out, c_in_g = weight.shape
    c_in = c_in_g * groups
    c_out_g = c_out // groups
    dense = jnp.zeros((c_out, c_in), weight.dtype)
    for g in range(groups):
        dense = dense.at[g * c_out_g:(g + 1) * c_out_g,
                         g * c_in_g:(g + 1) * c_in_g].set(
            weight[g * c_out_g:(g + 1) * c_out_g])
    return dense


@functools.partial(
    jax.jit,
    static_argnames=("groups", "mxu_dtype", "use_grouped_matmul", "block_b",
                     "tile_n"))
def gin_conv2d_forward(x, edge_index, weight, bias, eps, y=None, *,
                       groups=4, mxu_dtype=jnp.bfloat16,
                       use_grouped_matmul=None, block_b=None, tile_n=None):
    """x: (B, C_in, N, 1); edge_index: (2, B, N, K) -> (B, C_out, N, 1)."""
    b_sz, c_in, n, one = x.shape
    assert one == 1
    c_out = weight.shape[0]
    assert c_in % groups == 0 and c_out % groups == 0
    mxu_dtype = jnp.dtype(mxu_dtype)

    # Dense block-diagonal weight is fine for tiny channels; switch to
    # per-group matmuls once the group contraction is MXU-sized.
    if use_grouped_matmul is None:
        use_grouped_matmul = (c_in // groups) >= 128

    # ---- target-node tiling (lane axis), padded to multiples of 128 --------
    if tile_n is None:
        tile_n = min(512, _round_up(n, 128))
    tile_n = _round_up(tile_n, 128)
    n_pad = _round_up(n, tile_n)
    n_tiles = n_pad // tile_n

    if block_b is None:
        block_b = _pick_block_b(b_sz)
    assert b_sz % block_b == 0

    # Edge indices lane-dense as (B, K, N): targets on lanes, K on sublanes.
    idx = jnp.transpose(edge_index[0].astype(jnp.int32), (0, 2, 1))  # (B, K, N)
    k = idx.shape[1]
    if n_pad != n:
        idx = jnp.pad(idx, ((0, 0), (0, 0), (0, n_pad - n)))

    x2 = x[..., 0]                                                   # (B, C_in, N)
    if n_pad != n:
        x2 = jnp.pad(x2, ((0, 0), (0, 0), (0, n_pad - n)))

    if use_grouped_matmul:
        w_in = weight.reshape(groups, c_out // groups,
                              c_in // groups).astype(jnp.float32)
        w_spec = pl.BlockSpec((groups, c_out // groups, c_in // groups),
                              lambda bi, ni: (0, 0, 0))
    else:
        w_in = _expand_grouped_weight(weight, groups).astype(jnp.float32)
        w_spec = pl.BlockSpec((c_out, c_in), lambda bi, ni: (0, 0))

    bias2 = bias.reshape(c_out, 1).astype(jnp.float32)
    eps1 = jnp.reshape(eps, (1,)).astype(jnp.float32)

    if y is None:
        # Source slab == padded x; constant index_map over the N-tile axis.
        inputs = [x2, idx, w_in, bias2, eps1]
        in_specs = [
            pl.BlockSpec((block_b, c_in, n_pad), lambda bi, ni: (bi, 0, 0)),
            pl.BlockSpec((block_b, k, tile_n), lambda bi, ni: (bi, 0, ni)),
            w_spec,
            pl.BlockSpec((c_out, 1), lambda bi, ni: (0, 0)),
            pl.BlockSpec(memory_space=pltpu.MemorySpace.SMEM),   # eps scalar
        ]
        kernel = functools.partial(_gin_kernel_self, mxu_dtype=mxu_dtype,
                                   grouped=use_grouped_matmul)
    else:
        src2 = y[..., 0]                                             # (B, C_in, Nr)
        nr = src2.shape[-1]
        nr_pad = _round_up(nr, 128)
        if nr_pad != nr:
            src2 = jnp.pad(src2, ((0, 0), (0, 0), (0, nr_pad - nr)))
        inputs = [x2, src2, idx, w_in, bias2, eps1]
        in_specs = [
            pl.BlockSpec((block_b, c_in, tile_n), lambda bi, ni: (bi, 0, ni)),
            pl.BlockSpec((block_b, c_in, nr_pad), lambda bi, ni: (bi, 0, 0)),
            pl.BlockSpec((block_b, k, tile_n), lambda bi, ni: (bi, 0, ni)),
            w_spec,
            pl.BlockSpec((c_out, 1), lambda bi, ni: (0, 0)),
            pl.BlockSpec(memory_space=pltpu.MemorySpace.SMEM),
        ]
        kernel = functools.partial(_gin_kernel_xy, mxu_dtype=mxu_dtype,
                                   grouped=use_grouped_matmul)

    out = pl.pallas_call(
        kernel,
        out_shape=jax.ShapeDtypeStruct((b_sz, c_out, n_pad), x.dtype),
        grid_spec=pltpu.PrefetchScalarGridSpec(
            num_scalar_prefetch=0,
            grid=(b_sz // block_b, n_tiles),
            in_specs=in_specs,
            out_specs=pl.BlockSpec((block_b, c_out, tile_n),
                                   lambda bi, ni: (bi, 0, ni)),
        ),
        compiler_params=pltpu.CompilerParams(
            dimension_semantics=("parallel", "parallel"),
        ),
    )(*inputs)

    return out[:, :, :n, None]                                       # (B, C_out, N, 1)


class GINConv2dPallas:
    """Pallas equivalent of GINConv2d (conv -> GELU path of BasicConv)."""

    def __init__(self, in_channels, out_channels, key, groups=4, eps_init=0.0):
        k_w, k_b = jax.random.split(key)
        fan_in = in_channels // groups
        self.weight = jax.random.normal(
            k_w, (out_channels, fan_in), jnp.float32) / (fan_in ** 0.5)
        self.bias = 0.1 * jax.random.normal(k_b, (out_channels,), jnp.float32)
        self.eps = jnp.asarray(eps_init, jnp.float32)       # learnable GIN epsilon
        self.groups = groups

    def __call__(self, x, edge_index, y=None, mxu_dtype=jnp.bfloat16):
        return gin_conv2d_forward(x, edge_index, self.weight, self.bias,
                                  self.eps, y, groups=self.groups,
                                  mxu_dtype=mxu_dtype)


def _reference_gin(x, edge_index, weight, bias, eps, y=None, groups=4):
    """Pure-XLA reference: gather + sum + (1+eps)*x + grouped 1x1 conv + GELU."""
    b_sz, c_in, n, _ = x.shape
    c_out = weight.shape[0]
    idx = edge_index[0]
    k = idx.shape[-1]
    xt = x[..., 0]                                          # (B, C, N)
    src = xt if y is None else y[..., 0]                    # (B, C, Nr)
    idx_flat = jnp.broadcast_to(idx.reshape(b_sz, 1, n * k), (b_sz, c_in, n * k))
    gathered = jnp.take_along_axis(src, idx_flat, axis=2).reshape(b_sz, c_in, n, k)
    xj = gathered.sum(-1)                                   # (B, C, N)
    h = (1.0 + eps) * xt + xj
    hg = h.reshape(b_sz, groups, c_in // groups, n)
    wg = weight.reshape(groups, c_out // groups, c_in // groups)
    out = jnp.einsum("goc,bgcn->bgon", wg, hg,
                     precision=jax.lax.Precision.HIGHEST)
    out = out.reshape(b_sz, c_out, n) + bias.reshape(1, c_out, 1)
    out = _gelu_tanh(out)
    return out[..., None]


if __name__ == "__main__":
    key = jax.random.PRNGKey(0)
    k_x, k_y, k_idx, k_idx2, k_mod = jax.random.split(key, 5)

    # Shapes consistent with the ViG backbone: batch=2, 32 channels,
    # N=128 graph nodes, K=9 neighbors, grouped conv with groups=4.
    batch, c_in, c_out, num_points, k_nb, groups = 2, 32, 32, 128, 9, 4

    x = jax.random.normal(k_x, (batch, c_in, num_points, 1), jnp.float32)
    edge_index = jax.random.randint(
        k_idx, (2, batch, num_points, k_nb), 0, num_points, dtype=jnp.int32)

    module = GINConv2dPallas(c_in, c_out, k_mod, groups=groups, eps_init=0.25)
    ref = _reference_gin(x, edge_index, module.weight, module.bias, module.eps,
                         groups=groups)

    # 1) accurate f32 MXU path (structural correctness, tight tolerance).
    out_f32 = jax.block_until_ready(
        gin_conv2d_forward(x, edge_index, module.weight, module.bias,
                           module.eps, groups=groups, mxu_dtype=jnp.float32))
    assert out_f32.shape == (batch, c_out, num_points, 1), out_f32.shape
    assert bool(jnp.allclose(out_f32, ref, atol=2e-3, rtol=2e-3)), \
        float(jnp.max(jnp.abs(out_f32 - ref)))

    # 2) fast bf16 MXU path (default / production config); bf16-level tolerance.
    out_bf16 = jax.block_until_ready(module(x, edge_index))
    assert out_bf16.shape == (batch, c_out, num_points, 1), out_bf16.shape
    rel = float(jnp.linalg.norm(out_bf16 - ref) / jnp.linalg.norm(ref))
    assert rel < 3e-2, rel

    # 3) per-group matmul code path (used automatically at large channel counts).
    out_grp = jax.block_until_ready(
        gin_conv2d_forward(x, edge_index, module.weight, module.bias,
                           module.eps, groups=groups, mxu_dtype=jnp.float32,
                           use_grouped_matmul=True))
    assert bool(jnp.allclose(out_grp, ref, atol=2e-3, rtol=2e-3)), \
        float(jnp.max(jnp.abs(out_grp - ref)))

    # 4) explicit gather-source (y) path with a larger source node set.
    num_src = 256
    y_feat = jax.random.normal(k_y, (batch, c_in, num_src, 1), jnp.float32)
    edge_index_y = jax.random.randint(
        k_idx2, (2, batch, num_points, k_nb), 0, num_src, dtype=jnp.int32)
    out_y = jax.block_until_ready(
        gin_conv2d_forward(x, edge_index_y, module.weight, module.bias,
                           module.eps, y_feat, groups=groups,
                           mxu_dtype=jnp.float32))
    ref_y = _reference_gin(x, edge_index_y, module.weight, module.bias,
                           module.eps, y=y_feat, groups=groups)
    assert bool(jnp.allclose(out_y, ref_y, atol=2e-3, rtol=2e-3)), \
        float(jnp.max(jnp.abs(out_y - ref_y)))

    print("KERNEL_OK")
</pallas_src>

<mosaic_0001>
module attributes {stable_mosaic.version = 11 : i64} {
  func.func @_gin_kernel_self(%arg0: i32, %arg1: i32, %arg2: memref<2x32x128xf32, #tpu.memory_space<vmem>>, %arg3: memref<2x9x128xi32, #tpu.memory_space<vmem>>, %arg4: memref<32x32xf32, #tpu.memory_space<vmem>>, %arg5: memref<32x1xf32, #tpu.memory_space<vmem>>, %arg6: memref<1xf32, #tpu.memory_space<smem>>, %arg7: memref<2x32x128xf32, #tpu.memory_space<vmem>>) attributes {dimension_semantics = [#tpu.dimension_semantics<parallel>, #tpu.dimension_semantics<parallel>], iteration_bounds = array<i64: 1, 1>, scalar_prefetch = 0 : i64, scratch_operands = 0 : i64, tpu.core_type = #tpu.core_type<tc>, window_params = [{transform_indices = @transform_0, window_bounds = array<i64: 2, 32, 128>}, {transform_indices = @transform_1, window_bounds = array<i64: 2, 9, 128>}, {pipeline_mode = #tpu.pipeline_mode<synchronous>, transform_indices = @transform_2, window_bounds = array<i64: 32, 32>}, {pipeline_mode = #tpu.pipeline_mode<synchronous>, transform_indices = @transform_3, window_bounds = array<i64: 32, 1>}, {transform_indices = @transform_4, window_bounds = array<i64: 1>}, {transform_indices = @transform_5, window_bounds = array<i64: 2, 32, 128>}]} {
    %c128_i32 = arith.constant 128 : i32
    %0 = arith.muli %arg1, %c128_i32 : i32
    %1 = tpu.assume_multiple %0, 128 : i32
    %c0 = arith.constant 0 : index
    %c0_0 = arith.constant 0 : index
    %2 = vector.load %arg4[%c0, %c0_0] : memref<32x32xf32, #tpu.memory_space<vmem>>, vector<32x32xf32>
    %c0_1 = arith.constant 0 : index
    %c0_2 = arith.constant 0 : index
    %3 = vector.load %arg5[%c0_1, %c0_2] : memref<32x1xf32, #tpu.memory_space<vmem>>, vector<32x1xf32>
    %c0_3 = arith.constant 0 : index
    %4 = memref.load %arg6[%c0_3] : memref<1xf32, #tpu.memory_space<smem>>
    %c0_4 = arith.constant 0 : index
    %c0_5 = arith.constant 0 : index
    %c0_6 = arith.constant 0 : index
    %5 = vector.load %arg2[%c0_4, %c0_5, %c0_6] : memref<2x32x128xf32, #tpu.memory_space<vmem>>, vector<1x32x128xf32>
    %6 = vector.shape_cast %5 : vector<1x32x128xf32> to vector<32x128xf32>
    %c0_7 = arith.constant 0 : index
    %c0_8 = arith.constant 0 : index
    %7 = arith.index_cast %1 : i32 to index
    %8 = vector.load %arg2[%c0_7, %c0_8, %7] : memref<2x32x128xf32, #tpu.memory_space<vmem>>, vector<1x32x128xf32>
    %9 = vector.shape_cast %8 : vector<1x32x128xf32> to vector<32x128xf32>
    %c0_9 = arith.constant 0 : index
    %c0_10 = arith.constant 0 : index
    %c0_11 = arith.constant 0 : index
    %10 = vector.load %arg3[%c0_9, %c0_10, %c0_11] : memref<2x9x128xi32, #tpu.memory_space<vmem>>, vector<1x9x128xi32>
    %11 = vector.shape_cast %10 : vector<1x9x128xi32> to vector<9x128xi32>
    %12 = tpu.iota {dimensions = array<i32: 0>} : vector<128x1xi32>
    %13 = vector.extract_strided_slice %11 {offsets = [0, 0], sizes = [1, 128], strides = [1, 1]} : vector<9x128xi32> to vector<1x128xi32>
    %14 = vector.broadcast %13 : vector<1x128xi32> to vector<128x128xi32>
    %15 = vector.broadcast %12 : vector<128x1xi32> to vector<128x128xi32>
    %16 = arith.cmpi eq, %14, %15 : vector<128x128xi32>
    %17 = arith.extui %16 : vector<128x128xi1> to vector<128x128xi32>
    %18 = arith.sitofp %17 : vector<128x128xi32> to vector<128x128xf32>
    %19 = vector.extract_strided_slice %11 {offsets = [1, 0], sizes = [1, 128], strides = [1, 1]} : vector<9x128xi32> to vector<1x128xi32>
    %20 = vector.broadcast %19 : vector<1x128xi32> to vector<128x128xi32>
    %21 = vector.broadcast %12 : vector<128x1xi32> to vector<128x128xi32>
    %22 = arith.cmpi eq, %20, %21 : vector<128x128xi32>
    %23 = arith.extui %22 : vector<128x128xi1> to vector<128x128xi32>
    %24 = arith.sitofp %23 : vector<128x128xi32> to vector<128x128xf32>
    %25 = arith.addf %18, %24 : vector<128x128xf32>
    %26 = vector.extract_strided_slice %11 {offsets = [2, 0], sizes = [1, 128], strides = [1, 1]} : vector<9x128xi32> to vector<1x128xi32>
    %27 = vector.broadcast %26 : vector<1x128xi32> to vector<128x128xi32>
    %28 = vector.broadcast %12 : vector<128x1xi32> to vector<128x128xi32>
    %29 = arith.cmpi eq, %27, %28 : vector<128x128xi32>
    %30 = arith.extui %29 : vector<128x128xi1> to vector<128x128xi32>
    %31 = arith.sitofp %30 : vector<128x128xi32> to vector<128x128xf32>
    %32 = arith.addf %25, %31 : vector<128x128xf32>
    %33 = vector.extract_strided_slice %11 {offsets = [3, 0], sizes = [1, 128], strides = [1, 1]} : vector<9x128xi32> to vector<1x128xi32>
    %34 = vector.broadcast %33 : vector<1x128xi32> to vector<128x128xi32>
    %35 = vector.broadcast %12 : vector<128x1xi32> to vector<128x128xi32>
    %36 = arith.cmpi eq, %34, %35 : vector<128x128xi32>
    %37 = arith.extui %36 : vector<128x128xi1> to vector<128x128xi32>
    %38 = arith.sitofp %37 : vector<128x128xi32> to vector<128x128xf32>
    %39 = arith.addf %32, %38 : vector<128x128xf32>
    %40 = vector.extract_strided_slice %11 {offsets = [4, 0], sizes = [1, 128], strides = [1, 1]} : vector<9x128xi32> to vector<1x128xi32>
    %41 = vector.broadcast %40 : vector<1x128xi32> to vector<128x128xi32>
    %42 = vector.broadcast %12 : vector<128x1xi32> to vector<128x128xi32>
    %43 = arith.cmpi eq, %41, %42 : vector<128x128xi32>
    %44 = arith.extui %43 : vector<128x128xi1> to vector<128x128xi32>
    %45 = arith.sitofp %44 : vector<128x128xi32> to vector<128x128xf32>
    %46 = arith.addf %39, %45 : vector<128x128xf32>
    %47 = vector.extract_strided_slice %11 {offsets = [5, 0], sizes = [1, 128], strides = [1, 1]} : vector<9x128xi32> to vector<1x128xi32>
    %48 = vector.broadcast %47 : vector<1x128xi32> to vector<128x128xi32>
    %49 = vector.broadcast %12 : vector<128x1xi32> to vector<128x128xi32>
    %50 = arith.cmpi eq, %48, %49 : vector<128x128xi32>
    %51 = arith.extui %50 : vector<128x128xi1> to vector<128x128xi32>
    %52 = arith.sitofp %51 : vector<128x128xi32> to vector<128x128xf32>
    %53 = arith.addf %46, %52 : vector<128x128xf32>
    %54 = vector.extract_strided_slice %11 {offsets = [6, 0], sizes = [1, 128], strides = [1, 1]} : vector<9x128xi32> to vector<1x128xi32>
    %55 = vector.broadcast %54 : vector<1x128xi32> to vector<128x128xi32>
    %56 = vector.broadcast %12 : vector<128x1xi32> to vector<128x128xi32>
    %57 = arith.cmpi eq, %55, %56 : vector<128x128xi32>
    %58 = arith.extui %57 : vector<128x128xi1> to vector<128x128xi32>
    %59 = arith.sitofp %58 : vector<128x128xi32> to vector<128x128xf32>
    %60 = arith.addf %53, %59 : vector<128x128xf32>
    %61 = vector.extract_strided_slice %11 {offsets = [7, 0], sizes = [1, 128], strides = [1, 1]} : vector<9x128xi32> to vector<1x128xi32>
    %62 = vector.broadcast %61 : vector<1x128xi32> to vector<128x128xi32>
    %63 = vector.broadcast %12 : vector<128x1xi32> to vector<128x128xi32>
    %64 = arith.cmpi eq, %62, %63 : vector<128x128xi32>
    %65 = arith.extui %64 : vector<128x128xi1> to vector<128x128xi32>
    %66 = arith.sitofp %65 : vector<128x128xi32> to vector<128x128xf32>
    %67 = arith.addf %60, %66 : vector<128x128xf32>
    %68 = vector.extract_strided_slice %11 {offsets = [8, 0], sizes = [1, 128], strides = [1, 1]} : vector<9x128xi32> to vector<1x128xi32>
    %69 = vector.broadcast %68 : vector<1x128xi32> to vector<128x128xi32>
    %70 = vector.broadcast %12 : vector<128x1xi32> to vector<128x128xi32>
    %71 = arith.cmpi eq, %69, %70 : vector<128x128xi32>
    %72 = arith.extui %71 : vector<128x128xi1> to vector<128x128xi32>
    %73 = arith.sitofp %72 : vector<128x128xi32> to vector<128x128xf32>
    %74 = arith.addf %67, %73 : vector<128x128xf32>
    %cst = arith.constant dense<0.000000e+00> : vector<32x128xf32>
    %75 = tpu.matmul %6, %74, %cst {dimension_numbers = #tpu.dot_dimension_numbers<[1], [0], [0], [1], [0, 0, 1, 1], [], []>, precision = #tpu.contract_precision<fp32>} : vector<32x128xf32>, vector<128x128xf32>, vector<32x128xf32> -> vector<32x128xf32>
    %cst_12 = arith.constant 1.000000e+00 : f32
    %76 = arith.addf %cst_12, %4 : f32
    %77 = vector.broadcast %76 : f32 to vector<32x128xf32>
    %78 = arith.mulf %77, %9 : vector<32x128xf32>
    %79 = arith.addf %78, %75 : vector<32x128xf32>
    %cst_13 = arith.constant dense<0.000000e+00> : vector<32x128xf32>
    %80 = tpu.matmul %2, %79, %cst_13 {dimension_numbers = #tpu.dot_dimension_numbers<[1], [0], [0], [1], [0, 0, 1, 1], [], []>, precision = #tpu.contract_precision<fp32>} : vector<32x32xf32>, vector<32x128xf32>, vector<32x128xf32> -> vector<32x128xf32>
    %81 = vector.broadcast %3 : vector<32x1xf32> to vector<32x128xf32>
    %82 = arith.addf %80, %81 : vector<32x128xf32>
    %cst_14 = arith.constant 5.000000e-01 : f32
    %83 = vector.broadcast %cst_14 : f32 to vector<32x128xf32>
    %84 = arith.mulf %83, %82 : vector<32x128xf32>
    %cst_15 = arith.constant 4.471500e-02 : f32
    %85 = vector.broadcast %cst_15 : f32 to vector<32x128xf32>
    %86 = arith.mulf %85, %82 : vector<32x128xf32>
    %87 = arith.mulf %86, %82 : vector<32x128xf32>
    %88 = arith.mulf %87, %82 : vector<32x128xf32>
    %89 = arith.addf %82, %88 : vector<32x128xf32>
    %cst_16 = arith.constant 0.797884583 : f32
    %90 = vector.broadcast %cst_16 : f32 to vector<32x128xf32>
    %91 = arith.mulf %90, %89 : vector<32x128xf32>
    %92 = math.tanh %91 : vector<32x128xf32>
    %cst_17 = arith.constant 1.000000e+00 : f32
    %93 = vector.broadcast %cst_17 : f32 to vector<32x128xf32>
    %94 = arith.addf %93, %92 : vector<32x128xf32>
    %95 = arith.mulf %84, %94 : vector<32x128xf32>
    %c0_18 = arith.constant 0 : index
    %c0_19 = arith.constant 0 : index
    %c0_20 = arith.constant 0 : index
    %96 = vector.load %arg7[%c0_18, %c0_19, %c0_20] : memref<2x32x128xf32, #tpu.memory_space<vmem>>, vector<1x32x128xf32>
    %97 = vector.shape_cast %96 : vector<1x32x128xf32> to vector<32x128xf32>
    %98 = vector.shape_cast %95 : vector<32x128xf32> to vector<1x32x128xf32>
    tpu.vector_store %arg7[%c0_18, %c0_19, %c0_20], %98 {strides = array<i32>} : memref<2x32x128xf32, #tpu.memory_space<vmem>>, vector<1x32x128xf32>,
    %c1 = arith.constant 1 : index
    %c0_21 = arith.constant 0 : index
    %c0_22 = arith.constant 0 : index
    %99 = vector.load %arg2[%c1, %c0_21, %c0_22] : memref<2x32x128xf32, #tpu.memory_space<vmem>>, vector<1x32x128xf32>
    %100 = vector.shape_cast %99 : vector<1x32x128xf32> to vector<32x128xf32>
    %c1_23 = arith.constant 1 : index
    %c0_24 = arith.constant 0 : index
    %101 = arith.index_cast %1 : i32 to index
    %102 = vector.load %arg2[%c1_23, %c0_24, %101] : memref<2x32x128xf32, #tpu.memory_space<vmem>>, vector<1x32x128xf32>
    %103 = vector.shape_cast %102 : vector<1x32x128xf32> to vector<32x128xf32>
    %c1_25 = arith.constant 1 : index
    %c0_26 = arith.constant 0 : index
    %c0_27 = arith.constant 0 : index
    %104 = vector.load %arg3[%c1_25, %c0_26, %c0_27] : memref<2x9x128xi32, #tpu.memory_space<vmem>>, vector<1x9x128xi32>
    %105 = vector.shape_cast %104 : vector<1x9x128xi32> to vector<9x128xi32>
    %106 = tpu.iota {dimensions = array<i32: 0>} : vector<128x1xi32>
    %107 = vector.extract_strided_slice %105 {offsets = [0, 0], sizes = [1, 128], strides = [1, 1]} : vector<9x128xi32> to vector<1x128xi32>
    %108 = vector.broadcast %107 : vector<1x128xi32> to vector<128x128xi32>
    %109 = vector.broadcast %106 : vector<128x1xi32> to vector<128x128xi32>
    %110 = arith.cmpi eq, %108, %109 : vector<128x128xi32>
    %111 = arith.extui %110 : vector<128x128xi1> to vector<128x128xi32>
    %112 = arith.sitofp %111 : vector<128x128xi32> to vector<128x128xf32>
    %113 = vector.extract_strided_slice %105 {offsets = [1, 0], sizes = [1, 128], strides = [1, 1]} : vector<9x128xi32> to vector<1x128xi32>
    %114 = vector.broadcast %113 : vector<1x128xi32> to vector<128x128xi32>
    %115 = vector.broadcast %106 : vector<128x1xi32> to vector<128x128xi32>
    %116 = arith.cmpi eq, %114, %115 : vector<128x128xi32>
    %117 = arith.extui %116 : vector<128x128xi1> to vector<128x128xi32>
    %118 = arith.sitofp %117 : vector<128x128xi32> to vector<128x128xf32>
    %119 = arith.addf %112, %118 : vector<128x128xf32>
    %120 = vector.extract_strided_slice %105 {offsets = [2, 0], sizes = [1, 128], strides = [1, 1]} : vector<9x128xi32> to vector<1x128xi32>
    %121 = vector.broadcast %120 : vector<1x128xi32> to vector<128x128xi32>
    %122 = vector.broadcast %106 : vector<128x1xi32> to vector<128x128xi32>
    %123 = arith.cmpi eq, %121, %122 : vector<128x128xi32>
    %124 = arith.extui %123 : vector<128x128xi1> to vector<128x128xi32>
    %125 = arith.sitofp %124 : vector<128x128xi32> to vector<128x128xf32>
    %126 = arith.addf %119, %125 : vector<128x128xf32>
    %127 = vector.extract_strided_slice %105 {offsets = [3, 0], sizes = [1, 128], strides = [1, 1]} : vector<9x128xi32> to vector<1x128xi32>
    %128 = vector.broadcast %127 : vector<1x128xi32> to vector<128x128xi32>
    %129 = vector.broadcast %106 : vector<128x1xi32> to vector<128x128xi32>
    %130 = arith.cmpi eq, %128, %129 : vector<128x128xi32>
    %131 = arith.extui %130 : vector<128x128xi1> to vector<128x128xi32>
    %132 = arith.sitofp %131 : vector<128x128xi32> to vector<128x128xf32>
    %133 = arith.addf %126, %132 : vector<128x128xf32>
    %134 = vector.extract_strided_slice %105 {offsets = [4, 0], sizes = [1, 128], strides = [1, 1]} : vector<9x128xi32> to vector<1x128xi32>
    %135 = vector.broadcast %134 : vector<1x128xi32> to vector<128x128xi32>
    %136 = vector.broadcast %106 : vector<128x1xi32> to vector<128x128xi32>
    %137 = arith.cmpi eq, %135, %136 : vector<128x128xi32>
    %138 = arith.extui %137 : vector<128x128xi1> to vector<128x128xi32>
    %139 = arith.sitofp %138 : vector<128x128xi32> to vector<128x128xf32>
    %140 = arith.addf %133, %139 : vector<128x128xf32>
    %141 = vector.extract_strided_slice %105 {offsets = [5, 0], sizes = [1, 128], strides = [1, 1]} : vector<9x128xi32> to vector<1x128xi32>
    %142 = vector.broadcast %141 : vector<1x128xi32> to vector<128x128xi32>
    %143 = vector.broadcast %106 : vector<128x1xi32> to vector<128x128xi32>
    %144 = arith.cmpi eq, %142, %143 : vector<128x128xi32>
    %145 = arith.extui %144 : vector<128x128xi1> to vector<128x128xi32>
    %146 = arith.sitofp %145 : vector<128x128xi32> to vector<128x128xf32>
    %147 = arith.addf %140, %146 : vector<128x128xf32>
    %148 = vector.extract_strided_slice %105 {offsets = [6, 0], sizes = [1, 128], strides = [1, 1]} : vector<9x128xi32> to vector<1x128xi32>
    %149 = vector.broadcast %148 : vector<1x128xi32> to vector<128x128xi32>
    %150 = vector.broadcast %106 : vector<128x1xi32> to vector<128x128xi32>
    %151 = arith.cmpi eq, %149, %150 : vector<128x128xi32>
    %152 = arith.extui %151 : vector<128x128xi1> to vector<128x128xi32>
    %153 = arith.sitofp %152 : vector<128x128xi32> to vector<128x128xf32>
    %154 = arith.addf %147, %153 : vector<128x128xf32>
    %155 = vector.extract_strided_slice %105 {offsets = [7, 0], sizes = [1, 128], strides = [1, 1]} : vector<9x128xi32> to vector<1x128xi32>
    %156 = vector.broadcast %155 : vector<1x128xi32> to vector<128x128xi32>
    %157 = vector.broadcast %106 : vector<128x1xi32> to vector<128x128xi32>
    %158 = arith.cmpi eq, %156, %157 : vector<128x128xi32>
    %159 = arith.extui %158 : vector<128x128xi1> to vector<128x128xi32>
    %160 = arith.sitofp %159 : vector<128x128xi32> to vector<128x128xf32>
    %161 = arith.addf %154, %160 : vector<128x128xf32>
    %162 = vector.extract_strided_slice %105 {offsets = [8, 0], sizes = [1, 128], strides = [1, 1]} : vector<9x128xi32> to vector<1x128xi32>
    %163 = vector.broadcast %162 : vector<1x128xi32> to vector<128x128xi32>
    %164 = vector.broadcast %106 : vector<128x1xi32> to vector<128x128xi32>
    %165 = arith.cmpi eq, %163, %164 : vector<128x128xi32>
    %166 = arith.extui %165 : vector<128x128xi1> to vector<128x128xi32>
    %167 = arith.sitofp %166 : vector<128x128xi32> to vector<128x128xf32>
    %168 = arith.addf %161, %167 : vector<128x128xf32>
    %cst_28 = arith.constant dense<0.000000e+00> : vector<32x128xf32>
    %169 = tpu.matmul %100, %168, %cst_28 {dimension_numbers = #tpu.dot_dimension_numbers<[1], [0], [0], [1], [0, 0, 1, 1], [], []>, precision = #tpu.contract_precision<fp32>} : vector<32x128xf32>, vector<128x128xf32>, vector<32x128xf32> -> vector<32x128xf32>
    %cst_29 = arith.constant 1.000000e+00 : f32
    %170 = arith.addf %cst_29, %4 : f32
    %171 = vector.broadcast %170 : f32 to vector<32x128xf32>
    %172 = arith.mulf %171, %103 : vector<32x128xf32>
    %173 = arith.addf %172, %169 : vector<32x128xf32>
    %cst_30 = arith.constant dense<0.000000e+00> : vector<32x128xf32>
    %174 = tpu.matmul %2, %173, %cst_30 {dimension_numbers = #tpu.dot_dimension_numbers<[1], [0], [0], [1], [0, 0, 1, 1], [], []>, precision = #tpu.contract_precision<fp32>} : vector<32x32xf32>, vector<32x128xf32>, vector<32x128xf32> -> vector<32x128xf32>
    %175 = vector.broadcast %3 : vector<32x1xf32> to vector<32x128xf32>
    %176 = arith.addf %174, %175 : vector<32x128xf32>
    %cst_31 = arith.constant 5.000000e-01 : f32
    %177 = vector.broadcast %cst_31 : f32 to vector<32x128xf32>
    %178 = arith.mulf %177, %176 : vector<32x128xf32>
    %cst_32 = arith.constant 4.471500e-02 : f32
    %179 = vector.broadcast %cst_32 : f32 to vector<32x128xf32>
    %180 = arith.mulf %179, %176 : vector<32x128xf32>
    %181 = arith.mulf %180, %176 : vector<32x128xf32>
    %182 = arith.mulf %181, %176 : vector<32x128xf32>
    %183 = arith.addf %176, %182 : vector<32x128xf32>
    %cst_33 = arith.constant 0.797884583 : f32
    %184 = vector.broadcast %cst_33 : f32 to vector<32x128xf32>
    %185 = arith.mulf %184, %183 : vector<32x128xf32>
    %186 = math.tanh %185 : vector<32x128xf32>
    %cst_34 = arith.constant 1.000000e+00 : f32
    %187 = vector.broadcast %cst_34 : f32 to vector<32x128xf32>
    %188 = arith.addf %187, %186 : vector<32x128xf32>
    %189 = arith.mulf %178, %188 : vector<32x128xf32>
    %c1_35 = arith.constant 1 : index
    %c0_36 = arith.constant 0 : index
    %c0_37 = arith.constant 0 : index
    %190 = vector.load %arg7[%c1_35, %c0_36, %c0_37] : memref<2x32x128xf32, #tpu.memory_space<vmem>>, vector<1x32x128xf32>
    %191 = vector.shape_cast %190 : vector<1x32x128xf32> to vector<32x128xf32>
    %192 = vector.shape_cast %189 : vector<32x128xf32> to vector<1x32x128xf32>
    tpu.vector_store %arg7[%c1_35, %c0_36, %c0_37], %192 {strides = array<i32>} : memref<2x32x128xf32, #tpu.memory_space<vmem>>, vector<1x32x128xf32>,
    return
  }
  func.func @transform_0(%arg0: i32, %arg1: i32) -> (i32, i32, i32) {
    %c0_i32 = arith.constant 0 : i32
    %c0_i32_0 = arith.constant 0 : i32
    %c0_i32_1 = arith.constant 0 : i32
    return %arg0, %c0_i32, %c0_i32_0 : i32, i32, i32
  }
  func.func @transform_1(%arg0: i32, %arg1: i32) -> (i32, i32, i32) {
    %c0_i32 = arith.constant 0 : i32
    %c0_i32_0 = arith.constant 0 : i32
    return %arg0, %c0_i32, %arg1 : i32, i32, i32
  }
  func.func @transform_2(%arg0: i32, %arg1: i32) -> (i32, i32) {
    %c0_i32 = arith.constant 0 : i32
    %c0_i32_0 = arith.constant 0 : i32
    %c0_i32_1 = arith.constant 0 : i32
    return %c0_i32, %c0_i32_0 : i32, i32
  }
  func.func @transform_3(%arg0: i32, %arg1: i32) -> (i32, i32) {
    %c0_i32 = arith.constant 0 : i32
    %c0_i32_0 = arith.constant 0 : i32
    %c0_i32_1 = arith.constant 0 : i32
    return %c0_i32, %c0_i32_0 : i32, i32
  }
  func.func @transform_4(%arg0: i32, %arg1: i32) -> i32 {
    %c0_i32 = arith.constant 0 : i32
    %c0_i32_0 = arith.constant 0 : i32
    return %c0_i32 : i32
  }
  func.func @transform_5(%arg0: i32, %arg1: i32) -> (i32, i32, i32) {
    %c0_i32 = arith.constant 0 : i32
    %c0_i32_0 = arith.constant 0 : i32
    return %arg0, %c0_i32, %arg1 : i32, i32, i32
  }
}

</mosaic_0001>

<bundles_post_ra>
// kernel: gin_conv2d_forward.1
= control target key start
LH: loop header
LB: loop body
LE: loop exit
PB: predicated region body
PF: predicated region fallthrough
CT: control target
= control target key end

     0   :  { %v45_v1 = vlaneseq  ;;  %s5019_s0 = inlined_call_operand.vmem [shape: f32[2,32,128], index: 0, kind: input, shape index: {}]   ;;  %s5020_s1 = inlined_call_operand.vmem [shape: s32[2,9,128], index: 1, kind: input, shape index: {}]   ;;  %s5021_s2 = inlined_call_operand.vmem [shape: f32[32,32], index: 2, kind: input, shape index: {}]   ;;  %s5022_s3 = inlined_call_operand.vmem [shape: f32[32,1], index: 3, kind: input, shape index: {}]   ;;  %s5023_s4 = inlined_call_operand.<no memory space> [shape: f32[1], index: 4, kind: input, shape index: {}]   ;;  %s5024_s5 = inlined_call_operand.hbm [shape: f32[2,32,128], index: 5, kind: output, shape index: {}]  }
   0x1   :  { %v43_v0 = vld [vmem:[%s5020_s1] sm:$0xff] }
   0x2   :  { %v3180_v2 = vperm.slane %v43_v0, 0  ;;  %v3182_v3 = vshrl.u32 %v45_v1, 7  ;;  %v3184_v4 = vperm.slane %v43_v0, 1  ;;  %v3186_v5 = vperm.slane %v43_v0, 2 }
   0x3   :  { %v3188_v6 = vperm.slane %v43_v0, 3 }
   0x4   :  { %5077 = vst [vmem:[#allocation6_spill] sm:$0xff] %v3182_v3 }
   0x5   :  { %11 = vsyncpa [#allocation4], 0  ;;  %v3190_v7 = vperm.slane %v43_v0, 4  ;;  %v3193_v8 = vadd.s32 120, %v3182_v3  ;;  %v3195_v9 = vperm.slane %v43_v0, 5  ;;  %v3197_v10 = vperm.slane %v43_v0, 6 }
   0x6   :  { %v3199_v11 = vperm.slane %v43_v0, 7  ;;  %v3202_v12 = vadd.s32 112, %v3182_v3  ;;  %v3205_v13 = vadd.s32 104, %v3182_v3  ;;  %v3208_v14 = vadd.s32 96, %v3182_v3  ;;  %v3224_v16 = vld [vmem:[%s5020_s1 + $0x8] ss:$0 sm:$0xff] }
   0x7   :  { %v3211_v15 = vadd.s32 88, %v3182_v3  ;;  %vm78_vm0 = vcmp.eq.s32.totalorder %v3180_v2, %v3193_v8  ;;  %vm127_vm1 = vcmp.eq.s32.totalorder %v3184_v4, %v3193_v8  ;;  %vm192_vm2 = vcmp.eq.s32.totalorder %v3186_v5, %v3193_v8  ;;  %s1065_s9 = sadd.f32 1.0, %s5023_s4  ;;  %s2776_s13 = sshll.u32 %s5024_s5, 4  ;;  %s2777_s13 = int_to_ptr.hbm [resolvable:$true] %s2776_s13 }
   0x8   :  { %vm257_vm3 = vcmp.eq.s32.totalorder %v3188_v6, %v3193_v8  ;;  %v5045_v17 = vmov 0.0   ;;  %v3230_v21 = vadd.s32 80, %v3182_v3  ;;  %vm322_vm4 = vcmp.eq.s32.totalorder %v3190_v7, %v3193_v8  ;;  %s3145_s14 = smov 128   ;;  %s3146_s15 = smov 8  }
   0x9   :  { %v2806_v18 = vsel %vm78_vm0, 1.0, %v5045_v17  ;;  %v2822_v19 = vsel %vm127_vm1, 1.0, %v5045_v17  ;;  %v2838_v20 = vsel %vm192_vm2, 1.0, %v5045_v17  ;;  %vm387_vm5 = vcmp.eq.s32.totalorder %v3195_v9, %v3193_v8 }
   0xa   :  { %v175_v22 = vadd.f32 %v2822_v19, %v2806_v18  ;;  %vm452_vm6 = vcmp.eq.s32.totalorder %v3197_v10, %v3193_v8  ;;  %v2854_v23 = vsel %vm257_vm3, 1.0, %v5045_v17  ;;  %v2870_v24 = vsel %vm322_vm4, 1.0, %v5045_v17 }
   0xb   :  { %v2886_v25 = vsel %vm387_vm5, 1.0, %v5045_v17  ;;  %vm517_vm7 = vcmp.eq.s32.totalorder %v3199_v11, %v3193_v8  ;;  %v2902_v27 = vsel %vm452_vm6, 1.0, %v5045_v17  ;;  %vm582_vm8 = vcmp.eq.s32.totalorder %v3224_v16, %v3193_v8 }
   0xc   :  { %v240_v26 = vadd.f32 %v2838_v20, %v175_v22  ;;  %vm77_vm9 = vcmp.eq.s32.totalorder %v3180_v2, %v3202_v12  ;;  %v2918_v28 = vsel %vm517_vm7, 1.0, %v5045_v17  ;;  %vm126_vm10 = vcmp.eq.s32.totalorder %v3184_v4, %v3202_v12 }
   0xd   :  { %v2805_v29 = vsel %vm77_vm9, 1.0, %v5045_v17  ;;  %vm191_vm11 = vcmp.eq.s32.totalorder %v3186_v5, %v3202_v12  ;;  %v2821_v31 = vsel %vm126_vm10, 1.0, %v5045_v17  ;;  %vm256_vm12 = vcmp.eq.s32.totalorder %v3188_v6, %v3202_v12 }
   0xe   :  { %v305_v30 = vadd.f32 %v2854_v23, %v240_v26  ;;  %v2837_v32 = vsel %vm191_vm11, 1.0, %v5045_v17  ;;  %v2934_v33 = vsel %vm582_vm8, 1.0, %v5045_v17  ;;  %v174_v34 = vadd.f32 %v2821_v31, %v2805_v29 }
   0xf   :  { %vm321_vm13 = vcmp.eq.s32.totalorder %v3190_v7, %v3202_v12  ;;  %vm386_vm14 = vcmp.eq.s32.totalorder %v3195_v9, %v3202_v12  ;;  %v2853_v36 = vsel %vm256_vm12, 1.0, %v5045_v17  ;;  %vm451_vm15 = vcmp.eq.s32.totalorder %v3197_v10, %v3202_v12 }
  0x10   :  { %v370_v35 = vadd.f32 %v2870_v24, %v305_v30  ;;  %v2869_v37 = vsel %vm321_vm13, 1.0, %v5045_v17  ;;  %v239_v38 = vadd.f32 %v2837_v32, %v174_v34  ;;  %v2885_v39 = vsel %vm386_vm14, 1.0, %v5045_v17 }
  0x11   :  { %v2901_v40 = vsel %vm451_vm15, 1.0, %v5045_v17  ;;  %vm516_vm0 = vcmp.eq.s32.totalorder %v3199_v11, %v3202_v12  ;;  %vm581_vm1 = vcmp.eq.s32.totalorder %v3224_v16, %v3202_v12  ;;  %vm76_vm2 = vcmp.eq.s32.totalorder %v3180_v2, %v3205_v13 }
  0x12   :  { %v435_v41 = vadd.f32 %v2886_v25, %v370_v35  ;;  %v2917_v42 = vsel %vm516_vm0, 1.0, %v5045_v17  ;;  %v304_v43 = vadd.f32 %v2853_v36, %v239_v38  ;;  %v2804_v44 = vsel %vm76_vm2, 1.0, %v5045_v17 }
  0x13   :  { %vm125_vm3 = vcmp.eq.s32.totalorder %v3184_v4, %v3205_v13  ;;  %vm190_vm4 = vcmp.eq.s32.totalorder %v3186_v5, %v3205_v13  ;;  %vm255_vm5 = vcmp.eq.s32.totalorder %v3188_v6, %v3205_v13  ;;  %v2933_v49 = vsel %vm581_vm1, 1.0, %v5045_v17 }
  0x14   :  { %v500_v45 = vadd.f32 %v2902_v27, %v435_v41  ;;  %v2820_v46 = vsel %vm125_vm3, 1.0, %v5045_v17  ;;  %v2836_v47 = vsel %vm190_vm4, 1.0, %v5045_v17  ;;  %v369_v48 = vadd.f32 %v2869_v37, %v304_v43 }
  0x15   :  { %v173_v50 = vadd.f32 %v2820_v46, %v2804_v44  ;;  %vm320_vm6 = vcmp.eq.s32.totalorder %v3190_v7, %v3205_v13  ;;  %v2852_v52 = vsel %vm255_vm5, 1.0, %v5045_v17  ;;  %vm385_vm7 = vcmp.eq.s32.totalorder %v3195_v9, %v3205_v13 }
  0x16   :  { %v565_v51 = vadd.f32 %v2918_v28, %v500_v45  ;;  %vm450_vm8 = vcmp.eq.s32.totalorder %v3197_v10, %v3205_v13  ;;  %v434_v53 = vadd.f32 %v2885_v39, %v369_v48  ;;  %v2868_v55 = vsel %vm320_vm6, 1.0, %v5045_v17 }
  0x17   :  { %v238_v54 = vadd.f32 %v2836_v47, %v173_v50  ;;  %v2884_v56 = vsel %vm385_vm7, 1.0, %v5045_v17  ;;  %v2900_v58 = vsel %vm450_vm8, 1.0, %v5045_v17  ;;  %vm515_vm9 = vcmp.eq.s32.totalorder %v3199_v11, %v3205_v13 }
  0x18   :  { %v630_v57 = vadd.f32 %v2934_v33, %v565_v51  ;;  %vm75_vm10 = vcmp.eq.s32.totalorder %v3180_v2, %v3208_v14  ;;  %v499_v59 = vadd.f32 %v2901_v40, %v434_v53  ;;  %v2916_v61 = vsel %vm515_vm9, 1.0, %v5045_v17 }
  0x19   :  { %v303_v60 = vadd.f32 %v2852_v52, %v238_v54  ;;  %vm580_vm11 = vcmp.eq.s32.totalorder %v3224_v16, %v3205_v13  ;;  %v2803_v63 = vsel %vm75_vm10, 1.0, %v5045_v17  ;;  %vm124_vm12 = vcmp.eq.s32.totalorder %v3184_v4, %v3208_v14 }
  0x1a   :  { %v3303_v62 = vand.u32 4294901760, %v630_v57  ;;  %vm189_vm13 = vcmp.eq.s32.totalorder %v3186_v5, %v3208_v14  ;;  %v564_v0 = vadd.f32 %v2917_v42, %v499_v59  ;;  %v2819_v18 = vsel %vm124_vm12, 1.0, %v5045_v17 }
  0x1b   :  { %v368_v1 = vadd.f32 %v2868_v55, %v303_v60  ;;  %v2835_v19 = vsel %vm189_vm13, 1.0, %v5045_v17  ;;  %v172_v22 = vadd.f32 %v2819_v18, %v2803_v63  ;;  %vm254_vm14 = vcmp.eq.s32.totalorder %v3188_v6, %v3208_v14 }
  0x1c   :  { %632 = vmatpush.msra.mxu0 %v3303_v62  ;;  %v3314_v20 = vsub.f32 %v630_v57, %v3303_v62  ;;  %vm319_vm15 = vcmp.eq.s32.totalorder %v3190_v7, %v3208_v14  ;;  %v629_v23 = vadd.f32 %v2933_v49, %v564_v0  ;;  %v2932_v25 = vsel %vm580_vm11, 1.0, %v5045_v17  ;;  %879 = vmatpush.msra.mxu3 %v3303_v62 }
  0x1d   :  { %v433_v24 = vadd.f32 %v2884_v56, %v368_v1  ;;  %v2851_v26 = vsel %vm254_vm14, 1.0, %v5045_v17  ;;  %v237_v27 = vadd.f32 %v2835_v19, %v172_v22  ;;  %vm384_vm0 = vcmp.eq.s32.totalorder %v3195_v9, %v3208_v14 }
  0x1e   :  { %811 = vmatpush.msra.mxu2 %v3314_v20  ;;  %vm449_vm1 = vcmp.eq.s32.totalorder %v3197_v10, %v3208_v14  ;;  %vm514_vm2 = vcmp.eq.s32.totalorder %v3199_v11, %v3208_v14  ;;  %v3333_v28 = vand.u32 4294901760, %v629_v23  ;;  %v2867_v30 = vsel %vm319_vm15, 1.0, %v5045_v17 }
  0x1f   :  { %v498_v29 = vadd.f32 %v2900_v58, %v433_v24  ;;  %v2883_v31 = vsel %vm384_vm0, 1.0, %v5045_v17  ;;  %v302_v32 = vadd.f32 %v2851_v26, %v237_v27  ;;  %v2899_v33 = vsel %vm449_vm1, 1.0, %v5045_v17 }
  0x20   :  { %vm579_vm3 = vcmp.eq.s32.totalorder %v3224_v16, %v3208_v14  ;;  %vm74_vm4 = vcmp.eq.s32.totalorder %v3180_v2, %v3211_v15  ;;  %634 = vmatpush.msra.mxu0 %v3333_v28  ;;  %v2915_v35 = vsel %vm514_vm2, 1.0, %v5045_v17  ;;  %v3345_v36 = vsub.f32 %v629_v23, %v3333_v28  ;;  %881 = vmatpush.msra.mxu3 %v3333_v28 }
  0x21   :  { %v563_v34 = vadd.f32 %v2916_v61, %v498_v29  ;;  %v2802_v37 = vsel %vm74_vm4, 1.0, %v5045_v17  ;;  %v367_v38 = vadd.f32 %v2867_v30, %v302_v32  ;;  %vm123_vm5 = vcmp.eq.s32.totalorder %v3184_v4, %v3211_v15 }
  0x22   :  { %vm188_vm6 = vcmp.eq.s32.totalorder %v3186_v5, %v3211_v15  ;;  %vm253_vm7 = vcmp.eq.s32.totalorder %v3188_v6, %v3211_v15  ;;  %v2931_v40 = vsel %vm579_vm3, 1.0, %v5045_v17  ;;  %814 = vmatpush.msra.mxu2 %v3345_v36  ;;  %v2818_v41 = vsel %vm123_vm5, 1.0, %v5045_v17 }
  0x23   :  { %v628_v39 = vadd.f32 %v2932_v25, %v563_v34  ;;  %v2834_v42 = vsel %vm188_vm6, 1.0, %v5045_v17  ;;  %v432_v43 = vadd.f32 %v2883_v31, %v367_v38  ;;  %v171_v44 = vadd.f32 %v2818_v41, %v2802_v37 }
  0x24   :  { %vm318_vm8 = vcmp.eq.s32.totalorder %v3190_v7, %v3211_v15  ;;  %vm383_vm9 = vcmp.eq.s32.totalorder %v3195_v9, %v3211_v15  ;;  %v2850_v46 = vsel %vm253_vm7, 1.0, %v5045_v17  ;;  %vm448_vm10 = vcmp.eq.s32.totalorder %v3197_v10, %v3211_v15 }
  0x25   :  { %v3363_v45 = vand.u32 4294901760, %v628_v39  ;;  %v2866_v47 = vsel %vm318_vm8, 1.0, %v5045_v17  ;;  %v497_v48 = vadd.f32 %v2899_v33, %v432_v43  ;;  %v236_v49 = vadd.f32 %v2834_v42, %v171_v44 }
  0x26   :  { %v2882_v50 = vsel %vm383_vm9, 1.0, %v5045_v17  ;;  %vm513_vm11 = vcmp.eq.s32.totalorder %v3199_v11, %v3211_v15  ;;  %v2898_v51 = vsel %vm448_vm10, 1.0, %v5045_v17  ;;  %v5033_v53 = vand.u32 4294901760, %v3314_v20 }
  0x27   :  { %636 = vmatpush.msra.mxu0 %v3363_v45  ;;  %v2914_v52 = vsel %vm513_vm11, 1.0, %v5045_v17  ;;  %v3377_v54 = vsub.f32 %v628_v39, %v3363_v45  ;;  %883 = vmatpush.msra.mxu3 %v3363_v45  ;;  %v562_v55 = vadd.f32 %v2915_v35, %v497_v48  ;;  %v301_v56 = vadd.f32 %v2850_v46, %v236_v49 }
  0x28   :  { %vm578_vm12 = vcmp.eq.s32.totalorder %v3224_v16, %v3211_v15  ;;  %vm73_vm13 = vcmp.eq.s32.totalorder %v3180_v2, %v3230_v21  ;;  %v699_v57 = vsub.f32 %v3314_v20, %v5033_v53  ;;  %vm122_vm14 = vcmp.eq.s32.totalorder %v3184_v4, %v3230_v21 }
  0x29   :  { %817 = vmatpush.msra.mxu2 %v3377_v54  ;;  %v2801_v58 = vsel %vm73_vm13, 1.0, %v5045_v17  ;;  %vm187_vm15 = vcmp.eq.s32.totalorder %v3186_v5, %v3230_v21  ;;  %v627_v59 = vadd.f32 %v2931_v40, %v562_v55  ;;  %v366_v60 = vadd.f32 %v2866_v47, %v301_v56 }
  0x2a   :  { %v2817_v61 = vsel %vm122_vm14, 1.0, %v5045_v17  ;;  %v2833_v63 = vsel %vm187_vm15, 1.0, %v5045_v17  ;;  %v700_v0 = vand.u32 4294901760, %v699_v57  ;;  %vm252_vm0 = vcmp.eq.s32.totalorder %v3188_v6, %v3230_v21 }
  0x2b   :  { %v170_v1 = vadd.f32 %v2817_v61, %v2801_v58  ;;  %vm317_vm1 = vcmp.eq.s32.totalorder %v3190_v7, %v3230_v21  ;;  %v3399_v18 = vand.u32 4294901760, %v627_v59  ;;  %v431_v19 = vadd.f32 %v2882_v50, %v366_v60 }
  0x2c   :  { %v2930_v22 = vsel %vm578_vm12, 1.0, %v5045_v17  ;;  %v2849_v23 = vsel %vm252_vm0, 1.0, %v5045_v17  ;;  %701 = vmatpush.msra.mxu1 %v700_v0  ;;  %vm382_vm2 = vcmp.eq.s32.totalorder %v3195_v9, %v3230_v21  ;;  %vm447_vm3 = vcmp.eq.s32.totalorder %v3197_v10, %v3230_v21 }
  0x2d   :  { %v235_v24 = vadd.f32 %v2833_v63, %v170_v1  ;;  %vm512_vm4 = vcmp.eq.s32.totalorder %v3199_v11, %v3230_v21  ;;  %638 = vmatpush.msra.mxu0 %v3399_v18  ;;  %v496_v25 = vadd.f32 %v2898_v51, %v431_v19  ;;  %v2865_v26 = vsel %vm317_vm1, 1.0, %v5045_v17  ;;  %885 = vmatpush.msra.mxu3 %v3399_v18 }
  0x2e   :  { %v2881_v27 = vsel %vm382_vm2, 1.0, %v5045_v17  ;;  %v2897_v29 = vsel %vm447_vm3, 1.0, %v5045_v17  ;;  %vm577_vm5 = vcmp.eq.s32.totalorder %v3224_v16, %v3230_v21  ;;  %v5031_v31 = vand.u32 4294901760, %v3345_v36 }
  0x2f   :  { %v300_v30 = vadd.f32 %v2849_v23, %v235_v24  ;;  %v3421_v32 = vsub.f32 %v627_v59, %v3399_v18  ;;  %v561_v33 = vadd.f32 %v2914_v52, %v496_v25  ;;  %v2913_v34 = vsel %vm512_vm4, 1.0, %v5045_v17 }
  0x30   :  { %v2929_v35 = vsel %vm577_vm5, 1.0, %v5045_v17  ;;  %v3426_v37 = vadd.s32 72, %v3182_v3  ;;  %v705_v39 = vsub.f32 %v3345_v36, %v5031_v31  ;;  %v5030_v40 = vand.u32 4294901760, %v3377_v54 }
  0x31   :  { %v365_v38 = vadd.f32 %v2865_v26, %v300_v30  ;;  %820 = vmatpush.msra.mxu2 %v3421_v32  ;;  %v3434_v41 = vadd.s32 64, %v3182_v3  ;;  %v626_v42 = vadd.f32 %v2930_v22, %v561_v33  ;;  %v5029_v57 = vand.u32 4294901760, %v3421_v32 }
  0x32   :  { %vm72_vm6 = vcmp.eq.s32.totalorder %v3180_v2, %v3426_v37  ;;  %vm121_vm7 = vcmp.eq.s32.totalorder %v3184_v4, %v3426_v37  ;;  %vm186_vm8 = vcmp.eq.s32.totalorder %v3186_v5, %v3426_v37  ;;  %v706_v44 = vand.u32 4294901760, %v705_v39 }
  0x33   :  { %v430_v43 = vadd.f32 %v2881_v27, %v365_v38  ;;  %v2800_v46 = vsel %vm72_vm6, 1.0, %v5045_v17  ;;  %v2816_v47 = vsel %vm121_vm7, 1.0, %v5045_v17  ;;  %v3444_v48 = vand.u32 4294901760, %v626_v42 }
  0x34   :  { %v169_v49 = vadd.f32 %v2816_v47, %v2800_v46  ;;  %v2832_v50 = vsel %vm186_vm8, 1.0, %v5045_v17  ;;  %vm251_vm9 = vcmp.eq.s32.totalorder %v3188_v6, %v3426_v37  ;;  %707 = vmatpush.msra.mxu1 %v706_v44  ;;  %vm316_vm10 = vcmp.eq.s32.totalorder %v3190_v7, %v3426_v37 }
  0x35   :  { %v495_v51 = vadd.f32 %v2897_v29, %v430_v43  ;;  %v2848_v52 = vsel %vm251_vm9, 1.0, %v5045_v17  ;;  %vm381_vm11 = vcmp.eq.s32.totalorder %v3195_v9, %v3426_v37  ;;  %640 = vmatpush.msra.mxu0 %v3444_v48  ;;  %v2864_v56 = vsel %vm316_vm10, 1.0, %v5045_v17  ;;  %887 = vmatpush.msra.mxu3 %v3444_v48 }
  0x36   :  { %v234_v55 = vadd.f32 %v2832_v50, %v169_v49  ;;  %vm446_vm12 = vcmp.eq.s32.totalorder %v3197_v10, %v3426_v37  ;;  %v2880_v59 = vsel %vm381_vm11, 1.0, %v5045_v17  ;;  %vm511_vm13 = vcmp.eq.s32.totalorder %v3199_v11, %v3426_v37 }
  0x37   :  { %v560_v58 = vadd.f32 %v2913_v34, %v495_v51  ;;  %v2896_v60 = vsel %vm446_vm12, 1.0, %v5045_v17  ;;  %v2912_v63 = vsel %vm511_vm13, 1.0, %v5045_v17  ;;  %vm576_vm14 = vcmp.eq.s32.totalorder %v3224_v16, %v3426_v37 }
  0x38   :  { %v299_v61 = vadd.f32 %v2848_v52, %v234_v55  ;;  %v711_v0 = vsub.f32 %v3377_v54, %v5030_v40  ;;  %v3471_v19 = vsub.f32 %v626_v42, %v3444_v48  ;;  %vm71_vm15 = vcmp.eq.s32.totalorder %v3180_v2, %v3434_v41 }
  0x39   :  { %v625_v1 = vadd.f32 %v2929_v35, %v560_v58  ;;  %vm120_vm0 = vcmp.eq.s32.totalorder %v3184_v4, %v3434_v41  ;;  %v2799_v24 = vsel %vm71_vm15, 1.0, %v5045_v17  ;;  %vm185_vm1 = vcmp.eq.s32.totalorder %v3186_v5, %v3434_v41 }
  0x3a   :  { %v364_v22 = vadd.f32 %v2864_v56, %v299_v61  ;;  %v712_v23 = vand.u32 4294901760, %v711_v0  ;;  %v2815_v25 = vsel %vm120_vm0, 1.0, %v5045_v17  ;;  %823 = vmatpush.msra.mxu2 %v3471_v19  ;;  %vm250_vm2 = vcmp.eq.s32.totalorder %v3188_v6, %v3434_v41 }
  0x3b   :  { %v3479_v26 = vand.u32 4294901760, %v625_v1  ;;  %v168_v27 = vadd.f32 %v2815_v25, %v2799_v24  ;;  %v2831_v30 = vsel %vm185_vm1, 1.0, %v5045_v17  ;;  %v2847_v33 = vsel %vm250_vm2, 1.0, %v5045_v17 }
  0x3c   :  { %v429_v29 = vadd.f32 %v2880_v59, %v364_v22  ;;  %713 = vmatpush.msra.mxu1 %v712_v23  ;;  %vm315_vm3 = vcmp.eq.s32.totalorder %v3190_v7, %v3434_v41  ;;  %v2928_v34 = vsel %vm576_vm14, 1.0, %v5045_v17  ;;  %vm380_vm4 = vcmp.eq.s32.totalorder %v3195_v9, %v3434_v41 }
  0x3d   :  { %642 = vmatpush.msra.mxu0 %v3479_v26  ;;  %v233_v35 = vadd.f32 %v2831_v30, %v168_v27  ;;  %vm445_vm5 = vcmp.eq.s32.totalorder %v3197_v10, %v3434_v41  ;;  %889 = vmatpush.msra.mxu3 %v3479_v26  ;;  %v2863_v39 = vsel %vm315_vm3, 1.0, %v5045_v17  ;;  %v2879_v42 = vsel %vm380_vm4, 1.0, %v5045_v17 }
  0x3e   :  { %v494_v38 = vadd.f32 %v2896_v60, %v429_v29  ;;  %vm510_vm6 = vcmp.eq.s32.totalorder %v3199_v11, %v3434_v41  ;;  %v2895_v44 = vsel %vm445_vm5, 1.0, %v5045_v17  ;;  %vm575_vm7 = vcmp.eq.s32.totalorder %v3224_v16, %v3434_v41 }
  0x3f   :  { %v298_v43 = vadd.f32 %v2847_v33, %v233_v35  ;;  %v717_v46 = vsub.f32 %v3421_v32, %v5029_v57  ;;  %v2911_v49 = vsel %vm510_vm6, 1.0, %v5045_v17  ;;  %v3512_v50 = vsub.f32 %v625_v1, %v3479_v26 }
  0x40   :  { %v559_v47 = vadd.f32 %v2912_v63, %v494_v38  ;;  %v3515_v51 = vadd.s32 56, %v3182_v3  ;;  %v2927_v55 = vsel %vm575_vm7, 1.0, %v5045_v17  ;;  %v5028_v58 = vand.u32 4294901760, %v3471_v19 }
  0x41   :  { %v363_v52 = vadd.f32 %v2863_v39, %v298_v43  ;;  %v718_v56 = vand.u32 4294901760, %v717_v46  ;;  %826 = vmatpush.msra.mxu2 %v3512_v50  ;;  %v3539_v25 = vadd.s32 48, %v3182_v3  ;;  %v3734_v57 = vadd.s32 16, %v3182_v3 }
  0x42   :  { %v624_v59 = vadd.f32 %v2928_v34, %v559_v47  ;;  %vm70_vm8 = vcmp.eq.s32.totalorder %v3180_v2, %v3515_v51  ;;  %vm119_vm9 = vcmp.eq.s32.totalorder %v3184_v4, %v3515_v51  ;;  %vm184_vm10 = vcmp.eq.s32.totalorder %v3186_v5, %v3515_v51 }
  0x43   :  { %v428_v60 = vadd.f32 %v2879_v42, %v363_v52  ;;  %719 = vmatpush.msra.mxu1 %v718_v56  ;;  %v2798_v61 = vsel %vm70_vm8, 1.0, %v5045_v17  ;;  %v2814_v63 = vsel %vm119_vm9, 1.0, %v5045_v17  ;;  %v2830_v0 = vsel %vm184_vm10, 1.0, %v5045_v17  ;;  %5081 = vst [vmem:[#allocation10_spill] sm:$0xff] %v3734_v57 }
  0x44   :  { %v3529_v1 = vand.u32 4294901760, %v624_v59  ;;  %v167_v22 = vadd.f32 %v2814_v63, %v2798_v61  ;;  %vm249_vm11 = vcmp.eq.s32.totalorder %v3188_v6, %v3515_v51  ;;  %vm314_vm12 = vcmp.eq.s32.totalorder %v3190_v7, %v3515_v51 }
  0x45   :  { %v493_v23 = vadd.f32 %v2895_v44, %v428_v60  ;;  %v2846_v24 = vsel %vm249_vm11, 1.0, %v5045_v17  ;;  %vm379_vm13 = vcmp.eq.s32.totalorder %v3195_v9, %v3515_v51  ;;  %v2862_v29 = vsel %vm314_vm12, 1.0, %v5045_v17 }
  0x46   :  { %644 = vmatpush.msra.mxu0 %v3529_v1  ;;  %v232_v27 = vadd.f32 %v2830_v0, %v167_v22  ;;  %vm444_vm14 = vcmp.eq.s32.totalorder %v3197_v10, %v3515_v51  ;;  %vm509_vm15 = vcmp.eq.s32.totalorder %v3199_v11, %v3515_v51  ;;  %891 = vmatpush.msra.mxu3 %v3529_v1  ;;  %v2878_v33 = vsel %vm379_vm13, 1.0, %v5045_v17 }
  0x47   :  { %v558_v30 = vadd.f32 %v2911_v49, %v493_v23  ;;  %v2894_v34 = vsel %vm444_vm14, 1.0, %v5045_v17  ;;  %v2910_v35 = vsel %vm509_vm15, 1.0, %v5045_v17  ;;  %vm574_vm0 = vcmp.eq.s32.totalorder %v3224_v16, %v3515_v51 }
  0x48   :  { %v297_v38 = vadd.f32 %v2846_v24, %v232_v27  ;;  %v723_v39 = vsub.f32 %v3471_v19, %v5028_v58  ;;  %v3557_v42 = vsub.f32 %v624_v59, %v3529_v1  ;;  %vm69_vm1 = vcmp.eq.s32.totalorder %v3180_v2, %v3539_v25 }
  0x49   :  { %v623_v43 = vadd.f32 %v2927_v55, %v558_v30  ;;  %vm118_vm2 = vcmp.eq.s32.totalorder %v3184_v4, %v3539_v25  ;;  %vm183_vm3 = vcmp.eq.s32.totalorder %v3186_v5, %v3539_v25  ;;  %v2797_v47 = vsel %vm69_vm1, 1.0, %v5045_v17 }
  0x4a   :  { %v362_v44 = vadd.f32 %v2862_v29, %v297_v38  ;;  %v724_v46 = vand.u32 4294901760, %v723_v39  ;;  %829 = vmatpush.msra.mxu2 %v3557_v42  ;;  %v2813_v49 = vsel %vm118_vm2, 1.0, %v5045_v17  ;;  %v2829_v56 = vsel %vm183_vm3, 1.0, %v5045_v17 }
  0x4b   :  { %v3568_v52 = vand.u32 4294901760, %v623_v43  ;;  %v166_v55 = vadd.f32 %v2813_v49, %v2797_v47  ;;  %vm248_vm4 = vcmp.eq.s32.totalorder %v3188_v6, %v3539_v25  ;;  %vm313_vm5 = vcmp.eq.s32.totalorder %v3190_v7, %v3539_v25 }
  0x4c   :  { %v427_v59 = vadd.f32 %v2878_v33, %v362_v44  ;;  %725 = vmatpush.msra.mxu1 %v724_v46  ;;  %v2845_v60 = vsel %vm248_vm4, 1.0, %v5045_v17  ;;  %vm378_vm6 = vcmp.eq.s32.totalorder %v3195_v9, %v3539_v25  ;;  %v2926_v61 = vsel %vm574_vm0, 1.0, %v5045_v17 }
  0x4d   :  { %646 = vmatpush.msra.mxu0 %v3568_v52  ;;  %v231_v63 = vadd.f32 %v2829_v56, %v166_v55  ;;  %v2861_v0 = vsel %vm313_vm5, 1.0, %v5045_v17  ;;  %vm443_vm7 = vcmp.eq.s32.totalorder %v3197_v10, %v3539_v25  ;;  %893 = vmatpush.msra.mxu3 %v3568_v52  ;;  %v2877_v23 = vsel %vm378_vm6, 1.0, %v5045_v17 }
  0x4e   :  { %v492_v22 = vadd.f32 %v2894_v34, %v427_v59  ;;  %vm508_vm8 = vcmp.eq.s32.totalorder %v3199_v11, %v3539_v25  ;;  %vm573_vm9 = vcmp.eq.s32.totalorder %v3224_v16, %v3539_v25  ;;  %v2893_v27 = vsel %vm443_vm7, 1.0, %v5045_v17 }
  0x4f   :  { %v296_v24 = vadd.f32 %v2845_v60, %v231_v63  ;;  %v2909_v29 = vsel %vm508_vm8, 1.0, %v5045_v17  ;;  %v5027_v30 = vand.u32 4294901760, %v3512_v50  ;;  %v2925_v38 = vsel %vm573_vm9, 1.0, %v5045_v17 }
  0x50   :  { %v557_v33 = vadd.f32 %v2910_v35, %v492_v22  ;;  %v3597_v34 = vsub.f32 %v623_v43, %v3568_v52  ;;  %v3600_v39 = vadd.s32 40, %v3182_v3  ;;  %v5025_v47 = vand.u32 4294901760, %v3557_v42 }
  0x51   :  { %v361_v44 = vadd.f32 %v2861_v0, %v296_v24  ;;  %v729_v46 = vsub.f32 %v3512_v50, %v5027_v30  ;;  %v3607_v49 = vadd.s32 32, %v3182_v3 }
  0x52   :  { %5078 = vst [vmem:[#allocation7_spill] sm:$0xff] %v3600_v39  ;;  %v622_v55 = vadd.f32 %v2926_v61, %v557_v33  ;;  %832 = vmatpush.msra.mxu2 %v3597_v34  ;;  %vm68_vm10 = vcmp.eq.s32.totalorder %v3180_v2, %v3600_v39  ;;  %vm117_vm11 = vcmp.eq.s32.totalorder %v3184_v4, %v3600_v39 }
  0x53   :  { %5079 = vst [vmem:[#allocation8_spill] sm:$0xff] %v3607_v49  ;;  %vm182_vm12 = vcmp.eq.s32.totalorder %v3186_v5, %v3600_v39  ;;  %v426_v35 = vadd.f32 %v2877_v23, %v361_v44  ;;  %v730_v43 = vand.u32 4294901760, %v729_v46  ;;  %v2796_v56 = vsel %vm68_vm10, 1.0, %v5045_v17 }
  0x54   :  { %v2812_v59 = vsel %vm117_vm11, 1.0, %v5045_v17  ;;  %v3618_v60 = vand.u32 4294901760, %v622_v55  ;;  %v2828_v63 = vsel %vm182_vm12, 1.0, %v5045_v17  ;;  %vm247_vm13 = vcmp.eq.s32.totalorder %v3188_v6, %v3600_v39 }
  0x55   :  { %v165_v61 = vadd.f32 %v2812_v59, %v2796_v56  ;;  %v491_v0 = vadd.f32 %v2893_v27, %v426_v35  ;;  %731 = vmatpush.msra.mxu1 %v730_v43  ;;  %v2844_v22 = vsel %vm247_vm13, 1.0, %v5045_v17  ;;  %vm312_vm14 = vcmp.eq.s32.totalorder %v3190_v7, %v3600_v39 }
  0x56   :  { %vm377_vm15 = vcmp.eq.s32.totalorder %v3195_v9, %v3600_v39  ;;  %648 = vmatpush.msra.mxu0 %v3618_v60  ;;  %v2860_v24 = vsel %vm312_vm14, 1.0, %v5045_v17  ;;  %vm442_vm0 = vcmp.eq.s32.totalorder %v3197_v10, %v3600_v39  ;;  %895 = vmatpush.msra.mxu3 %v3618_v60  ;;  %v3634_v27 = vadd.s32 24, %v3182_v3 }
  0x57   :  { %v230_v23 = vadd.f32 %v2828_v63, %v165_v61  ;;  %v556_v33 = vadd.f32 %v2909_v29, %v491_v0  ;;  %v2876_v44 = vsel %vm377_vm15, 1.0, %v5045_v17  ;;  %v2892_v46 = vsel %vm442_vm0, 1.0, %v5045_v17 }
  0x58   :  { %5080 = vst [vmem:[#allocation9_spill] sm:$0xff] %v3634_v27  ;;  %vm507_vm1 = vcmp.eq.s32.totalorder %v3199_v11, %v3600_v39  ;;  %vm572_vm2 = vcmp.eq.s32.totalorder %v3224_v16, %v3600_v39  ;;  %v735_v56 = vsub.f32 %v3557_v42, %v5025_v47  ;;  %v3647_v29 = vsub.f32 %v622_v55, %v3618_v60 }
  0x59   :  { %v295_v35 = vadd.f32 %v2844_v22, %v230_v23  ;;  %v2908_v43 = vsel %vm507_vm1, 1.0, %v5045_v17  ;;  %v621_v59 = vadd.f32 %v2925_v38, %v556_v33  ;;  %vm67_vm3 = vcmp.eq.s32.totalorder %v3180_v2, %v3607_v49 }
  0x5a   :  { %vm116_vm4 = vcmp.eq.s32.totalorder %v3184_v4, %v3607_v49  ;;  %v736_v63 = vand.u32 4294901760, %v735_v56  ;;  %v2795_v0 = vsel %vm67_vm3, 1.0, %v5045_v17  ;;  %835 = vmatpush.msra.mxu2 %v3647_v29  ;;  %vm181_vm5 = vcmp.eq.s32.totalorder %v3186_v5, %v3607_v49 }
  0x5b   :  { %v360_v61 = vadd.f32 %v2860_v24, %v295_v35  ;;  %v2811_v22 = vsel %vm116_vm4, 1.0, %v5045_v17  ;;  %v3655_v23 = vand.u32 4294901760, %v621_v59  ;;  %vm246_vm6 = vcmp.eq.s32.totalorder %v3188_v6, %v3607_v49 }
  0x5c   :  { %v164_v38 = vadd.f32 %v2811_v22, %v2795_v0  ;;  %737 = vmatpush.msra.mxu1 %v736_v63  ;;  %v2827_v24 = vsel %vm181_vm5, 1.0, %v5045_v17  ;;  %v2843_v33 = vsel %vm246_vm6, 1.0, %v5045_v17  ;;  %vm311_vm7 = vcmp.eq.s32.totalorder %v3190_v7, %v3607_v49 }
  0x5d   :  { %v425_v55 = vadd.f32 %v2876_v44, %v360_v61  ;;  %650 = vmatpush.msra.mxu0 %v3655_v23  ;;  %v2924_v35 = vsel %vm572_vm2, 1.0, %v5045_v17  ;;  %vm376_vm8 = vcmp.eq.s32.totalorder %v3195_v9, %v3607_v49  ;;  %vm441_vm9 = vcmp.eq.s32.totalorder %v3197_v10, %v3607_v49  ;;  %897 = vmatpush.msra.mxu3 %v3655_v23 }
  0x5e   :  { %v229_v56 = vadd.f32 %v2827_v24, %v164_v38  ;;  %v2859_v61 = vsel %vm311_vm7, 1.0, %v5045_v17  ;;  %v2875_v63 = vsel %vm376_vm8, 1.0, %v5045_v17  ;;  %vm506_vm10 = vcmp.eq.s32.totalorder %v3199_v11, %v3607_v49 }
  0x5f   :  { %v490_v44 = vadd.f32 %v2892_v46, %v425_v55  ;;  %v2891_v22 = vsel %vm441_vm9, 1.0, %v5045_v17  ;;  %v2907_v38 = vsel %vm506_vm10, 1.0, %v5045_v17  ;;  %v5026_v24 = vand.u32 4294901760, %v3597_v34 }
  0x60   :  { %v294_v0 = vadd.f32 %v2843_v33, %v229_v56  ;;  %vm571_vm11 = vcmp.eq.s32.totalorder %v3224_v16, %v3607_v49  ;;  %v3686_v46 = vsub.f32 %v621_v59, %v3655_v23  ;;  %vm66_vm12 = vcmp.eq.s32.totalorder %v3180_v2, %v3634_v27 }
  0x61   :  { %v555_v47 = vadd.f32 %v2908_v43, %v490_v44  ;;  %v741_v33 = vsub.f32 %v3597_v34, %v5026_v24  ;;  %v2794_v56 = vsel %vm66_vm12, 1.0, %v5045_v17  ;;  %vm115_vm13 = vcmp.eq.s32.totalorder %v3184_v4, %v3634_v27 }
  0x62   :  { %v359_v55 = vadd.f32 %v2859_v61, %v294_v0  ;;  %838 = vmatpush.msra.mxu2 %v3686_v46  ;;  %v2810_v44 = vsel %vm115_vm13, 1.0, %v5045_v17  ;;  %vm180_vm14 = vcmp.eq.s32.totalorder %v3186_v5, %v3634_v27  ;;  %vm245_vm15 = vcmp.eq.s32.totalorder %v3188_v6, %v3634_v27 }
  0x63   :  { %v620_v43 = vadd.f32 %v2924_v35, %v555_v47  ;;  %v742_v61 = vand.u32 4294901760, %v741_v33  ;;  %v163_v0 = vadd.f32 %v2810_v44, %v2794_v56  ;;  %v2826_v24 = vsel %vm180_vm14, 1.0, %v5045_v17 }
  0x64   :  { %v424_v59 = vadd.f32 %v2875_v63, %v359_v55  ;;  %v2842_v58 = vsel %vm245_vm15, 1.0, %v5045_v17  ;;  %vm310_vm0 = vcmp.eq.s32.totalorder %v3190_v7, %v3634_v27  ;;  %vm375_vm1 = vcmp.eq.s32.totalorder %v3195_v9, %v3634_v27 }
  0x65   :  { %v3703_v30 = vand.u32 4294901760, %v620_v43  ;;  %v2923_v35 = vsel %vm571_vm11, 1.0, %v5045_v17  ;;  %743 = vmatpush.msra.mxu1 %v742_v61  ;;  %v228_v63 = vadd.f32 %v2826_v24, %v163_v0  ;;  %v2858_v55 = vsel %vm310_vm0, 1.0, %v5045_v17 }
  0x66   :  { %v489_v47 = vadd.f32 %v2891_v22, %v424_v59  ;;  %vm440_vm2 = vcmp.eq.s32.totalorder %v3197_v10, %v3634_v27  ;;  %vm505_vm3 = vcmp.eq.s32.totalorder %v3199_v11, %v3634_v27  ;;  %vm570_vm4 = vcmp.eq.s32.totalorder %v3224_v16, %v3634_v27 }
  0x67   :  { %652 = vmatpush.msra.mxu0 %v3703_v30  ;;  %v5032_v22 = vand.u32 4294901760, %v3647_v29  ;;  %899 = vmatpush.msra.mxu3 %v3703_v30  ;;  %v293_v56 = vadd.f32 %v2842_v58, %v228_v63  ;;  %v2874_v24 = vsel %vm375_vm1, 1.0, %v5045_v17  ;;  %v2890_v44 = vsel %vm440_vm2, 1.0, %v5045_v17 }
  0x68   :  { %v554_v33 = vadd.f32 %v2907_v38, %v489_v47  ;;  %v2906_v59 = vsel %vm505_vm3, 1.0, %v5045_v17  ;;  %v3731_v0 = vsub.f32 %v620_v43, %v3703_v30  ;;  %v2922_v58 = vsel %vm570_vm4, 1.0, %v5045_v17 }
  0x69   :  { %v747_v61 = vsub.f32 %v3647_v29, %v5032_v22  ;;  %v358_v31 = vadd.f32 %v2858_v55, %v293_v56  ;;  %v5036_v38 = vand.u32 4294901760, %v3686_v46  ;;  %vm65_vm5 = vcmp.eq.s32.totalorder %v3180_v2, %v3734_v57 }
  0x6a   :  { %v619_v40 = vadd.f32 %v2923_v35, %v554_v33  ;;  %841 = vmatpush.msra.mxu2 %v3731_v0  ;;  %vm114_vm6 = vcmp.eq.s32.totalorder %v3184_v4, %v3734_v57  ;;  %vm179_vm7 = vcmp.eq.s32.totalorder %v3186_v5, %v3734_v57  ;;  %v2793_v63 = vsel %vm65_vm5, 1.0, %v5045_v17 }
  0x6b   :  { %v748_v47 = vand.u32 4294901760, %v747_v61  ;;  %v423_v35 = vadd.f32 %v2874_v24, %v358_v31  ;;  %v2809_v55 = vsel %vm114_vm6, 1.0, %v5045_v17  ;;  %v2825_v56 = vsel %vm179_vm7, 1.0, %v5045_v17 }
  0x6c   :  { %v3745_v43 = vand.u32 4294901760, %v619_v40  ;;  %v162_v33 = vadd.f32 %v2809_v55, %v2793_v63  ;;  %vm244_vm8 = vcmp.eq.s32.totalorder %v3188_v6, %v3734_v57  ;;  %vm309_vm9 = vcmp.eq.s32.totalorder %v3190_v7, %v3734_v57 }
  0x6d   :  { %749 = vmatpush.msra.mxu1 %v748_v47  ;;  %v488_v61 = vadd.f32 %v2890_v44, %v423_v35  ;;  %v2841_v22 = vsel %vm244_vm8, 1.0, %v5045_v17  ;;  %vm374_vm10 = vcmp.eq.s32.totalorder %v3195_v9, %v3734_v57  ;;  %v3759_v31 = vadd.s32 8, %v3182_v3 }
  0x6e   :  { %654 = vmatpush.msra.mxu0 %v3745_v43  ;;  %901 = vmatpush.msra.mxu3 %v3745_v43  ;;  %v227_v24 = vadd.f32 %v2825_v56, %v162_v33  ;;  %v2857_v47 = vsel %vm309_vm9, 1.0, %v5045_v17  ;;  %vm439_vm11 = vcmp.eq.s32.totalorder %v3197_v10, %v3734_v57  ;;  %vm504_vm12 = vcmp.eq.s32.totalorder %v3199_v11, %v3734_v57 }
  0x6f   :  { %v553_v44 = vadd.f32 %v2906_v59, %v488_v61  ;;  %v2873_v35 = vsel %vm374_vm10, 1.0, %v5045_v17  ;;  %v2889_v63 = vsel %vm439_vm11, 1.0, %v5045_v17  ;;  %v2905_v55 = vsel %vm504_vm12, 1.0, %v5045_v17 }
  0x70   :  { %v292_v53 = vadd.f32 %v2841_v22, %v227_v24  ;;  %vm569_vm13 = vcmp.eq.s32.totalorder %v3224_v16, %v3734_v57  ;;  %v753_v33 = vsub.f32 %v3686_v46, %v5036_v38  ;;  %v3776_v56 = vsub.f32 %v619_v40, %v3745_v43 }
  0x71   :  { %v618_v27 = vadd.f32 %v2922_v58, %v553_v44  ;;  %vm64_vm14 = vcmp.eq.s32.totalorder %v3180_v2, %v3759_v31  ;;  %vm113_vm15 = vcmp.eq.s32.totalorder %v3184_v4, %v3759_v31  ;;  %vm178_vm0 = vcmp.eq.s32.totalorder %v3186_v5, %v3759_v31 }
  0x72   :  { %v357_v22 = vadd.f32 %v2857_v47, %v292_v53  ;;  %v754_v59 = vand.u32 4294901760, %v753_v33  ;;  %844 = vmatpush.msra.mxu2 %v3776_v56  ;;  %v2792_v61 = vsel %vm64_vm14, 1.0, %v5045_v17  ;;  %v2808_v24 = vsel %vm113_vm15, 1.0, %v5045_v17 }
  0x73   :  { %v3787_v40 = vand.u32 4294901760, %v618_v27  ;;  %v161_v58 = vadd.f32 %v2808_v24, %v2792_v61  ;;  %v2824_v44 = vsel %vm178_vm0, 1.0, %v5045_v17  ;;  %vm243_vm1 = vcmp.eq.s32.totalorder %v3188_v6, %v3759_v31 }
  0x74   :  { %v422_v38 = vadd.f32 %v2873_v35, %v357_v22  ;;  %755 = vmatpush.msra.mxu1 %v754_v59  ;;  %v2840_v49 = vsel %vm243_vm1, 1.0, %v5045_v17  ;;  %vm308_vm2 = vcmp.eq.s32.totalorder %v3190_v7, %v3759_v31  ;;  %vm373_vm3 = vcmp.eq.s32.totalorder %v3195_v9, %v3759_v31 }
  0x75   :  { %656 = vmatpush.msra.mxu0 %v3787_v40  ;;  %v2921_v53 = vsel %vm569_vm13, 1.0, %v5045_v17  ;;  %v226_v47 = vadd.f32 %v2824_v44, %v161_v58  ;;  %v2856_v33 = vsel %vm308_vm2, 1.0, %v5045_v17  ;;  %vm438_vm4 = vcmp.eq.s32.totalorder %v3197_v10, %v3759_v31  ;;  %903 = vmatpush.msra.mxu3 %v3787_v40 }
  0x76   :  { %v487_v35 = vadd.f32 %v2889_v63, %v422_v38  ;;  %v2872_v22 = vsel %vm373_vm3, 1.0, %v5045_v17  ;;  %v2888_v59 = vsel %vm438_vm4, 1.0, %v5045_v17  ;;  %vm503_vm5 = vcmp.eq.s32.totalorder %v3199_v11, %v3759_v31 }
  0x77   :  { %v291_v61 = vadd.f32 %v2840_v49, %v226_v47  ;;  %v2904_v24 = vsel %vm503_vm5, 1.0, %v5045_v17  ;;  %vm568_vm6 = vcmp.eq.s32.totalorder %v3224_v16, %v3759_v31  ;;  %v5049_v58 = vand.u32 4294901760, %v3731_v0 }
  0x78   :  { %v552_v44 = vadd.f32 %v2905_v55, %v487_v35  ;;  %v3815_v57 = vsub.f32 %v618_v27, %v3787_v40  ;;  %vm63_vm7 = vcmp.eq.s32.totalorder %v3180_v2, %v3182_v3  ;;  %vm112_vm8 = vcmp.eq.s32.totalorder %v3184_v4, %v3182_v3 }
  0x79   :  { %v356_v38 = vadd.f32 %v2856_v33, %v291_v61  ;;  %v759_v49 = vsub.f32 %v3731_v0, %v5049_v58  ;;  %v2791_v63 = vsel %vm63_vm7, 1.0, %v5045_v17  ;;  %v2807_v47 = vsel %vm112_vm8, 1.0, %v5045_v17 }
  0x7a   :  { %v617_v39 = vadd.f32 %v2921_v53, %v552_v44  ;;  %847 = vmatpush.msra.mxu2 %v3815_v57  ;;  %v160_v27 = vadd.f32 %v2807_v47, %v2791_v63  ;;  %vm177_vm9 = vcmp.eq.s32.totalorder %v3186_v5, %v3182_v3  ;;  %vm242_vm10 = vcmp.eq.s32.totalorder %v3188_v6, %v3182_v3  ;;  %v3845_v6 = vld [vmem:[%s5019_s0] sm:$0xff] }
  0x7b   :  { %v421_v2 = vadd.f32 %v2872_v22, %v356_v38  ;;  %v760_v4 = vand.u32 4294901760, %v759_v49  ;;  %v2823_v55 = vsel %vm177_vm9, 1.0, %v5045_v17  ;;  %v2839_v33 = vsel %vm242_vm10, 1.0, %v5045_v17 }
  0x7c   :  { %v3833_v35 = vand.u32 4294901760, %v617_v39  ;;  %v225_v61 = vadd.f32 %v2823_v55, %v160_v27  ;;  %vm307_vm11 = vcmp.eq.s32.totalorder %v3190_v7, %v3182_v3  ;;  %vm372_vm12 = vcmp.eq.s32.totalorder %v3195_v9, %v3182_v3 }
  0x7d   :  { %v486_v53 = vadd.f32 %v2888_v59, %v421_v2  ;;  %761 = vmatpush.msra.mxu1 %v760_v4  ;;  %v2855_v5 = vsel %vm307_vm11, 1.0, %v5045_v17  ;;  %vm437_vm13 = vcmp.eq.s32.totalorder %v3197_v10, %v3182_v3  ;;  %v2920_v7 = vsel %vm568_vm6, 1.0, %v5045_v17  ;;  %v3857_v10 = vld [vmem:[%s5019_s0 + $0x8] sm:$0xff] }
  0x7e   :  { %658 = vmatpush.msra.mxu0 %v3833_v35  ;;  %v290_v9 = vadd.f32 %v2839_v33, %v225_v61  ;;  %v2871_v22 = vsel %vm372_vm12, 1.0, %v5045_v17  ;;  %905 = vmatpush.msra.mxu3 %v3833_v35  ;;  %v2887_v44 = vsel %vm437_vm13, 1.0, %v5045_v17  ;;  %vm502_vm14 = vcmp.eq.s32.totalorder %v3199_v11, %v3182_v3 }
  0x7f   :  { %v551_v59 = vadd.f32 %v2904_v24, %v486_v53  ;;  %v5044_v38 = vand.u32 4294901760, %v3776_v56  ;;  %v3864_v49 = vsub.f32 %v617_v39, %v3833_v35  ;;  %v3867_v63 = vand.u32 4294901760, %v3845_v6  ;;  %v3114_v24 = vld [vmem:[%s5020_s1 + $0x8] ss:$0 sm:$0xff] }
  0x80   :  { %v355_v16 = vadd.f32 %v2855_v5, %v290_v9  ;;  %v5043_v47 = vand.u32 4294901760, %v3815_v57  ;;  %vm567_vm15 = vcmp.eq.s32.totalorder %v3114_v24, %v3182_v3  ;;  %v3878_v4 = vand.u32 4294901760, %v3857_v10 }
  0x81   :  { %v616_v27 = vadd.f32 %v2920_v7, %v551_v59  ;;  %v765_v2 = vsub.f32 %v3776_v56, %v5044_v38  ;;  %850 = vmatpush.msra.mxu2 %v3864_v49  ;;  %v664_v55 = vsub.f32 %v3845_v6, %v3867_v63  ;;  %v5047_v61 = vand.u32 4294901760, %v3864_v49 }
  0x82   :  { %v420_v39 = vadd.f32 %v2871_v22, %v355_v16  ;;  %v771_v33 = vsub.f32 %v3815_v57, %v5043_v47  ;;  %v2903_v5 = vsel %vm502_vm14, 1.0, %v5045_v17  ;;  %v2919_v47 = vsel %vm567_vm15, 1.0, %v5045_v17 }
  0x83   :  { %v3887_v53 = vand.u32 4294901760, %v616_v27  ;;  %v766_v7 = vand.u32 4294901760, %v765_v2  ;;  %v665_v22 = vand.u32 4294901760, %v664_v55  ;;  %v777_v16 = vsub.f32 %v3864_v49, %v5047_v61 }
  0x84   :  { %v485_v9 = vadd.f32 %v2887_v44, %v420_v39  ;;  %v772_v59 = vand.u32 4294901760, %v771_v33  ;;  %v672_v11 = vsub.f32 %v3857_v10, %v3878_v4  ;;  %v3909_v33 = vld [vmem:[%s5019_s0 + $0x10] sm:$0xff]  ;;  %v5085_v3 = vand.u32 4294901760, %v3421_v32 }
  0x85   :  { %660 = vmatpush.msra.mxu0 %v3887_v53  ;;  %767 = vmatpush.msra.mxu1 %v766_v7  ;;  %v3901_v38 = vsub.f32 %v616_v27, %v3887_v53  ;;  %v666_v2 = vsub.f32 %v664_v55, %v665_v22  ;;  %v778_v39 = vand.u32 4294901760, %v777_v16  ;;  %v3917_v16 = vand.u32 4294901760, %v3909_v33 }
  0x86   :  { %v550_v44 = vadd.f32 %v2903_v5, %v485_v9  ;;  %907 = vmatpush.msra.mxu3 %v3887_v53  ;;  %v673_v9 = vand.u32 4294901760, %v672_v11  ;;  %vm1095_vm0 = vcmask 261120  }
  0x87   :  { %773 = vmatpush.msra.mxu1 %v772_v59  ;;  %853 = vmatpush.msra.mxu2 %v3901_v38  ;;  %v5048_v24 = vand.u32 4294901760, %v3901_v38  ;;  %v667_v7 = vand.u32 4294901760, %v666_v2  ;;  %v5082_v2 = vand.u32 4294901760, %v3314_v20  ;;  %v5084_v20 = vand.u32 4294901760, %v3377_v54 }
  0x88   :  { %v615_v27 = vadd.f32 %v2919_v47, %v550_v44  ;;  %v674_v47 = vsub.f32 %v672_v11, %v673_v9  ;;  %v680_v44 = vsub.f32 %v3909_v33, %v3917_v16  ;;  %v5087_v54 = vand.u32 4294901760, %v3512_v50 }
  0x89   :  { %779 = vmatpush.msra.mxu1 %v778_v39  ;;  %v783_v5 = vsub.f32 %v3901_v38, %v5048_v24  ;;  %v5092_v50 = vand.u32 4294901760, %v3731_v0 }
  0x8a   :  { %v3919_v17 = vand.u32 4294901760, %v615_v27  ;;  %v681_v24 = vand.u32 4294901760, %v680_v44 }
  0x8b   :  { %v784_v61 = vand.u32 4294901760, %v783_v5  ;;  %v3931_v5 = vld [vmem:[%s5019_s0 + $0x18] sm:$0xff] }
  0x8c   :  { %662 = vmatpush.msra.mxu0 %v3919_v17  ;;  %v787_v59 = vsub.f32 %v615_v27, %v3919_v17  ;;  %909 = vmatpush.msra.mxu3 %v3919_v17  ;;  %v5083_v27 = vand.u32 4294901760, %v3345_v36  ;;  %v687_v58 = vand.u32 4294901760, %v3931_v5 }
  0x8d   :  { %668 = vmatmul.f32.vlgmr.msra.gmra.mxu0 %v667_v7  ;;  %785 = vmatpush.msra.mxu1 %v784_v61  ;;  %v675_v7 = vand.u32 4294901760, %v674_v47  ;;  %v5089_v47 = vand.u32 4294901760, %v3597_v34 }
  0x8e   :  { %938 = vmatpush.msrb.mxu0 %v5082_v2  ;;  %856 = vmatpush.msra.mxu2 %v787_v59  ;;  %v788_v39 = vand.u32 4294901760, %v787_v59  ;;  %v688_v36 = vsub.f32 %v3931_v5, %v687_v58 }
  0x8f   :  { %859 = vmatmul.f32.vlgmr.msra.gmra.mxu2 %v664_v55  ;;  %913 = vmatmul.f32.vlgmr.msra.gmra.mxu3 %v665_v22  ;;  %v682_v55 = vsub.f32 %v680_v44, %v681_v24  ;;  %v5086_v22 = vand.u32 4294901760, %v3471_v19  ;;  %v5090_v19 = vand.u32 4294901760, %v3647_v29 }
  0x90   :  { %942 = vmatpush.msrb.mxu0 %v5083_v27  ;;  %v789_v61 = vsub.f32 %v787_v59, %v788_v39  ;;  %v5088_v59 = vand.u32 4294901760, %v3557_v42 }
  0x91   :  { %v683_v32 = vand.u32 4294901760, %v682_v55 }
  0x92   :  { %946 = vmatpush.msrb.mxu0 %v5084_v20  ;;  %v790_v2 = vand.u32 4294901760, %v789_v61 }
  0x94   :  { %791 = vmatpush.msra.mxu1 %v790_v2  ;;  %950 = vmatpush.msrb.mxu0 %v5085_v3  ;;  %v689_v3 = vand.u32 4294901760, %v688_v36 }
  0x95   :  { %676 = vmatmul.f32.gmra.mxu0 %v675_v7  ;;  %793 = vmatmul.f32.vlgmr.msra.gmra.mxu1 %v3867_v63 }
  0x96   :  { %954 = vmatpush.msrb.mxu0 %v5086_v22  ;;  %1017 = vmatpush.msrb.mxu1 %v3303_v62  ;;  %v690_v62 = vsub.f32 %v688_v36, %v689_v3 }
  0x97   :  { %864 = vmatmul.f32.gmra.mxu2 %v672_v11  ;;  %919 = vmatmul.f32.gmra.mxu3 %v673_v9 }
  0x98   :  { %958 = vmatpush.msrb.mxu0 %v5087_v54  ;;  %1019 = vmatpush.msrb.mxu1 %v3333_v28  ;;  %v5091_v28 = vand.u32 4294901760, %v3686_v46 }
  0x9a   :  { %962 = vmatpush.msrb.mxu0 %v5088_v59  ;;  %1021 = vmatpush.msrb.mxu1 %v3363_v45  ;;  %v691_v45 = vand.u32 4294901760, %v690_v62 }
  0x9c   :  { %966 = vmatpush.msrb.mxu0 %v5089_v47  ;;  %1023 = vmatpush.msrb.mxu1 %v3399_v18  ;;  %v5093_v18 = vand.u32 4294901760, %v3776_v56 }
  0x9d   :  { %684 = vmatmul.f32.gmra.mxu0 %v683_v32  ;;  %797 = vmatmul.f32.gmra.mxu1 %v3878_v4 }
  0x9e   :  { %970 = vmatpush.msrb.mxu0 %v5090_v19  ;;  %1025 = vmatpush.msrb.mxu1 %v3444_v48  ;;  %v5094_v48 = vand.u32 4294901760, %v3815_v57 }
  0x9f   :  { %869 = vmatmul.f32.gmra.mxu2 %v680_v44  ;;  %925 = vmatmul.f32.gmra.mxu3 %v681_v24 }
  0xa0   :  { %974 = vmatpush.msrb.mxu0 %v5091_v28  ;;  %1027 = vmatpush.msrb.mxu1 %v3479_v26  ;;  %v5095_v26 = vand.u32 4294901760, %v3864_v49  ;;  %v3991_v49 = vstv %s1065_s9 }
  0xa1   :  { %v1067_v9 = vmul.f32 %v3991_v49, %v3845_v6  ;;  %v4010_v2 = vmul.f32 %v3991_v49, %v3909_v33  ;;  %v23_v6 = vld [vmem:[%s5021_s2] sm:$0xff]  ;;  %v5097_v33 = vmov 0.0   ;;  %v4034_v62 = vmul.f32 %v3991_v49, %v3931_v5 }
  0xa2   :  { %978 = vmatpush.msrb.mxu0 %v5092_v50  ;;  %1029 = vmatpush.msrb.mxu1 %v3529_v1  ;;  %v5096_v1 = vand.u32 4294901760, %v3901_v38  ;;  %v1097_v55 = vsel %vm1095_vm0, %v23_v6, 0 }
  0xa3   :  { %v4022_v22 = vand.u32 4294901760, %v1097_v55 }
  0xa4   :  { %982 = vmatpush.msrb.mxu0 %v5093_v18  ;;  %1031 = vmatpush.msrb.mxu1 %v3568_v52 }
  0xa5   :  { %692 = vmatmul.f32.gmra.mxu0 %v691_v45  ;;  %801 = vmatmul.f32.gmra.mxu1 %v3917_v16 }
  0xa6   :  { %986 = vmatpush.msrb.mxu0 %v5094_v48  ;;  %1033 = vmatpush.msrb.mxu1 %v3618_v60 }
  0xa7   :  { %874 = vmatmul.f32.gmra.mxu2 %v688_v36  ;;  %931 = vmatmul.f32.gmra.mxu3 %v689_v3 }
  0xa8   :  { %990 = vmatpush.msrb.mxu0 %v5095_v26  ;;  %1035 = vmatpush.msrb.mxu1 %v3655_v23 }
  0xaa   :  { %994 = vmatpush.msrb.mxu0 %v5096_v1  ;;  %1037 = vmatpush.msrb.mxu1 %v3703_v30 }
  0xac   :  { %998 = vmatpush.msrb.mxu0 %v788_v39  ;;  %1039 = vmatpush.msrb.mxu1 %v3745_v43  ;;  %v4000_v39 = vmul.f32 %v3991_v49, %v3857_v10 }
  0xad   :  { %805 = vmatmul.f32.gmra.mxu1 %v687_v58  ;;  %1000 = vmatmul.f32.vlgmr.msrb.gmra.mxu0 %v3867_v63 }
  0xae   :  { %1041 = vmatpush.msrb.mxu1 %v3787_v40 }
  0xb0   :  { %1043 = vmatpush.msrb.mxu1 %v3833_v35 }
  0xb2   :  { %1045 = vmatpush.msrb.mxu1 %v3887_v53 }
  0xb4   :  { %1047 = vmatpush.msrb.mxu1 %v3919_v17 }
  0xb5   :  { %1004 = vmatmul.f32.gmra.mxu0 %v3878_v4  ;;  %1049 = vmatmul.f32.vlgmr.msrb.gmra.mxu1 %v3867_v63 }
  0xbd   :  { %1008 = vmatmul.f32.gmra.mxu0 %v3917_v16  ;;  %1053 = vmatmul.f32.gmra.mxu1 %v3878_v4 }
  0xc5   :  { %1012 = vmatmul.f32.gmra.mxu0 %v687_v58  ;;  %1057 = vmatmul.f32.gmra.mxu1 %v3917_v16  ;;  %v2943_v16 = vld [vmem:[%s5020_s1 + $0x10] sm:$0xff] }
  0xc6   :  { %v4002_v27 = vperm.slane %v2943_v16, 0  ;;  %v4004_v61 = vperm.slane %v2943_v16, 1  ;;  %v4020_v10 = vperm.slane %v2943_v16, 2  ;;  %v4028_v47 = vperm.slane %v2943_v16, 3 }
  0xc7   :  { %v4042_v48 = vperm.slane %v2943_v16, 4 }
  0xc8   :  { %vm1456_vm1 = vcmp.eq.s32.totalorder %v4002_v27, %v3193_v8  ;;  %vm1505_vm2 = vcmp.eq.s32.totalorder %v4004_v61, %v3193_v8  ;;  %vm1570_vm3 = vcmp.eq.s32.totalorder %v4020_v10, %v3193_v8  ;;  %vm1455_vm4 = vcmp.eq.s32.totalorder %v4002_v27, %v3202_v12 }
  0xc9   :  { %v2960_v54 = vsel %vm1456_vm1, 1.0, %v5097_v33  ;;  %v2976_v32 = vsel %vm1505_vm2, 1.0, %v5097_v33  ;;  %v2992_v19 = vsel %vm1570_vm3, 1.0, %v5097_v33  ;;  %v2959_v28 = vsel %vm1455_vm4, 1.0, %v5097_v33 }
  0xca   :  { %v1553_v59 = vadd.f32 %v2976_v32, %v2960_v54  ;;  %vm1504_vm5 = vcmp.eq.s32.totalorder %v4004_v61, %v3202_v12  ;;  %vm1635_vm6 = vcmp.eq.s32.totalorder %v4028_v47, %v3193_v8  ;;  %vm1700_vm7 = vcmp.eq.s32.totalorder %v4042_v48, %v3193_v8 }
  0xcb   :  { %v2975_v26 = vsel %vm1504_vm5, 1.0, %v5097_v33  ;;  %vm1569_vm8 = vcmp.eq.s32.totalorder %v4020_v10, %v3202_v12  ;;  %vm1634_vm12 = vcmp.eq.s32.totalorder %v4028_v47, %v3202_v12  ;;  %vm1699_vm13 = vcmp.eq.s32.totalorder %v4042_v48, %v3202_v12 }
  0xcc   :  { %v1618_v18 = vadd.f32 %v2992_v19, %v1553_v59  ;;  %vm1454_vm4 = vcmp.eq.s32.totalorder %v4002_v27, %v3205_v13  ;;  %vm1503_vm5 = vcmp.eq.s32.totalorder %v4004_v61, %v3205_v13 }
  0xcd   :  { %1061 = vmatmul.f32.gmra.mxu1 %v687_v58 }
 0x10a   :  { %v669_v57 = vpop.f32.mrf.mxu0 }
 0x112   :  { %v677_v42 = vpop.f32.mrf.mxu0  ;;  %v794_v52 = vpop.f32.mrf.mxu1 }
 0x113   :  { %v860_v30 = vpop.f32.mrf.mxu2  ;;  %v914_v34 = vpop.f32.mrf.mxu3  ;;  %v795_v43 = vadd.f32 %v794_v52, %v669_v57  ;;  %v4046_v57 = vsub.f32 %v1097_v55, %v4022_v22 }
 0x115   :  { %v861_v58 = vadd.f32 %v860_v30, %v795_v43  ;;  %v4062_v43 = vperm.slane %v2943_v16, 6 }
 0x117   :  { %v915_v24 = vadd.f32 %v914_v34, %v861_v58  ;;  %v4051_v34 = vperm.slane %v2943_v16, 5  ;;  %vm1830_vm10 = vcmp.eq.s32.totalorder %v4062_v43, %v3193_v8  ;;  %vm1829_vm1 = vcmp.eq.s32.totalorder %v4062_v43, %v3202_v12 }
 0x119   :  { %vm1765_vm9 = vcmp.eq.s32.totalorder %v4051_v34, %v3193_v8  ;;  %vm1764_vm15 = vcmp.eq.s32.totalorder %v4051_v34, %v3202_v12 }
 0x11a   :  { %v685_v60 = vpop.f32.mrf.mxu0  ;;  %v798_v29 = vpop.f32.mrf.mxu1  ;;  %v3040_v58 = vsel %vm1765_vm9, 1.0, %v5097_v33  ;;  %vm1763_vm9 = vcmp.eq.s32.totalorder %v4051_v34, %v3205_v13 }
 0x11b   :  { %v865_v17 = vpop.f32.mrf.mxu2  ;;  %v920_v23 = vpop.f32.mrf.mxu3  ;;  %v799_v56 = vadd.f32 %v798_v29, %v677_v42  ;;  %v3008_v42 = vsel %vm1635_vm6, 1.0, %v5097_v33  ;;  %v24_v29 = vld [vmem:[%s5021_s2 + $0x8] sm:$0xff]  ;;  %vm1568_vm6 = vcmp.eq.s32.totalorder %v4020_v10, %v3205_v13 }
 0x11c   :  { %v1683_v30 = vadd.f32 %v3008_v42, %v1618_v18  ;;  %v25_v18 = vld [vmem:[%s5021_s2 + $0x10] sm:$0xff] }
 0x11d   :  { %v866_v38 = vadd.f32 %v865_v17, %v799_v56  ;;  %v3024_v17 = vsel %vm1700_vm7, 1.0, %v5097_v33  ;;  %vm1633_vm7 = vcmp.eq.s32.totalorder %v4028_v47, %v3205_v13 }
 0x11f   :  { %v921_v44 = vadd.f32 %v920_v23, %v866_v38  ;;  %v1552_v23 = vadd.f32 %v2975_v26, %v2959_v28  ;;  %v3007_v28 = vsel %vm1634_vm12, 1.0, %v5097_v33 }
 0x122   :  { %v693_v46 = vpop.f32.mrf.mxu0  ;;  %v802_v0 = vpop.f32.mrf.mxu1 }
 0x123   :  { %v803_v40 = vadd.f32 %v802_v0, %v685_v60  ;;  %v870_v35 = vpop.f32.mrf.mxu2  ;;  %v926_v4 = vpop.f32.mrf.mxu3  ;;  %v1748_v0 = vadd.f32 %v3024_v17, %v1683_v30  ;;  %v3039_v17 = vsel %vm1764_vm15, 1.0, %v5097_v33  ;;  %vm1567_vm15 = vcmp.eq.s32.totalorder %v4020_v10, %v3208_v14 }
 0x125   :  { %v871_v63 = vadd.f32 %v870_v35, %v803_v40  ;;  %v4067_v40 = vand.u32 4294901760, %v4046_v57 }
 0x127   :  { %v4006_v7 = vadd.f32 %v926_v4, %v871_v63  ;;  %v1813_v63 = vadd.f32 %v3040_v58, %v1748_v0  ;;  %v4074_v4 = vperm.slane %v2943_v16, 7  ;;  %v4089_v16 = vld [vmem:[%s5020_s1 + $0x18] ss:$0 sm:$0xff]  ;;  %v1131_v59 = vsub.f32 %v4046_v57, %v4067_v40 }
 0x128   :  { %vm1960_vm14 = vcmp.eq.s32.totalorder %v4089_v16, %v3193_v8  ;;  %v3055_v0 = vsel %vm1829_vm1, 1.0, %v5097_v33  ;;  %vm1959_vm3 = vcmp.eq.s32.totalorder %v4089_v16, %v3202_v12  ;;  %vm1958_vm12 = vcmp.eq.s32.totalorder %v4089_v16, %v3205_v13 }
 0x129   :  { %vm1895_vm11 = vcmp.eq.s32.totalorder %v4074_v4, %v3193_v8  ;;  %v3088_v42 = vsel %vm1960_vm14, 1.0, %v5097_v33  ;;  %vm1894_vm2 = vcmp.eq.s32.totalorder %v4074_v4, %v3202_v12  ;;  %vm1502_vm14 = vcmp.eq.s32.totalorder %v4004_v61, %v3208_v14 }
 0x12a   :  { %v806_v53 = vpop.f32.mrf.mxu1  ;;  %v1001_v11 = vpop.f32.mrf.mxu0  ;;  %v3072_v19 = vsel %vm1895_vm11, 1.0, %v5097_v33  ;;  %vm1893_vm11 = vcmp.eq.s32.totalorder %v4074_v4, %v3205_v13  ;;  %vm1632_vm1 = vcmp.eq.s32.totalorder %v4028_v47, %v3208_v14 }
 0x12b   :  { %v807_v20 = vadd.f32 %v806_v53, %v693_v46  ;;  %v1002_v36 = vadd.f32 %v1001_v11, %v915_v24  ;;  %v875_v3 = vpop.f32.mrf.mxu2  ;;  %v1100_v46 = vsel %vm1095_vm0, %v24_v29, 0  ;;  %v932_v38 = vpop.f32.mrf.mxu3  ;;  %v2991_v53 = vsel %vm1569_vm8, 1.0, %v5097_v33 }
 0x12c   :  { %v4069_v35 = vand.u32 4294901760, %v1100_v46  ;;  %vm1698_vm8 = vcmp.eq.s32.totalorder %v4042_v48, %v3205_v13 }
 0x12d   :  { %v876_v1 = vadd.f32 %v875_v3, %v807_v20 }
 0x12e   :  { %v4081_v24 = vsub.f32 %v1100_v46, %v4069_v35 }
 0x130   :  { %v4097_v3 = vand.u32 4294901760, %v4081_v24 }
 0x132   :  { %v1005_v45 = vpop.f32.mrf.mxu0  ;;  %v1050_v50 = vpop.f32.mrf.mxu1 }
 0x133   :  { %v1051_v5 = vadd.f32 %v1050_v50, %v1002_v36  ;;  %v1006_v52 = vadd.f32 %v1005_v45, %v921_v44  ;;  %v1617_v44 = vadd.f32 %v2991_v53, %v1552_v23  ;;  %v933_v36 = vadd.f32 %v932_v38, %v876_v1 }
 0x134   :  { %v3023_v1 = vsel %vm1699_vm13, 1.0, %v5097_v33  ;;  %v4138_v38 = vand.u32 4294901760, %v1131_v59  ;;  %vm1453_vm13 = vcmp.eq.s32.totalorder %v4002_v27, %v3208_v14 }
 0x135   :  { %v1071_v60 = vadd.f32 %v1067_v9, %v1051_v5  ;;  %v3056_v9 = vsel %vm1830_vm10, 1.0, %v5097_v33  ;;  %v1103_v5 = vsel %vm1095_vm0, %v25_v18, 0  ;;  %vm1828_vm10 = vcmp.eq.s32.totalorder %v4062_v43, %v3205_v13 }
 0x136   :  { %v1878_v55 = vadd.f32 %v3056_v9, %v1813_v63  ;;  %v4124_v30 = vand.u32 4294901760, %v1103_v5 }
 0x137   :  { %v4064_v56 = vand.u32 4294901760, %v1071_v60 }
 0x138   :  { %v1943_v26 = vadd.f32 %v3072_v19, %v1878_v55  ;;  %5098 = vst [vmem:[#allocation11_spill] sm:$0xff] %v4124_v30  ;;  %v4133_v46 = vsub.f32 %v1103_v5, %v4124_v30 }
 0x139   :  { %v4078_v11 = vsub.f32 %v1071_v60, %v4064_v56 }
 0x13a   :  { %v1009_v20 = vpop.f32.mrf.mxu0  ;;  %v1054_v6 = vpop.f32.mrf.mxu1  ;;  %v2008_v60 = vadd.f32 %v3088_v42, %v1943_v26  ;;  %v2974_v42 = vsel %vm1503_vm5, 1.0, %v5097_v33  ;;  %vm1892_vm5 = vcmp.eq.s32.totalorder %v4074_v4, %v3208_v14 }
 0x13b   :  { %v1055_v54 = vadd.f32 %v1054_v6, %v1006_v52  ;;  %v5054_v32 = vand.u32 4294901760, %v4078_v11  ;;  %v1010_v45 = vadd.f32 %v1009_v20, %v4006_v7  ;;  %v1682_v52 = vadd.f32 %v3007_v28, %v1617_v44 }
 0x13c   :  { %v1139_v7 = vsub.f32 %v4081_v24, %v4097_v3  ;;  %v4140_v63 = vand.u32 4294901760, %v2008_v60  ;;  %v3071_v6 = vsel %vm1894_vm2, 1.0, %v5097_v33  ;;  %vm1697_vm2 = vcmp.eq.s32.totalorder %v4042_v48, %v3208_v14 }
 0x13d   :  { %v1072_v50 = vadd.f32 %v4000_v39, %v1055_v54  ;;  %v4120_v39 = vsub.f32 %v4078_v11, %v5054_v32  ;;  %v1747_v29 = vadd.f32 %v3023_v1, %v1682_v52  ;;  %v4148_v54 = vand.u32 4294901760, %v4133_v46 }
 0x13e   :  { %v4151_v59 = vsub.f32 %v2008_v60, %v4140_v63  ;;  %v4156_v28 = vand.u32 4294901760, %v1139_v7 }
 0x13f   :  { %v4115_v8 = vand.u32 4294901760, %v1072_v50  ;;  %v1812_v53 = vadd.f32 %v3039_v17, %v1747_v29  ;;  %5099 = vst [vmem:[#allocation12_spill] sm:$0xff] %v4148_v54  ;;  %v2990_v29 = vsel %vm1568_vm6, 1.0, %v5097_v33  ;;  %vm1957_vm6 = vcmp.eq.s32.totalorder %v4089_v16, %v3208_v14 }
 0x140   :  { %v5052_v18 = vand.u32 4294901760, %v4151_v59 }
 0x141   :  { %v4130_v23 = vsub.f32 %v1072_v50, %v4115_v8  ;;  %v1877_v19 = vadd.f32 %v3055_v0, %v1812_v53  ;;  %v2958_v50 = vsel %vm1454_vm4, 1.0, %v5097_v33  ;;  %vm1827_vm4 = vcmp.eq.s32.totalorder %v4062_v43, %v3208_v14 }
 0x142   :  { %v1058_v58 = vpop.f32.mrf.mxu1  ;;  %v1013_v55 = vpop.f32.mrf.mxu0  ;;  %v1551_v60 = vadd.f32 %v2974_v42, %v2958_v50 }
 0x143   :  { %v1059_v9 = vadd.f32 %v1058_v58, %v1010_v45  ;;  %v5055_v44 = vand.u32 4294901760, %v4130_v23  ;;  %v3087_v45 = vsel %vm1959_vm3, 1.0, %v5097_v33  ;;  %v1942_v26 = vadd.f32 %v3071_v6, %v1877_v19 }
 0x144   :  { %v1014_v1 = vadd.f32 %v1013_v55, %v933_v36  ;;  %v4182_v36 = vsub.f32 %v4151_v59, %v5052_v18  ;;  %v1616_v53 = vadd.f32 %v2990_v29, %v1551_v60  ;;  %v3038_v60 = vsel %vm1763_vm9, 1.0, %v5097_v33 }
 0x145   :  { %v1073_v12 = vadd.f32 %v4010_v2, %v1059_v9  ;;  %v4170_v2 = vsub.f32 %v4130_v23, %v5055_v44  ;;  %v2007_v7 = vadd.f32 %v3087_v45, %v1942_v26  ;;  %v3006_v9 = vsel %vm1633_vm7, 1.0, %v5097_v33 }
 0x146   :  { %v1681_v50 = vadd.f32 %v3006_v9, %v1616_v53  ;;  %v3054_v53 = vsel %vm1828_vm10, 1.0, %v5097_v33  ;;  %v3005_v19 = vsel %vm1632_vm1, 1.0, %v5097_v33  ;;  %vm1762_vm3 = vcmp.eq.s32.totalorder %v4051_v34, %v3208_v14 }
 0x147   :  { %v4165_v5 = vand.u32 4294901760, %v1073_v12  ;;  %v4188_v58 = vand.u32 4294901760, %v2007_v7  ;;  %v3021_v44 = vsel %vm1697_vm2, 1.0, %v5097_v33  ;;  %vm1501_vm7 = vcmp.eq.s32.totalorder %v4004_v61, %v3211_v15 }
 0x148   :  { %vm1631_vm9 = vcmp.eq.s32.totalorder %v4028_v47, %v3211_v15  ;;  %vm1696_vm10 = vcmp.eq.s32.totalorder %v4042_v48, %v3211_v15  ;;  %vm1500_vm1 = vcmp.eq.s32.totalorder %v4004_v61, %v3230_v21  ;;  %vm1565_vm2 = vcmp.eq.s32.totalorder %v4020_v10, %v3230_v21 }
 0x149   :  { %v4177_v17 = vsub.f32 %v1073_v12, %v4165_v5  ;;  %v3022_v12 = vsel %vm1698_vm8, 1.0, %v5097_v33  ;;  %v4197_v45 = vsub.f32 %v2007_v7, %v4188_v58  ;;  %v27_v7 = vld [vmem:[%s5022_s3] sm:$0xff]  ;;  %vm1566_vm8 = vcmp.eq.s32.totalorder %v4020_v10, %v3211_v15 }
 0x14a   :  { %v1062_v0 = vpop.f32.mrf.mxu1  ;;  %v3020_v14 = vsel %vm1696_vm10, 1.0, %v5097_v33  ;;  %vm1564_vm10 = vcmp.eq.s32.totalorder %v4020_v10, %v3426_v37 }
 0x14b   :  { %v1063_v6 = vadd.f32 %v1062_v0, %v1014_v1  ;;  %v1181_v55 = vand.u32 4294901760, %v4177_v17  ;;  %v5053_v29 = vand.u32 4294901760, %v4197_v45  ;;  %v1746_v0 = vadd.f32 %v3022_v12, %v1681_v50 }
 0x14c   :  { %v2957_v50 = vsel %vm1453_vm13, 1.0, %v5097_v33  ;;  %vm1891_vm13 = vcmp.eq.s32.totalorder %v4074_v4, %v3211_v15 }
 0x14d   :  { %v1074_v26 = vadd.f32 %v4034_v62, %v1063_v6  ;;  %v4207_v1 = vsub.f32 %v4177_v17, %v1181_v55  ;;  %v3070_v62 = vsel %vm1893_vm11, 1.0, %v5097_v33  ;;  %v3143_v6 = vmov 0  }
 0x14e   :  { %3094 = vset.pattern.permute.xlu0 %v3143_v6  ;;  %3095 = vset.pattern.permute.xlu1 %v3143_v6  ;;  %v4226_v18 = vsub.f32 %v4197_v45, %v5053_v29  ;;  %v1811_v12 = vadd.f32 %v3038_v60, %v1746_v0  ;;  %v2973_v6 = vsel %vm1502_vm14, 1.0, %v5097_v33  ;;  %v26_v29 = vld [vmem:[%s5021_s2 + $0x18] sm:$0xff]  ;;  %vm1761_vm11 = vcmp.eq.s32.totalorder %v4051_v34, %v3211_v15 }
 0x14f   :  { %v4216_v9 = vand.u32 4294901760, %v1074_v26  ;;  %1077 = vperm.xlu0 %3094, %v27_v7   ;;  %v3086_v7 = vsel %vm1958_vm12, 1.0, %v5097_v33  ;;  %v1550_v0 = vadd.f32 %v2973_v6, %v2957_v50  ;;  %v1183_v13 = vand.u32 4294901760, %v4207_v1 }
 0x150   :  { %v1876_v60 = vadd.f32 %v3054_v53, %v1811_v12  ;;  %v2084_v53 = vand.u32 4294901760, %v4226_v18  ;;  %v1106_v42 = vsel %vm1095_vm0, %v26_v29, 0  ;;  %v3037_v18 = vsel %vm1762_vm3, 1.0, %v5097_v33 }
 0x151   :  { %v1174_v20 = vsub.f32 %v1074_v26, %v4216_v9  ;;  %1121 = vmatpush.msrb.mxu2 %v4216_v9  ;;  %1272 = vmatpush.msra.mxu1 %v4216_v9  ;;  %v2989_v26 = vsel %vm1567_vm15, 1.0, %v5097_v33  ;;  %vm1452_vm0 = vcmp.eq.s32.totalorder %v4002_v27, %v3211_v15  ;;  %vm1826_vm12 = vcmp.eq.s32.totalorder %v4062_v43, %v3211_v15 }
 0x152   :  { %v1941_v12 = vadd.f32 %v3070_v62, %v1876_v60  ;;  %v1615_v50 = vadd.f32 %v2989_v26, %v1550_v0  ;;  %v3053_v62 = vsel %vm1827_vm4, 1.0, %v5097_v33  ;;  %v4269_v60 = vand.u32 4294901760, %v1106_v42 }
 0x153   :  { %1123 = vmatpush.msrb.mxu2 %v4165_v5  ;;  %1228 = vmatpush.msra.mxu0 %v1174_v20  ;;  %v1175_v32 = vand.u32 4294901760, %v1174_v20  ;;  %v3069_v0 = vsel %vm1892_vm5, 1.0, %v5097_v33  ;;  %vm1956_vm14 = vcmp.eq.s32.totalorder %v4089_v16, %v3211_v15  ;;  %vm1451_vm15 = vcmp.eq.s32.totalorder %v4002_v27, %v3230_v21 }
 0x154   :  { %1274 = vmatpush.msra.mxu1 %v4165_v5  ;;  %v2006_v52 = vadd.f32 %v3086_v7, %v1941_v12  ;;  %v1680_v1 = vadd.f32 %v3005_v19, %v1615_v50  ;;  %5100 = vst [vmem:[#allocation13_spill] sm:$0xff] %v4269_v60  ;;  %v2956_v7 = vsel %vm1452_vm0, 1.0, %v5097_v33  ;;  %v4282_v26 = vsub.f32 %v1106_v42, %v4269_v60 }
 0x155   :  { %1125 = vmatpush.msrb.mxu2 %v4115_v8  ;;  %1231 = vmatpush.msra.mxu0 %v4177_v17  ;;  %v1176_v6 = vsub.f32 %v1174_v20, %v1175_v32  ;;  %v2972_v12 = vsel %vm1501_vm7, 1.0, %v5097_v33  ;;  %v2988_v50 = vsel %vm1566_vm8, 1.0, %v5097_v33  ;;  %v5104_v17 = vand.u32 4294901760, %v4182_v36 }
 0x156   :  { %1276 = vmatpush.msra.mxu1 %v4115_v8  ;;  %v4275_v19 = vand.u32 4294901760, %v2006_v52  ;;  %v1745_v29 = vadd.f32 %v3021_v44, %v1680_v1  ;;  %5101 = vst [vmem:[#allocation14_spill] sm:$0xff] %v4282_v26  ;;  %v4298_v42 = vand.u32 4294901760, %v4282_v26  ;;  %vm1630_vm3 = vcmp.eq.s32.totalorder %v4028_v47, %v3230_v21 }
 0x157   :  { %1127 = vmatpush.msrb.mxu2 %v4064_v56  ;;  %1234 = vmatpush.msra.mxu0 %v4130_v23  ;;  %v1177_v20 = vand.u32 4294901760, %v1176_v6  ;;  %v1549_v6 = vadd.f32 %v2972_v12, %v2956_v7  ;;  %v3085_v7 = vsel %vm1957_vm6, 1.0, %v5097_v33  ;;  %vm1695_vm4 = vcmp.eq.s32.totalorder %v4042_v48, %v3230_v21 }
 0x158   :  { %1278 = vmatpush.msra.mxu1 %v4064_v56  ;;  %1133 = vmatmul.f32.vlgmr.msrb.gmra.mxu2 %v4138_v38  ;;  %v4291_v44 = vsub.f32 %v2006_v52, %v4275_v19  ;;  %5102 = vst [vmem:[#allocation15_spill] sm:$0xff] %v4298_v42  ;;  %v5103_v52 = vsub.f32 %v4133_v46, %v4148_v54 }
 0x159   :  { %1319 = vmatpush.msra.mxu2 %v1175_v32  ;;  %1178 = vmatpush.msrb.mxu3 %v1177_v20  ;;  %v1810_v32 = vadd.f32 %v3037_v18, %v1745_v29  ;;  %v3004_v18 = vsel %vm1631_vm9, 1.0, %v5097_v33  ;;  %v5105_v20 = vand.u32 4294901760, %v4130_v23  ;;  %v5106_v29 = vand.u32 4294901760, %v4170_v2 }
 0x15a   :  { %1237 = vmatpush.msra.mxu0 %v4078_v11  ;;  %1282 = vmatmul.f32.vlgmr.msra.gmra.mxu1 %v4067_v40  ;;  %v4307_v1 = vand.u32 4294901760, %v5103_v52  ;;  %v1155_v36 = vsub.f32 %v4282_v26, %v4298_v42  ;;  %v1614_v12 = vadd.f32 %v2988_v50, %v1549_v6  ;;  %v3036_v6 = vsel %vm1761_vm11, 1.0, %v5097_v33 }
 0x15b   :  { %1323 = vmatpush.msra.mxu2 %v1181_v55  ;;  %1184 = vmatpush.msrb.mxu3 %v1183_v13  ;;  %v5061_v55 = vand.u32 4294901760, %v4291_v44  ;;  %v1875_v13 = vadd.f32 %v3053_v62, %v1810_v32  ;;  %v5107_v62 = vand.u32 4294901760, %v4078_v11  ;;  %v5108_v32 = vand.u32 4294901760, %v4120_v39 }
 0x15c   :  { %1240 = vmatmul.f32.vlgmr.msra.gmra.mxu0 %v4046_v57  ;;  %2079 = vmatpush.msrb.mxu1 %v5104_v17  ;;  %v1679_v50 = vadd.f32 %v3004_v18, %v1614_v12  ;;  %v3052_v11 = vsel %vm1826_vm12, 1.0, %v5097_v33  ;;  %v3068_v17 = vsel %vm1891_vm13, 1.0, %v5097_v33  ;;  %v2955_v18 = vsel %vm1451_vm15, 1.0, %v5097_v33 }
 0x15d   :  { %1327 = vmatpush.msra.mxu2 %v5105_v20  ;;  %1190 = vmatpush.msrb.mxu3 %v5106_v29  ;;  %v2089_v23 = vsub.f32 %v4291_v44, %v5061_v55  ;;  %v1940_v2 = vadd.f32 %v3069_v0, %v1875_v13  ;;  %v2971_v20 = vsel %vm1500_vm1, 1.0, %v5097_v33  ;;  %v3003_v12 = vsel %vm1630_vm3, 1.0, %v5097_v33 }
 0x15e   :  { %2010 = vmatpush.msrb.mxu0 %v4140_v63  ;;  %2085 = vmatpush.msrb.mxu1 %v2084_v53  ;;  %v4340_v53 = vand.u32 4294901760, %v1155_v36  ;;  %v1744_v39 = vadd.f32 %v3020_v14, %v1679_v50  ;;  %v1548_v29 = vadd.f32 %v2971_v20, %v2955_v18  ;;  %vm1760_vm5 = vcmp.eq.s32.totalorder %v4051_v34, %v3230_v21 }
 0x15f   :  { %1331 = vmatpush.msra.mxu2 %v5107_v62  ;;  %1196 = vmatpush.msrb.mxu3 %v5108_v32  ;;  %v2090_v0 = vand.u32 4294901760, %v2089_v23  ;;  %v2005_v52 = vadd.f32 %v3085_v7, %v1940_v2  ;;  %v2987_v7 = vsel %vm1565_vm2, 1.0, %v5097_v33  ;;  %v3084_v23 = vsel %vm1956_vm14, 1.0, %v5097_v33 }
 0x160   :  { %5109 = vst [vmem:[#allocation16_spill] sm:$0xff] %v4340_v53  ;;  %1141 = vmatmul.f32.gmra.mxu2 %v4156_v28  ;;  %1198 = vmatmul.f32.vlgmr.msrb.gmra.mxu3 %v4022_v22  ;;  %v1613_v2 = vadd.f32 %v2987_v7, %v1548_v29  ;;  %v3019_v14 = vsel %vm1695_vm4, 1.0, %v5097_v33  ;;  %v3035_v32 = vsel %vm1760_vm5, 1.0, %v5097_v33  ;;  %vm1825_vm0 = vcmp.eq.s32.totalorder %v4062_v43, %v3230_v21 }
 0x161   :  { %1362 = vmatpush.msra.mxu3 %v4216_v9  ;;  %2012 = vmatpush.msrb.mxu0 %v4188_v58  ;;  %v4357_v13 = vand.u32 4294901760, %v2005_v52  ;;  %v1809_v9 = vadd.f32 %v3036_v6, %v1744_v39  ;;  %vm1890_vm6 = vcmp.eq.s32.totalorder %v4074_v4, %v3230_v21  ;;  %v3051_v50 = vsel %vm1825_vm0, 1.0, %v5097_v33 }
 0x162   :  { %2091 = vmatpush.msrb.mxu1 %v2090_v0  ;;  %2189 = vmatpush.msrb.mxu2 %v4151_v59  ;;  %v1678_v15 = vadd.f32 %v3003_v12, %v1613_v2  ;;  %vm1955_vm7 = vcmp.eq.s32.totalorder %v4089_v16, %v3230_v21  ;;  %v3067_v0 = vsel %vm1890_vm6, 1.0, %v5097_v33  ;;  %vm1450_vm8 = vcmp.eq.s32.totalorder %v4002_v27, %v3426_v37  ;;  %v28_v12 = vld [vmem:[%s5022_s3 + $0x8] sm:$0xff] }
 0x163   :  { %1364 = vmatpush.msra.mxu3 %v4165_v5  ;;  %2014 = vmatpush.msrb.mxu0 %v4275_v19  ;;  %v4370_v36 = vsub.f32 %v2005_v52, %v4357_v13  ;;  %v1874_v5 = vadd.f32 %v3052_v11, %v1809_v9  ;;  %vm1499_vm9 = vcmp.eq.s32.totalorder %v4004_v61, %v3426_v37  ;;  %v2954_v11 = vsel %vm1450_vm8, 1.0, %v5097_v33 }
 0x164   :  { %1245 = vmatmul.f32.gmra.mxu0 %v4081_v24  ;;  %1288 = vmatmul.f32.gmra.mxu1 %v4097_v3  ;;  %v1743_v52 = vadd.f32 %v3019_v14, %v1678_v15  ;;  %v2970_v39 = vsel %vm1499_vm9, 1.0, %v5097_v33  ;;  %vm1629_vm11 = vcmp.eq.s32.totalorder %v4028_v47, %v3426_v37  ;;  %v2986_v29 = vsel %vm1564_vm10, 1.0, %v5097_v33 }
 0x165   :  { %1366 = vmatpush.msra.mxu3 %v4115_v8  ;;  %2016 = vmatpush.msrb.mxu0 %v4357_v13  ;;  %v5060_v62 = vand.u32 4294901760, %v4370_v36  ;;  %v1939_v8 = vadd.f32 %v3068_v17, %v1874_v5  ;;  %v1547_v18 = vadd.f32 %v2970_v39, %v2954_v11  ;;  %v3002_v7 = vsel %vm1629_vm11, 1.0, %v5097_v33 }
 0x166   :  { %2192 = vmatpush.msrb.mxu2 %v4197_v45  ;;  %v1808_v9 = vadd.f32 %v3035_v32, %v1743_v52  ;;  %vm1694_vm12 = vcmp.eq.s32.totalorder %v4042_v48, %v3426_v37  ;;  %vm1759_vm13 = vcmp.eq.s32.totalorder %v4051_v34, %v3426_v37  ;;  %vm1824_vm14 = vcmp.eq.s32.totalorder %v4062_v43, %v3426_v37 }
 0x167   :  { %1368 = vmatpush.msra.mxu3 %v4064_v56  ;;  %v2095_v6 = vsub.f32 %v4370_v36, %v5060_v62  ;;  %v2004_v56 = vadd.f32 %v3084_v23, %v1939_v8  ;;  %v1612_v5 = vadd.f32 %v2986_v29, %v1547_v18  ;;  %v3018_v14 = vsel %vm1694_vm12, 1.0, %v5097_v33  ;;  %1082 = vperm.xlu0 %3094, %v28_v12  }
 0x168   :  { %1149 = vmatmul.f32.gmra.mxu2 %v4307_v1  ;;  %1202 = vmatmul.f32.gmra.mxu3 %v4069_v35  ;;  %v1873_v2 = vadd.f32 %v3051_v50, %v1808_v9  ;;  %v3083_v32 = vsel %vm1955_vm7, 1.0, %v5097_v33  ;;  %v3034_v15 = vsel %vm1759_vm13, 1.0, %v5097_v33  ;;  %vm1889_vm15 = vcmp.eq.s32.totalorder %v4074_v4, %v3426_v37 }
 0x169   :  { %2195 = vmatpush.msrb.mxu2 %v4291_v44  ;;  %2257 = vmatpush.msrb.mxu3 %v4140_v63  ;;  %v2096_v17 = vand.u32 4294901760, %v2095_v6  ;;  %v4415_v20 = vand.u32 4294901760, %v2004_v56  ;;  %v1677_v8 = vadd.f32 %v3002_v7, %v1612_v5  ;;  %vm1954_vm1 = vcmp.eq.s32.totalorder %v4089_v16, %v3426_v37 }
 0x16a   :  { %v1938_v6 = vadd.f32 %v3067_v0, %v1873_v2  ;;  %v3066_v52 = vsel %vm1889_vm15, 1.0, %v5097_v33  ;;  %vm1449_vm2 = vcmp.eq.s32.totalorder %v4002_v27, %v3434_v41  ;;  %vm1498_vm3 = vcmp.eq.s32.totalorder %v4004_v61, %v3434_v41 }
 0x16b   :  { %2198 = vmatpush.msrb.mxu2 %v4370_v36  ;;  %2259 = vmatpush.msrb.mxu3 %v4188_v58  ;;  %v4432_v23 = vsub.f32 %v2004_v56, %v4415_v20  ;;  %v3050_v56 = vsel %vm1824_vm14, 1.0, %v5097_v33  ;;  %v1742_v21 = vadd.f32 %v3018_v14, %v1677_v8  ;;  %v2953_v39 = vsel %vm1449_vm2, 1.0, %v5097_v33 }
 0x16c   :  { %2097 = vmatpush.msrb.mxu1 %v2096_v17  ;;  %2018 = vmatpush.msrb.mxu0 %v4415_v20  ;;  %v2003_v11 = vadd.f32 %v3083_v32, %v1938_v6  ;;  %v2969_v17 = vsel %vm1498_vm3, 1.0, %v5097_v33  ;;  %vm1563_vm4 = vcmp.eq.s32.totalorder %v4020_v10, %v3434_v41  ;;  %vm1628_vm5 = vcmp.eq.s32.totalorder %v4028_v47, %v3434_v41 }
 0x16d   :  { %1250 = vmatmul.f32.gmra.mxu0 %v4133_v46  ;;  %1294 = vmatmul.f32.gmra.mxu1 %v4148_v54  ;;  %v5058_v50 = vand.u32 4294901760, %v4432_v23  ;;  %v1807_v18 = vadd.f32 %v3034_v15, %v1742_v21  ;;  %v1546_v9 = vadd.f32 %v2969_v17, %v2953_v39  ;;  %v2985_v12 = vsel %vm1563_vm4, 1.0, %v5097_v33 }
 0x16e   :  { %2201 = vmatpush.msrb.mxu2 %v4432_v23  ;;  %2261 = vmatpush.msrb.mxu3 %v4275_v19  ;;  %v4467_v7 = vand.u32 4294901760, %v2003_v11  ;;  %v3001_v5 = vsel %vm1628_vm5, 1.0, %v5097_v33  ;;  %vm1693_vm0 = vcmp.eq.s32.totalorder %v4042_v48, %v3434_v41  ;;  %vm1758_vm6 = vcmp.eq.s32.totalorder %v4051_v34, %v3434_v41 }
 0x16f   :  { %v2101_v0 = vsub.f32 %v4432_v23, %v5058_v50  ;;  %v1872_v2 = vadd.f32 %v3050_v56, %v1807_v18  ;;  %v1611_v14 = vadd.f32 %v2985_v12, %v1546_v9  ;;  %v3082_v8 = vsel %vm1954_vm1, 1.0, %v5097_v33 }
 0x170   :  { %1157 = vmatmul.f32.gmra.mxu2 %v4340_v53  ;;  %1206 = vmatmul.f32.gmra.mxu3 %v4124_v30  ;;  %v4478_v32 = vsub.f32 %v2003_v11, %v4467_v7  ;;  %v3017_v15 = vsel %vm1693_vm0, 1.0, %v5097_v33  ;;  %vm1823_vm7 = vcmp.eq.s32.totalorder %v4062_v43, %v3434_v41  ;;  %v3033_v21 = vsel %vm1758_vm6, 1.0, %v5097_v33 }
 0x171   :  { %2263 = vmatpush.msrb.mxu3 %v4357_v13  ;;  %v2102_v29 = vand.u32 4294901760, %v2101_v0  ;;  %2020 = vmatpush.msrb.mxu0 %v4467_v7  ;;  %v1937_v6 = vadd.f32 %v3066_v52, %v1872_v2  ;;  %v1676_v56 = vadd.f32 %v3001_v5, %v1611_v14  ;;  %vm1888_vm8 = vcmp.eq.s32.totalorder %v4074_v4, %v3434_v41 }
 0x172   :  { %v5057_v0 = vand.u32 4294901760, %v4478_v32  ;;  %v3049_v37 = vsel %vm1823_vm7, 1.0, %v5097_v33  ;;  %v3065_v11 = vsel %vm1888_vm8, 1.0, %v5097_v33  ;;  %vm1448_vm9 = vcmp.eq.s32.totalorder %v4002_v27, %v3515_v51  ;;  %2204 = vmatpush.msrb.mxu2 %v4478_v32 }
 0x173   :  { %2265 = vmatpush.msrb.mxu3 %v4415_v20  ;;  %2103 = vmatpush.msrb.mxu1 %v2102_v29  ;;  %v2002_v52 = vadd.f32 %v3082_v8, %v1937_v6  ;;  %v1741_v39 = vadd.f32 %v3017_v15, %v1676_v56  ;;  %vm1953_vm10 = vcmp.eq.s32.totalorder %v4089_v16, %v3434_v41  ;;  %v2952_v17 = vsel %vm1448_vm9, 1.0, %v5097_v33 }
 0x174   :  { %v2107_v18 = vsub.f32 %v4478_v32, %v5057_v0  ;;  %vm1497_vm11 = vcmp.eq.s32.totalorder %v4004_v61, %v3515_v51  ;;  %vm1562_vm12 = vcmp.eq.s32.totalorder %v4020_v10, %v3515_v51  ;;  %vm1627_vm13 = vcmp.eq.s32.totalorder %v4028_v47, %v3515_v51 }
 0x175   :  { %1255 = vmatmul.f32.gmra.mxu0 %v4282_v26  ;;  %1300 = vmatmul.f32.gmra.mxu1 %v4298_v42  ;;  %v4513_v41 = vand.u32 4294901760, %v2002_v52  ;;  %v1806_v9 = vadd.f32 %v3033_v21, %v1741_v39  ;;  %v2968_v29 = vsel %vm1497_vm11, 1.0, %v5097_v33  ;;  %v2984_v12 = vsel %vm1562_vm12, 1.0, %v5097_v33 }
 0x176   :  { %2267 = vmatpush.msrb.mxu3 %v4467_v7  ;;  %v2108_v5 = vand.u32 4294901760, %v2107_v18  ;;  %v3081_v2 = vsel %vm1953_vm10, 1.0, %v5097_v33  ;;  %v1545_v14 = vadd.f32 %v2968_v29, %v2952_v17  ;;  %vm1692_vm14 = vcmp.eq.s32.totalorder %v4042_v48, %v3515_v51 }
 0x177   :  { %2022 = vmatpush.msrb.mxu0 %v4513_v41  ;;  %v4522_v8 = vsub.f32 %v2002_v52, %v4513_v41  ;;  %v1871_v15 = vadd.f32 %v3049_v37, %v1806_v9  ;;  %v3000_v6 = vsel %vm1627_vm13, 1.0, %v5097_v33  ;;  %vm1757_vm15 = vcmp.eq.s32.totalorder %v4051_v34, %v3515_v51 }
 0x178   :  { %1210 = vmatmul.f32.gmra.mxu3 %v4269_v60  ;;  %1333 = vmatmul.f32.vlgmr.msra.gmra.mxu2 %v4022_v22  ;;  %v1610_v56 = vadd.f32 %v2984_v12, %v1545_v14  ;;  %v3016_v21 = vsel %vm1692_vm14, 1.0, %v5097_v33  ;;  %vm1822_vm1 = vcmp.eq.s32.totalorder %v4062_v43, %v3515_v51  ;;  %vm1887_vm2 = vcmp.eq.s32.totalorder %v4074_v4, %v3515_v51 }
 0x179   :  { %2269 = vmatpush.msrb.mxu3 %v4513_v41  ;;  %2109 = vmatpush.msrb.mxu1 %v2108_v5  ;;  %v5056_v52 = vand.u32 4294901760, %v4522_v8  ;;  %v1936_v37 = vadd.f32 %v3065_v11, %v1871_v15  ;;  %v3032_v39 = vsel %vm1757_vm15, 1.0, %v5097_v33  ;;  %v3048_v17 = vsel %vm1822_vm1, 1.0, %v5097_v33 }
 0x17a   :  { %2207 = vmatpush.msrb.mxu2 %v4522_v8  ;;  %v1675_v18 = vadd.f32 %v3000_v6, %v1610_v56  ;;  %v3064_v9 = vsel %vm1887_vm2, 1.0, %v5097_v33  ;;  %vm1447_vm3 = vcmp.eq.s32.totalorder %v4002_v27, %v3539_v25  ;;  %vm1496_vm4 = vcmp.eq.s32.totalorder %v4004_v61, %v3539_v25 }
 0x17b   :  { %v2113_v29 = vsub.f32 %v4522_v8, %v5056_v52  ;;  %v2001_v11 = vadd.f32 %v3081_v2, %v1936_v37  ;;  %vm1952_vm5 = vcmp.eq.s32.totalorder %v4089_v16, %v3515_v51  ;;  %v2951_v12 = vsel %vm1447_vm3, 1.0, %v5097_v33 }
 0x17c   :  { %v1740_v5 = vadd.f32 %v3016_v21, %v1675_v18  ;;  %v2967_v14 = vsel %vm1496_vm4, 1.0, %v5097_v33  ;;  %vm1561_vm0 = vcmp.eq.s32.totalorder %v4020_v10, %v3539_v25  ;;  %vm1626_vm6 = vcmp.eq.s32.totalorder %v4028_v47, %v3539_v25 }
 0x17d   :  { %v2114_v15 = vand.u32 4294901760, %v2113_v29  ;;  %v4555_v2 = vand.u32 4294901760, %v2001_v11  ;;  %v1544_v6 = vadd.f32 %v2967_v14, %v2951_v12  ;;  %v2983_v56 = vsel %vm1561_vm0, 1.0, %v5097_v33 }
 0x17e   :  { %v1805_v37 = vadd.f32 %v3032_v39, %v1740_v5  ;;  %v2999_v52 = vsel %vm1626_vm6, 1.0, %v5097_v33  ;;  %vm1691_vm7 = vcmp.eq.s32.totalorder %v4042_v48, %v3539_v25  ;;  %vm1756_vm8 = vcmp.eq.s32.totalorder %v4051_v34, %v3539_v25 }
 0x17f   :  { %2115 = vmatpush.msrb.mxu1 %v2114_v15  ;;  %2024 = vmatpush.msrb.mxu0 %v4555_v2  ;;  %v4565_v21 = vsub.f32 %v2001_v11, %v4555_v2  ;;  %v3080_v18 = vsel %vm1952_vm5, 1.0, %v5097_v33  ;;  %v1609_v39 = vadd.f32 %v2983_v56, %v1544_v6  ;;  %v3015_v29 = vsel %vm1691_vm7, 1.0, %v5097_v33  ;;  %v5110_v6 = vld [vmem:[#allocation7_spill] sm:$0xff] }
 0x180   :  { %1337 = vmatmul.f32.gmra.mxu2 %v4069_v35  ;;  %1370 = vmatmul.f32.vlgmr.msra.gmra.mxu3 %v4022_v22  ;;  %v1870_v12 = vadd.f32 %v3048_v17, %v1805_v37  ;;  %v3031_v5 = vsel %vm1756_vm8, 1.0, %v5097_v33  ;;  %vm1821_vm9 = vcmp.eq.s32.totalorder %v4062_v43, %v3539_v25  ;;  %vm1886_vm10 = vcmp.eq.s32.totalorder %v4074_v4, %v3539_v25 }
 0x181   :  { %2271 = vmatpush.msrb.mxu3 %v4555_v2  ;;  %v5059_v11 = vand.u32 4294901760, %v4565_v21  ;;  %v1674_v14 = vadd.f32 %v2999_v52, %v1609_v39  ;;  %v3047_v51 = vsel %vm1821_vm9, 1.0, %v5097_v33  ;;  %vm1951_vm11 = vcmp.eq.s32.totalorder %v4089_v16, %v3539_v25  ;;  %2210 = vmatpush.msrb.mxu2 %v4565_v21 }
 0x182   :  { %v1935_v17 = vadd.f32 %v3064_v9, %v1870_v12  ;;  %v3063_v15 = vsel %vm1886_vm10, 1.0, %v5097_v33  ;;  %vm1446_vm12 = vcmp.eq.s32.totalorder %v4002_v27, %v5110_v6  ;;  %vm1495_vm13 = vcmp.eq.s32.totalorder %v4004_v61, %v5110_v6 }
 0x183   :  { %v2119_v52 = vsub.f32 %v4565_v21, %v5059_v11  ;;  %v1739_v56 = vadd.f32 %v3015_v29, %v1674_v14  ;;  %v2950_v37 = vsel %vm1446_vm12, 1.0, %v5097_v33  ;;  %v2966_v39 = vsel %vm1495_vm13, 1.0, %v5097_v33 }
 0x184   :  { %v2000_v9 = vadd.f32 %v3080_v18, %v1935_v17  ;;  %v1543_v12 = vadd.f32 %v2966_v39, %v2950_v37  ;;  %vm1560_vm14 = vcmp.eq.s32.totalorder %v4020_v10, %v5110_v6  ;;  %vm1625_vm15 = vcmp.eq.s32.totalorder %v4028_v47, %v5110_v6  ;;  %v29_v18 = vld [vmem:[%s5022_s3 + $0x10] sm:$0xff] }
 0x185   :  { %v2120_v0 = vand.u32 4294901760, %v2119_v52  ;;  %v1804_v50 = vadd.f32 %v3031_v5, %v1739_v56  ;;  %v2982_v29 = vsel %vm1560_vm14, 1.0, %v5097_v33  ;;  %v2998_v14 = vsel %vm1625_vm15, 1.0, %v5097_v33  ;;  %1087 = vperm.xlu1 %3095, %v29_v18   ;;  %v5111_v39 = vld [vmem:[#allocation8_spill] sm:$0xff] }
 0x186   :  { %v4601_v11 = vand.u32 4294901760, %v2000_v9  ;;  %v1608_v62 = vadd.f32 %v2982_v29, %v1543_v12  ;;  %vm1690_vm1 = vcmp.eq.s32.totalorder %v4042_v48, %v5110_v6  ;;  %vm1755_vm2 = vcmp.eq.s32.totalorder %v4051_v34, %v5110_v6 }
 0x187   :  { %2121 = vmatpush.msrb.mxu1 %v2120_v0  ;;  %v1869_v17 = vadd.f32 %v3047_v51, %v1804_v50  ;;  %v3079_v5 = vsel %vm1951_vm11, 1.0, %v5097_v33  ;;  %v3014_v52 = vsel %vm1690_vm1, 1.0, %v5097_v33  ;;  %vm1820_vm3 = vcmp.eq.s32.totalorder %v4062_v43, %v5110_v6 }
 0x188   :  { %1341 = vmatmul.f32.gmra.mxu2 %v4124_v30  ;;  %1374 = vmatmul.f32.gmra.mxu3 %v4069_v35  ;;  %v4619_v56 = vsub.f32 %v2000_v9, %v4601_v11  ;;  %v1673_v37 = vadd.f32 %v2998_v14, %v1608_v62  ;;  %v3030_v0 = vsel %vm1755_vm2, 1.0, %v5097_v33  ;;  %vm1885_vm4 = vcmp.eq.s32.totalorder %v4074_v4, %v5110_v6 }
 0x189   :  { %2026 = vmatpush.msrb.mxu0 %v4601_v11  ;;  %2273 = vmatpush.msrb.mxu3 %v4601_v11  ;;  %v1934_v25 = vadd.f32 %v3063_v15, %v1869_v17  ;;  %v3046_v50 = vsel %vm1820_vm3, 1.0, %v5097_v33  ;;  %v3062_v51 = vsel %vm1885_vm4, 1.0, %v5097_v33  ;;  %vm1445_vm5 = vcmp.eq.s32.totalorder %v4002_v27, %v5111_v39 }
 0x18a   :  { %v5062_v12 = vand.u32 4294901760, %v4619_v56  ;;  %v1738_v9 = vadd.f32 %v3014_v52, %v1673_v37  ;;  %vm1950_vm0 = vcmp.eq.s32.totalorder %v4089_v16, %v5110_v6  ;;  %v2949_v62 = vsel %vm1445_vm5, 1.0, %v5097_v33  ;;  %2213 = vmatpush.msrb.mxu2 %v4619_v56 }
 0x18b   :  { %v1999_v29 = vadd.f32 %v3079_v5, %v1934_v25  ;;  %vm1494_vm6 = vcmp.eq.s32.totalorder %v4004_v61, %v5111_v39  ;;  %vm1559_vm7 = vcmp.eq.s32.totalorder %v4020_v10, %v5111_v39  ;;  %vm1624_vm8 = vcmp.eq.s32.totalorder %v4028_v47, %v5111_v39 }
 0x18c   :  { %v2125_v15 = vsub.f32 %v4619_v56, %v5062_v12  ;;  %v1803_v6 = vadd.f32 %v3030_v0, %v1738_v9  ;;  %v2965_v14 = vsel %vm1494_vm6, 1.0, %v5097_v33  ;;  %v2981_v18 = vsel %vm1559_vm7, 1.0, %v5097_v33 }
 0x18d   :  { %v4647_v17 = vand.u32 4294901760, %v1999_v29  ;;  %v3078_v5 = vsel %vm1950_vm0, 1.0, %v5097_v33  ;;  %v1542_v52 = vadd.f32 %v2965_v14, %v2949_v62  ;;  %vm1689_vm9 = vcmp.eq.s32.totalorder %v4042_v48, %v5111_v39 }
 0x18e   :  { %v2126_v37 = vand.u32 4294901760, %v2125_v15  ;;  %v1868_v25 = vadd.f32 %v3046_v50, %v1803_v6  ;;  %v2997_v55 = vsel %vm1624_vm8, 1.0, %v5097_v33  ;;  %vm1754_vm10 = vcmp.eq.s32.totalorder %v4051_v34, %v5111_v39 }
 0x18f   :  { %2028 = vmatpush.msrb.mxu0 %v4647_v17  ;;  %v4657_v0 = vsub.f32 %v1999_v29, %v4647_v17  ;;  %v1607_v9 = vadd.f32 %v2981_v18, %v1542_v52  ;;  %v3013_v12 = vsel %vm1689_vm9, 1.0, %v5097_v33  ;;  %vm1819_vm11 = vcmp.eq.s32.totalorder %v4062_v43, %v5111_v39  ;;  %2275 = vmatpush.msrb.mxu3 %v4647_v17  ;;  %v5112_v52 = vld [vmem:[#allocation9_spill] sm:$0xff] }
 0x190   :  { %1345 = vmatmul.f32.gmra.mxu2 %v4269_v60  ;;  %1378 = vmatmul.f32.gmra.mxu3 %v4124_v30  ;;  %v1933_v50 = vadd.f32 %v3062_v51, %v1868_v25  ;;  %v3029_v62 = vsel %vm1754_vm10, 1.0, %v5097_v33  ;;  %v3045_v15 = vsel %vm1819_vm11, 1.0, %v5097_v33  ;;  %vm1884_vm12 = vcmp.eq.s32.totalorder %v4074_v4, %v5111_v39 }
 0x191   :  { %2127 = vmatpush.msrb.mxu1 %v2126_v37  ;;  %v5066_v29 = vand.u32 4294901760, %v4657_v0  ;;  %v1672_v6 = vadd.f32 %v2997_v55, %v1607_v9  ;;  %v3061_v14 = vsel %vm1884_vm12, 1.0, %v5097_v33  ;;  %vm1949_vm13 = vcmp.eq.s32.totalorder %v4089_v16, %v5111_v39  ;;  %2216 = vmatpush.msrb.mxu2 %v4657_v0 }
 0x192   :  { %v1998_v18 = vadd.f32 %v3078_v5, %v1933_v50  ;;  %vm1444_vm14 = vcmp.eq.s32.totalorder %v4002_v27, %v5112_v52  ;;  %vm1493_vm15 = vcmp.eq.s32.totalorder %v4004_v61, %v5112_v52  ;;  %vm1558_vm1 = vcmp.eq.s32.totalorder %v4020_v10, %v5112_v52 }
 0x193   :  { %v2131_v55 = vsub.f32 %v4657_v0, %v5066_v29  ;;  %v1737_v51 = vadd.f32 %v3013_v12, %v1672_v6  ;;  %v2948_v37 = vsel %vm1444_vm14, 1.0, %v5097_v33  ;;  %v2964_v25 = vsel %vm1493_vm15, 1.0, %v5097_v33 }
 0x194   :  { %v4683_v9 = vand.u32 4294901760, %v1998_v18  ;;  %v1541_v5 = vadd.f32 %v2964_v25, %v2948_v37  ;;  %v2980_v50 = vsel %vm1558_vm1, 1.0, %v5097_v33  ;;  %vm1623_vm2 = vcmp.eq.s32.totalorder %v4028_v47, %v5112_v52 }
 0x195   :  { %v2132_v42 = vand.u32 4294901760, %v2131_v55  ;;  %v1802_v53 = vadd.f32 %v3029_v62, %v1737_v51  ;;  %v2996_v26 = vsel %vm1623_vm2, 1.0, %v5097_v33  ;;  %vm1688_vm3 = vcmp.eq.s32.totalorder %v4042_v48, %v5112_v52 }
 0x196   :  { %2030 = vmatpush.msrb.mxu0 %v4683_v9  ;;  %v4694_v12 = vsub.f32 %v1998_v18, %v4683_v9  ;;  %v3077_v6 = vsel %vm1949_vm13, 1.0, %v5097_v33  ;;  %v1606_v37 = vadd.f32 %v2980_v50, %v1541_v5  ;;  %vm1753_vm4 = vcmp.eq.s32.totalorder %v4051_v34, %v5112_v52  ;;  %2277 = vmatpush.msrb.mxu3 %v4683_v9 }
 0x197   :  { %2133 = vmatpush.msrb.mxu1 %v2132_v42  ;;  %v1867_v62 = vadd.f32 %v3045_v15, %v1802_v53  ;;  %v3012_v55 = vsel %vm1688_vm3, 1.0, %v5097_v33  ;;  %vm1818_vm5 = vcmp.eq.s32.totalorder %v4062_v43, %v5112_v52  ;;  %vm1883_vm0 = vcmp.eq.s32.totalorder %v4074_v4, %v5112_v52  ;;  %v5113_v53 = vld [vmem:[#allocation10_spill] sm:$0xff] }
 0x198   :  { %1382 = vmatmul.f32.gmra.mxu3 %v4269_v60  ;;  %v5069_v18 = vand.u32 4294901760, %v4694_v12  ;;  %v1671_v39 = vadd.f32 %v2996_v26, %v1606_v37  ;;  %v3028_v51 = vsel %vm1753_vm4, 1.0, %v5097_v33  ;;  %v3044_v25 = vsel %vm1818_vm5, 1.0, %v5097_v33  ;;  %2219 = vmatpush.msrb.mxu2 %v4694_v12 }
 0x199   :  { %v1932_v5 = vadd.f32 %v3061_v14, %v1867_v62  ;;  %v3060_v42 = vsel %vm1883_vm0, 1.0, %v5097_v33  ;;  %vm1443_vm6 = vcmp.eq.s32.totalorder %v4002_v27, %v5113_v53  ;;  %vm1492_vm7 = vcmp.eq.s32.totalorder %v4004_v61, %v5113_v53 }
 0x19a   :  { %v2137_v15 = vsub.f32 %v4694_v12, %v5069_v18  ;;  %v1736_v26 = vadd.f32 %v3012_v55, %v1671_v39  ;;  %vm1948_vm8 = vcmp.eq.s32.totalorder %v4089_v16, %v5112_v52  ;;  %v2947_v50 = vsel %vm1443_vm6, 1.0, %v5097_v33 }
 0x19b   :  { %v1997_v37 = vadd.f32 %v3077_v6, %v1932_v5  ;;  %v2963_v14 = vsel %vm1492_vm7, 1.0, %v5097_v33  ;;  %vm1557_vm9 = vcmp.eq.s32.totalorder %v4020_v10, %v5113_v53  ;;  %vm1622_vm10 = vcmp.eq.s32.totalorder %v4028_v47, %v5113_v53 }
 0x19c   :  { %v2138_v62 = vand.u32 4294901760, %v2137_v15  ;;  %v1801_v29 = vadd.f32 %v3028_v51, %v1736_v26  ;;  %v1540_v60 = vadd.f32 %v2963_v14, %v2947_v50  ;;  %v2979_v18 = vsel %vm1557_vm9, 1.0, %v5097_v33 }
 0x19d   :  { %v4729_v55 = vand.u32 4294901760, %v1997_v37  ;;  %v2995_v39 = vsel %vm1622_vm10, 1.0, %v5097_v33  ;;  %vm1687_vm11 = vcmp.eq.s32.totalorder %v4042_v48, %v5113_v53  ;;  %vm1752_vm12 = vcmp.eq.s32.totalorder %v4051_v34, %v5113_v53 }
 0x19e   :  { %2139 = vmatpush.msrb.mxu1 %v2138_v62  ;;  %v1866_v6 = vadd.f32 %v3044_v25, %v1801_v29  ;;  %v3076_v51 = vsel %vm1948_vm8, 1.0, %v5097_v33  ;;  %v1605_v5 = vadd.f32 %v2979_v18, %v1540_v60  ;;  %v3011_v15 = vsel %vm1687_vm11, 1.0, %v5097_v33  ;;  %v4754_v60 = vld [vmem:[%s5020_s1 + $0x18] ss:$0 sm:$0xff] }
 0x19f   :  { %2032 = vmatpush.msrb.mxu0 %v4729_v55  ;;  %v4743_v26 = vsub.f32 %v1997_v37, %v4729_v55  ;;  %v3027_v50 = vsel %vm1752_vm12, 1.0, %v5097_v33  ;;  %vm1817_vm13 = vcmp.eq.s32.totalorder %v4062_v43, %v5113_v53  ;;  %vm1882_vm14 = vcmp.eq.s32.totalorder %v4074_v4, %v5113_v53  ;;  %2279 = vmatpush.msrb.mxu3 %v4729_v55 }
 0x1a0   :  { %v1931_v29 = vadd.f32 %v3060_v42, %v1866_v6  ;;  %v1670_v25 = vadd.f32 %v2995_v39, %v1605_v5  ;;  %v3043_v16 = vsel %vm1817_vm13, 1.0, %v5097_v33  ;;  %vm1947_vm15 = vcmp.eq.s32.totalorder %v4754_v60, %v5113_v53 }
 0x1a1   :  { %v5072_v52 = vand.u32 4294901760, %v4743_v26  ;;  %v3059_v18 = vsel %vm1882_vm14, 1.0, %v5097_v33  ;;  %vm1442_vm1 = vcmp.eq.s32.totalorder %v4002_v27, %v3759_v31  ;;  %vm1491_vm2 = vcmp.eq.s32.totalorder %v4004_v61, %v3759_v31  ;;  %2222 = vmatpush.msrb.mxu2 %v4743_v26 }
 0x1a2   :  { %v1996_v42 = vadd.f32 %v3076_v51, %v1931_v29  ;;  %v1735_v37 = vadd.f32 %v3011_v15, %v1670_v25  ;;  %v2946_v14 = vsel %vm1442_vm1, 1.0, %v5097_v33  ;;  %v2962_v62 = vsel %vm1491_vm2, 1.0, %v5097_v33  ;;  %v30_v29 = vld [vmem:[%s5022_s3 + $0x18] sm:$0xff] }
 0x1a3   :  { %v2143_v39 = vsub.f32 %v4743_v26, %v5072_v52  ;;  %v1539_v6 = vadd.f32 %v2962_v62, %v2946_v14  ;;  %vm1556_vm3 = vcmp.eq.s32.totalorder %v4020_v10, %v3759_v31  ;;  %vm1621_vm4 = vcmp.eq.s32.totalorder %v4028_v47, %v3759_v31  ;;  %1092 = vperm.xlu1 %3095, %v30_v29  }
 0x1a4   :  { %v4775_v5 = vand.u32 4294901760, %v1996_v42  ;;  %v1800_v30 = vadd.f32 %v3027_v50, %v1735_v37  ;;  %v2978_v51 = vsel %vm1556_vm3, 1.0, %v5097_v33  ;;  %v2994_v15 = vsel %vm1621_vm4, 1.0, %v5097_v33 }
 0x1a5   :  { %v2144_v25 = vand.u32 4294901760, %v2143_v39  ;;  %v1604_v52 = vadd.f32 %v2978_v51, %v1539_v6  ;;  %vm1686_vm5 = vcmp.eq.s32.totalorder %v4042_v48, %v3759_v31  ;;  %vm1751_vm0 = vcmp.eq.s32.totalorder %v4051_v34, %v3759_v31  ;;  %v5114_v51 = vld [vmem:[#allocation6_spill] sm:$0xff] }
 0x1a6   :  { %2034 = vmatpush.msrb.mxu0 %v4775_v5  ;;  %v4788_v50 = vsub.f32 %v1996_v42, %v4775_v5  ;;  %v1865_v37 = vadd.f32 %v3043_v16, %v1800_v30  ;;  %v3075_v14 = vsel %vm1947_vm15, 1.0, %v5097_v33  ;;  %v3010_v62 = vsel %vm1686_vm5, 1.0, %v5097_v33  ;;  %2281 = vmatpush.msrb.mxu3 %v4775_v5 }
 0x1a7   :  { %2145 = vmatpush.msrb.mxu1 %v2144_v25  ;;  %v1669_v39 = vadd.f32 %v2994_v15, %v1604_v52  ;;  %v3026_v6 = vsel %vm1751_vm0, 1.0, %v5097_v33  ;;  %vm1816_vm6 = vcmp.eq.s32.totalorder %v4062_v43, %v3759_v31  ;;  %vm1881_vm7 = vcmp.eq.s32.totalorder %v4074_v4, %v3759_v31 }
 0x1a8   :  { %v5076_v30 = vand.u32 4294901760, %v4788_v50  ;;  %v1930_v16 = vadd.f32 %v3059_v18, %v1865_v37  ;;  %v3042_v53 = vsel %vm1816_vm6, 1.0, %v5097_v33  ;;  %vm1946_vm8 = vcmp.eq.s32.totalorder %v4754_v60, %v3759_v31  ;;  %2225 = vmatpush.msrb.mxu2 %v4788_v50 }
 0x1a9   :  { %v1734_v42 = vadd.f32 %v3010_v62, %v1669_v39  ;;  %v3058_v52 = vsel %vm1881_vm7, 1.0, %v5097_v33  ;;  %vm1441_vm9 = vcmp.eq.s32.totalorder %v4002_v27, %v5114_v51  ;;  %vm1490_vm10 = vcmp.eq.s32.totalorder %v4004_v61, %v5114_v51 }
 0x1aa   :  { %v2149_v18 = vsub.f32 %v4788_v50, %v5076_v30  ;;  %v1995_v15 = vadd.f32 %v3075_v14, %v1930_v16  ;;  %v2945_v29 = vsel %vm1441_vm9, 1.0, %v5097_v33  ;;  %v2961_v25 = vsel %vm1490_vm10, 1.0, %v5097_v33 }
 0x1ab   :  { %v1799_v37 = vadd.f32 %v3026_v6, %v1734_v42  ;;  %v1538_v54 = vadd.f32 %v2961_v25, %v2945_v29  ;;  %vm1555_vm11 = vcmp.eq.s32.totalorder %v4020_v10, %v5114_v51  ;;  %vm1620_vm12 = vcmp.eq.s32.totalorder %v4028_v47, %v5114_v51  ;;  %v4831_v10 = vld [vmem:[%s5019_s0 + $0x20] sm:$0xff] }
 0x1ac   :  { %v2150_v27 = vand.u32 4294901760, %v2149_v18  ;;  %v4820_v62 = vand.u32 4294901760, %v1995_v15  ;;  %v2977_v61 = vsel %vm1555_vm11, 1.0, %v5097_v33  ;;  %v2993_v39 = vsel %vm1620_vm12, 1.0, %v5097_v33 }
 0x1ad   :  { %v1864_v14 = vadd.f32 %v3042_v53, %v1799_v37  ;;  %v1603_v16 = vadd.f32 %v2977_v61, %v1538_v54  ;;  %vm1685_vm13 = vcmp.eq.s32.totalorder %v4042_v48, %v5114_v51  ;;  %vm1750_vm14 = vcmp.eq.s32.totalorder %v4051_v34, %v5114_v51  ;;  %v4847_v53 = vld [vmem:[%s5019_s0 + $0x28] sm:$0xff] }
 0x1ae   :  { %2151 = vmatpush.msrb.mxu1 %v2150_v27  ;;  %2036 = vmatpush.msrb.mxu0 %v4820_v62  ;;  %v4835_v47 = vsub.f32 %v1995_v15, %v4820_v62  ;;  %v3074_v54 = vsel %vm1946_vm8, 1.0, %v5097_v33  ;;  %v3009_v48 = vsel %vm1685_vm13, 1.0, %v5097_v33  ;;  %vm1815_vm15 = vcmp.eq.s32.totalorder %v4062_v43, %v5114_v51 }
 0x1af   :  { %v1929_v6 = vadd.f32 %v3058_v52, %v1864_v14  ;;  %v1668_v34 = vadd.f32 %v2993_v39, %v1603_v16  ;;  %2283 = vmatpush.msrb.mxu3 %v4820_v62  ;;  %v3025_v18 = vsel %vm1750_vm14, 1.0, %v5097_v33  ;;  %v4853_v31 = vand.u32 4294901760, %v4831_v10 }
 0x1b0   :  { %v5074_v42 = vand.u32 4294901760, %v4835_v47  ;;  %2228 = vmatpush.msrb.mxu2 %v4835_v47  ;;  %vm1880_vm1 = vcmp.eq.s32.totalorder %v4074_v4, %v5114_v51  ;;  %v3041_v29 = vsel %vm1815_vm15, 1.0, %v5097_v33  ;;  %v4865_v37 = vand.u32 4294901760, %v4847_v53 }
 0x1b1   :  { %v1994_v52 = vadd.f32 %v3074_v54, %v1929_v6  ;;  %v1733_v15 = vadd.f32 %v3009_v48, %v1668_v34  ;;  %v2042_v25 = vsub.f32 %v4831_v10, %v4853_v31  ;;  %vm1945_vm2 = vcmp.eq.s32.totalorder %v4754_v60, %v5114_v51 }
 0x1b2   :  { %v2155_v43 = vsub.f32 %v4835_v47, %v5074_v42  ;;  %v3057_v4 = vsel %vm1880_vm1, 1.0, %v5097_v33  ;;  %v3073_v48 = vsel %vm1945_vm2, 1.0, %v5097_v33  ;;  %v2050_v34 = vsub.f32 %v4847_v53, %v4865_v37 }
 0x1b3   :  { %v4867_v27 = vand.u32 4294901760, %v1994_v52  ;;  %v1798_v61 = vadd.f32 %v3025_v18, %v1733_v15  ;;  %v2043_v14 = vand.u32 4294901760, %v2042_v25  ;;  %v4885_v18 = vld [vmem:[%s5019_s0 + $0x30] sm:$0xff] }
 0x1b4   :  { %v2156_v39 = vand.u32 4294901760, %v2155_v43  ;;  %v2051_v43 = vand.u32 4294901760, %v2050_v34 }
 0x1b5   :  { %2038 = vmatpush.msrb.mxu0 %v4867_v27  ;;  %v4874_v16 = vsub.f32 %v1994_v52, %v4867_v27  ;;  %v1863_v54 = vadd.f32 %v3041_v29, %v1798_v61  ;;  %2285 = vmatpush.msrb.mxu3 %v4867_v27  ;;  %v2044_v6 = vsub.f32 %v2042_v25, %v2043_v14  ;;  %v4891_v29 = vand.u32 4294901760, %v4885_v18 }
 0x1b6   :  { %2157 = vmatpush.msrb.mxu1 %v2156_v39 }
 0x1b7   :  { %v5075_v60 = vand.u32 4294901760, %v4874_v16  ;;  %v1928_v51 = vadd.f32 %v3057_v4, %v1863_v54  ;;  %2231 = vmatpush.msrb.mxu2 %v4874_v16  ;;  %v2045_v33 = vand.u32 4294901760, %v2044_v6  ;;  %v2052_v54 = vsub.f32 %v2050_v34, %v2051_v43 }
 0x1b8   :  { %v2058_v42 = vsub.f32 %v4885_v18, %v4891_v29  ;;  %v5115_v6 = vand.u32 4294901760, %v4151_v59  ;;  %v5117_v59 = vand.u32 4294901760, %v4291_v44  ;;  %v5120_v44 = vand.u32 4294901760, %v4478_v32 }
 0x1b9   :  { %v2161_v52 = vsub.f32 %v4874_v16, %v5075_v60  ;;  %v1993_v15 = vadd.f32 %v3073_v48, %v1928_v51  ;;  %v4905_v51 = vld [vmem:[%s5019_s0 + $0x38] sm:$0xff]  ;;  %v5125_v32 = vand.u32 4294901760, %v4694_v12  ;;  %s3144_s0 = smov [#allocation3]  }
 0x1ba   :  { %v4910_v60 = vand.u32 4294901760, %v4905_v51  ;;  %s2774_s11 = sshll.u32 %s3144_s0, 4  ;;  %s2775_s11 = int_to_ptr.vmem [resolvable:$true] %s2774_s11 }
 0x1bb   :  { %v2162_v61 = vand.u32 4294901760, %v2161_v52  ;;  %v4893_v39 = vand.u32 4294901760, %v1993_v15 }
 0x1bd   :  { %2163 = vmatpush.msrb.mxu1 %v2162_v61  ;;  %2040 = vmatpush.msrb.mxu0 %v4893_v39  ;;  %v2165_v4 = vsub.f32 %v1993_v15, %v4893_v39  ;;  %v5116_v15 = vand.u32 4294901760, %v4197_v45  ;;  %v2059_v61 = vand.u32 4294901760, %v2058_v42  ;;  %v2066_v45 = vsub.f32 %v4905_v51, %v4910_v60 }
 0x1be   :  { %2046 = vmatmul.f32.vlgmr.msrb.gmra.mxu0 %v2045_v33  ;;  %2287 = vmatpush.msrb.mxu3 %v4893_v39  ;;  %v2053_v33 = vand.u32 4294901760, %v2052_v54 }
 0x1bf   :  { %v2166_v48 = vand.u32 4294901760, %v2165_v4  ;;  %2316 = vmatpush.msra.mxu0 %v5115_v6  ;;  %2234 = vmatpush.msrb.mxu2 %v2165_v4  ;;  %v5118_v6 = vand.u32 4294901760, %v4370_v36 }
 0x1c0   :  { %2237 = vmatmul.f32.vlgmr.msrb.gmra.mxu2 %v2042_v25  ;;  %2291 = vmatmul.f32.vlgmr.msrb.gmra.mxu3 %v2043_v14  ;;  %v2060_v25 = vsub.f32 %v2058_v42, %v2059_v61  ;;  %v5119_v14 = vand.u32 4294901760, %v4432_v23 }
 0x1c1   :  { %v2167_v52 = vsub.f32 %v2165_v4, %v2166_v48  ;;  %2320 = vmatpush.msra.mxu0 %v5116_v15  ;;  %v5121_v4 = vand.u32 4294901760, %v4522_v8  ;;  %v5129_v8 = vand.u32 4294901760, %v4874_v16 }
 0x1c2   :  { %v2061_v36 = vand.u32 4294901760, %v2060_v25 }
 0x1c3   :  { %v2168_v30 = vand.u32 4294901760, %v2167_v52  ;;  %2324 = vmatpush.msra.mxu0 %v5117_v59 }
 0x1c5   :  { %2169 = vmatpush.msrb.mxu1 %v2168_v30  ;;  %2328 = vmatpush.msra.mxu0 %v5118_v6  ;;  %v2067_v30 = vand.u32 4294901760, %v2066_v45 }
 0x1c6   :  { %2171 = vmatmul.f32.vlgmr.msrb.gmra.mxu1 %v4853_v31  ;;  %2054 = vmatmul.f32.gmra.mxu0 %v2053_v33 }
 0x1c7   :  { %2395 = vmatpush.msra.mxu1 %v4140_v63  ;;  %2332 = vmatpush.msra.mxu0 %v5119_v14  ;;  %v5122_v63 = vand.u32 4294901760, %v4565_v21  ;;  %v2068_v23 = vsub.f32 %v2066_v45, %v2067_v30 }
 0x1c8   :  { %2242 = vmatmul.f32.gmra.mxu2 %v2050_v34  ;;  %2297 = vmatmul.f32.gmra.mxu3 %v2051_v43 }
 0x1c9   :  { %2397 = vmatpush.msra.mxu1 %v4188_v58  ;;  %2336 = vmatpush.msra.mxu0 %v5120_v44  ;;  %v5123_v58 = vand.u32 4294901760, %v4619_v56 }
 0x1cb   :  { %2399 = vmatpush.msra.mxu1 %v4275_v19  ;;  %2340 = vmatpush.msra.mxu0 %v5121_v4  ;;  %v5124_v19 = vand.u32 4294901760, %v4657_v0 }
 0x1cd   :  { %2401 = vmatpush.msra.mxu1 %v4357_v13  ;;  %2344 = vmatpush.msra.mxu0 %v5122_v63  ;;  %v2069_v13 = vand.u32 4294901760, %v2068_v23 }
 0x1ce   :  { %2175 = vmatmul.f32.gmra.mxu1 %v4865_v37  ;;  %2062 = vmatmul.f32.gmra.mxu0 %v2061_v36 }
 0x1cf   :  { %2403 = vmatpush.msra.mxu1 %v4415_v20  ;;  %2348 = vmatpush.msra.mxu0 %v5123_v58  ;;  %v5126_v20 = vand.u32 4294901760, %v4743_v26 }
 0x1d0   :  { %2247 = vmatmul.f32.gmra.mxu2 %v2058_v42  ;;  %2303 = vmatmul.f32.gmra.mxu3 %v2059_v61 }
 0x1d1   :  { %2405 = vmatpush.msra.mxu1 %v4467_v7  ;;  %2352 = vmatpush.msra.mxu0 %v5124_v19  ;;  %v5127_v7 = vand.u32 4294901760, %v4788_v50 }
 0x1d3   :  { %2407 = vmatpush.msra.mxu1 %v4513_v41  ;;  %2356 = vmatpush.msra.mxu0 %v5125_v32  ;;  %v5128_v41 = vand.u32 4294901760, %v4835_v47 }
 0x1d5   :  { %2409 = vmatpush.msra.mxu1 %v4555_v2  ;;  %2360 = vmatpush.msra.mxu0 %v5126_v20 }
 0x1d6   :  { %2179 = vmatmul.f32.gmra.mxu1 %v4891_v29  ;;  %2070 = vmatmul.f32.gmra.mxu0 %v2069_v13 }
 0x1d7   :  { %2411 = vmatpush.msra.mxu1 %v4601_v11  ;;  %2364 = vmatpush.msra.mxu0 %v5127_v7  ;;  %v1283_v47 = vpop.f32.mrf.mxu1 }
 0x1d8   :  { %2252 = vmatmul.f32.gmra.mxu2 %v2066_v45  ;;  %2309 = vmatmul.f32.gmra.mxu3 %v2067_v30 }
 0x1d9   :  { %2413 = vmatpush.msra.mxu1 %v4647_v17  ;;  %2368 = vmatpush.msra.mxu0 %v5128_v41  ;;  %v4965_v17 = vpop.permute.xlu0 %1077  ;;  %v1241_v26 = vpop.f32.mrf.mxu0 }
 0x1db   :  { %2415 = vmatpush.msra.mxu1 %v4683_v9  ;;  %2372 = vmatpush.msra.mxu0 %v5129_v8  ;;  %v1134_v2 = vpop.f32.mrf.mxu2 }
 0x1dc   :  { %v1135_v12 = vadd.f32 %v1134_v2, %v4965_v17 }
 0x1dd   :  { %2417 = vmatpush.msra.mxu1 %v4729_v55  ;;  %2376 = vmatpush.msra.mxu0 %v2166_v48 }
 0x1de   :  { %2183 = vmatmul.f32.gmra.mxu1 %v4910_v60  ;;  %2378 = vmatmul.f32.vlgmr.msra.gmra.mxu0 %v4853_v31 }
 0x1df   :  { %2419 = vmatpush.msra.mxu1 %v4775_v5 }
 0x1e1   :  { %2421 = vmatpush.msra.mxu1 %v4820_v62  ;;  %v1246_v59 = vpop.f32.mrf.mxu0  ;;  %v1289_v45 = vpop.f32.mrf.mxu1 }
 0x1e3   :  { %v1199_v21 = vpop.f32.mrf.mxu3  ;;  %2423 = vmatpush.msra.mxu1 %v4867_v27  ;;  %v1142_v11 = vpop.f32.mrf.mxu2 }
 0x1e4   :  { %v1200_v55 = vadd.f32 %v1199_v21, %v1135_v12 }
 0x1e5   :  { %2425 = vmatpush.msra.mxu1 %v4893_v39 }
 0x1e6   :  { %2427 = vmatmul.f32.vlgmr.msra.gmra.mxu1 %v4853_v31  ;;  %2382 = vmatmul.f32.gmra.mxu0 %v4865_v37  ;;  %v1242_v62 = vadd.f32 %v1241_v26, %v1200_v55 }
 0x1e8   :  { %v1284_v42 = vadd.f32 %v1283_v47, %v1242_v62 }
 0x1ea   :  { %v1251_v30 = vpop.f32.mrf.mxu0  ;;  %v1295_v7 = vpop.f32.mrf.mxu1 }
 0x1eb   :  { %v1203_v56 = vpop.f32.mrf.mxu3  ;;  %v1150_v0 = vpop.f32.mrf.mxu2 }
 0x1ee   :  { %2431 = vmatmul.f32.gmra.mxu1 %v4865_v37  ;;  %2386 = vmatmul.f32.gmra.mxu0 %v4891_v29 }
 0x1f3   :  { %v1207_v9 = vpop.f32.mrf.mxu3  ;;  %v1158_v5 = vpop.f32.mrf.mxu2 }
 0x1f6   :  { %2435 = vmatmul.f32.gmra.mxu1 %v4891_v29  ;;  %2390 = vmatmul.f32.gmra.mxu0 %v4910_v60  ;;  %v4971_v29 = vpop.permute.xlu0 %1082 }
 0x1f7   :  { %v1143_v61 = vadd.f32 %v1142_v11, %v4971_v29 }
 0x1f9   :  { %v1204_v25 = vadd.f32 %v1203_v56, %v1143_v61  ;;  %v1256_v56 = vpop.f32.mrf.mxu0 }
 0x1fb   :  { %v1211_v50 = vpop.f32.mrf.mxu3  ;;  %v1334_v31 = vpop.f32.mrf.mxu2  ;;  %v1247_v44 = vadd.f32 %v1246_v59, %v1204_v25 }
 0x1fc   :  { %v1335_v37 = vadd.f32 %v1334_v31, %v1284_v42  ;;  %v1301_v31 = vpop.f32.mrf.mxu1 }
 0x1fd   :  { %v1290_v4 = vadd.f32 %v1289_v45, %v1247_v44 }
 0x1fe   :  { %2439 = vmatmul.f32.gmra.mxu1 %v4910_v60  ;;  %v4974_v60 = vpop.permute.xlu1 %1087 }
 0x1ff   :  { %v1151_v36 = vadd.f32 %v1150_v0, %v4974_v60 }
 0x201   :  { %v1208_v63 = vadd.f32 %v1207_v9, %v1151_v36 }
 0x203   :  { %v1371_v27 = vpop.f32.mrf.mxu3  ;;  %v1338_v14 = vpop.f32.mrf.mxu2  ;;  %v1252_v13 = vadd.f32 %v1251_v30, %v1208_v63 }
 0x204   :  { %v1372_v16 = vadd.f32 %v1371_v27, %v1335_v37  ;;  %v1339_v58 = vadd.f32 %v1338_v14, %v1290_v4 }
 0x205   :  { %v1296_v2 = vadd.f32 %v1295_v7, %v1252_v13 }
 0x206   :  { %v1390_v34 = vmul.f32 0.044715, %v1372_v16  ;;  %v1386_v15 = vmul.f32 0.5, %v1372_v16 }
 0x208   :  { %v1394_v43 = vmul.f32 %v1390_v34, %v1372_v16 }
 0x20a   :  { %v1398_v39 = vmul.f32 %v1394_v43, %v1372_v16 }
 0x20b   :  { %v1375_v19 = vpop.f32.mrf.mxu3  ;;  %v1342_v41 = vpop.f32.mrf.mxu2 }
 0x20c   :  { %v1402_v54 = vadd.f32 %v1398_v39, %v1372_v16  ;;  %v1376_v20 = vadd.f32 %v1375_v19, %v1339_v58  ;;  %v1343_v12 = vadd.f32 %v1342_v41, %v1296_v2 }
 0x20e   :  { %v1406_v48 = vmul.f32 0.7978846, %v1402_v54  ;;  %v1391_v8 = vmul.f32 0.044715, %v1376_v20 }
 0x210   :  { %3098 = vtanh.f32 %v1406_v48  ;;  %v1395_v11 = vmul.f32 %v1391_v8, %v1376_v20 }
 0x212   :  { %v1399_v0 = vmul.f32 %v1395_v11, %v1376_v20 }
 0x213   :  { %v1379_v55 = vpop.f32.mrf.mxu3  ;;  %v1346_v37 = vpop.f32.mrf.mxu2 }
 0x214   :  { %v1403_v9 = vadd.f32 %v1399_v0, %v1376_v20  ;;  %v1380_v62 = vadd.f32 %v1379_v55, %v1343_v12 }
 0x215   :  { %v4977_v23 = vpop.permute.xlu1 %1092 }
 0x216   :  { %v3099_v52 = vpop.eup %3098  ;;  %v1159_v32 = vadd.f32 %v1158_v5, %v4977_v23  ;;  %v1407_v47 = vmul.f32 0.7978846, %v1403_v9  ;;  %v1392_v42 = vmul.f32 0.044715, %v1380_v62  ;;  %v1388_v36 = vmul.f32 0.5, %v1380_v62 }
 0x217   :  { %v1414_v33 = vadd.f32 1.0, %v3099_v52 }
 0x218   :  { %v1212_v21 = vadd.f32 %v1211_v50, %v1159_v32  ;;  %3100 = vtanh.f32 %v1407_v47  ;;  %v1396_v5 = vmul.f32 %v1392_v42, %v1380_v62 }
 0x219   :  { %v1418_v6 = vmul.f32 %v1414_v33, %v1386_v15  ;;  %v1387_v15 = vmul.f32 0.5, %v1376_v20 }
 0x21a   :  { %v1257_v26 = vadd.f32 %v1256_v56, %v1212_v21  ;;  %v1400_v34 = vmul.f32 %v1396_v5, %v1380_v62 }
 0x21b   :  { %1422 = vst [vmem:[#allocation3] sm:$0xff] %v1418_v6  ;;  %v1383_v43 = vpop.f32.mrf.mxu3 }
 0x21c   :  { %v1302_v27 = vadd.f32 %v1301_v31, %v1257_v26  ;;  %v1404_v39 = vadd.f32 %v1400_v34, %v1380_v62 }
 0x21e   :  { %v1347_v16 = vadd.f32 %v1346_v37, %v1302_v27  ;;  %v3101_v54 = vpop.eup %3100  ;;  %v1408_v48 = vmul.f32 0.7978846, %v1404_v39 }
 0x21f   :  { %v1415_v33 = vadd.f32 1.0, %v3101_v54 }
 0x220   :  { %v1384_v50 = vadd.f32 %v1383_v43, %v1347_v16  ;;  %3102 = vtanh.f32 %v1408_v48 }
 0x221   :  { %v1419_v59 = vmul.f32 %v1415_v33, %v1387_v15 }
 0x222   :  { %v1393_v52 = vmul.f32 0.044715, %v1384_v50  ;;  %v1389_v13 = vmul.f32 0.5, %v1384_v50 }
 0x223   :  { %1423 = vst [vmem:[#allocation3 + $0x8] sm:$0xff] %v1419_v59 }
 0x224   :  { %v1397_v61 = vmul.f32 %v1393_v52, %v1384_v50 }
 0x226   :  { %v1401_v25 = vmul.f32 %v1397_v61, %v1384_v50  ;;  %v3103_v14 = vpop.eup %3102 }
 0x227   :  { %v1416_v30 = vadd.f32 1.0, %v3103_v14 }
 0x228   :  { %v1405_v45 = vadd.f32 %v1401_v25, %v1384_v50 }
 0x229   :  { %v1420_v4 = vmul.f32 %v1416_v30, %v1388_v36 }
 0x22a   :  { %v1409_v44 = vmul.f32 0.7978846, %v1405_v45  ;;  %v2445_v45 = vmul.f32 %v4885_v18, %v3991_v49  ;;  %v2446_v18 = vmul.f32 %v4905_v51, %v3991_v49 }
 0x22b   :  { %1424 = vst [vmem:[#allocation3 + $0x10] sm:$0xff] %v1420_v4 }
 0x22c   :  { %3104 = vtanh.f32 %v1409_v44  ;;  %v2444_v44 = vmul.f32 %v4847_v53, %v3991_v49 }
 0x232   :  { %v3105_v19 = vpop.eup %3104 }
 0x233   :  { %v1417_v32 = vadd.f32 1.0, %v3105_v19 }
 0x235   :  { %v1421_v20 = vmul.f32 %v1417_v32, %v1389_v13 }
 0x237   :  { %1425 = vst [vmem:[#allocation3 + $0x18] sm:$0xff] %v1421_v20 }
 0x23b   :  { %v2047_v6 = vpop.f32.mrf.mxu0 }
 0x243   :  { %v2172_v63 = vpop.f32.mrf.mxu1  ;;  %v2055_v58 = vpop.f32.mrf.mxu0 }
 0x244   :  { %v2238_v8 = vpop.f32.mrf.mxu2  ;;  %v2292_v2 = vpop.f32.mrf.mxu3  ;;  %v2173_v37 = vadd.f32 %v2172_v63, %v2047_v6 }
 0x246   :  { %v2239_v43 = vadd.f32 %v2238_v8, %v2173_v37 }
 0x248   :  { %v2293_v54 = vadd.f32 %v2292_v2, %v2239_v43 }
 0x24b   :  { %v2176_v7 = vpop.f32.mrf.mxu1  ;;  %v2063_v41 = vpop.f32.mrf.mxu0 }
 0x24c   :  { %v2243_v56 = vpop.f32.mrf.mxu2  ;;  %v2298_v55 = vpop.f32.mrf.mxu3  ;;  %v2177_v42 = vadd.f32 %v2176_v7, %v2055_v58  ;;  %v2443_v58 = vmul.f32 %v4831_v10, %v3991_v49 }
 0x24e   :  { %v2244_v27 = vadd.f32 %v2243_v56, %v2177_v42 }
 0x250   :  { %v2299_v39 = vadd.f32 %v2298_v55, %v2244_v27 }
 0x253   :  { %v2180_v21 = vpop.f32.mrf.mxu1  ;;  %v2071_v11 = vpop.f32.mrf.mxu0 }
 0x254   :  { %v2248_v62 = vpop.f32.mrf.mxu2  ;;  %v2304_v47 = vpop.f32.mrf.mxu3  ;;  %v2181_v31 = vadd.f32 %v2180_v21, %v2063_v41 }
 0x256   :  { %v2249_v5 = vadd.f32 %v2248_v62, %v2181_v31 }
 0x258   :  { %v2305_v50 = vadd.f32 %v2304_v47, %v2249_v5 }
 0x25b   :  { %v2184_v12 = vpop.f32.mrf.mxu1  ;;  %v2379_v0 = vpop.f32.mrf.mxu0 }
 0x25c   :  { %v2253_v48 = vpop.f32.mrf.mxu2  ;;  %v2185_v52 = vadd.f32 %v2184_v12, %v2071_v11  ;;  %v2310_v61 = vpop.f32.mrf.mxu3  ;;  %v2380_v59 = vadd.f32 %v2379_v0, %v2293_v54 }
 0x25e   :  { %v2254_v25 = vadd.f32 %v2253_v48, %v2185_v52 }
 0x260   :  { %v2311_v30 = vadd.f32 %v2310_v61, %v2254_v25 }
 0x263   :  { %v2428_v26 = vpop.f32.mrf.mxu1  ;;  %v2383_v9 = vpop.f32.mrf.mxu0 }
 0x264   :  { %v2384_v15 = vadd.f32 %v2383_v9, %v2299_v39  ;;  %v2429_v63 = vadd.f32 %v2428_v26, %v2380_v59 }
 0x266   :  { %v2447_v20 = vadd.f32 %v2443_v58, %v2429_v63 }
 0x268   :  { %v2469_v21 = vand.u32 4294901760, %v2447_v20 }
 0x26a   :  { %v2535_v10 = vsub.f32 %v2447_v20, %v2469_v21 }
 0x26b   :  { %v2432_v16 = vpop.f32.mrf.mxu1  ;;  %v2387_v34 = vpop.f32.mrf.mxu0 }
 0x26c   :  { %v2388_v33 = vadd.f32 %v2387_v34, %v2305_v50  ;;  %v2433_v6 = vadd.f32 %v2432_v16, %v2384_v15  ;;  %v2536_v62 = vand.u32 4294901760, %v2535_v10  ;;  %v5134_v16 = vld [vmem:[#allocation15_spill] sm:$0xff] }
 0x26e   :  { %v2448_v13 = vadd.f32 %v2444_v44, %v2433_v6  ;;  %v2537_v37 = vsub.f32 %v2535_v10, %v2536_v62 }
 0x270   :  { %v2467_v8 = vand.u32 4294901760, %v2448_v13  ;;  %v2538_v5 = vand.u32 4294901760, %v2537_v37 }
 0x272   :  { %v2529_v12 = vsub.f32 %v2448_v13, %v2467_v8 }
 0x273   :  { %v2436_v14 = vpop.f32.mrf.mxu1  ;;  %v2391_v4 = vpop.f32.mrf.mxu0 }
 0x274   :  { %v2437_v36 = vadd.f32 %v2436_v14, %v2388_v33  ;;  %v2392_v32 = vadd.f32 %v2391_v4, %v2311_v30  ;;  %v2530_v9 = vand.u32 4294901760, %v2529_v12 }
 0x276   :  { %v2449_v19 = vadd.f32 %v2445_v45, %v2437_v36  ;;  %v2531_v42 = vsub.f32 %v2529_v12, %v2530_v9 }
 0x278   :  { %v2465_v7 = vand.u32 4294901760, %v2449_v19  ;;  %v2532_v27 = vand.u32 4294901760, %v2531_v42 }
 0x27a   :  { %v2523_v11 = vsub.f32 %v2449_v19, %v2465_v7 }
 0x27b   :  { %v2440_v41 = vpop.f32.mrf.mxu1 }
 0x27c   :  { %v2441_v2 = vadd.f32 %v2440_v41, %v2392_v32  ;;  %v2524_v55 = vand.u32 4294901760, %v2523_v11 }
 0x27e   :  { %v2450_v53 = vadd.f32 %v2446_v18, %v2441_v2  ;;  %v2525_v51 = vsub.f32 %v2523_v11, %v2524_v55 }
 0x280   :  { %v2463_v56 = vand.u32 4294901760, %v2450_v53  ;;  %v2526_v31 = vand.u32 4294901760, %v2525_v51 }
 0x282   :  { %v2517_v0 = vsub.f32 %v2450_v53, %v2463_v56  ;;  %2464 = vmatpush.msra.mxu2 %v2463_v56  ;;  %2615 = vmatpush.msrb.mxu1 %v2463_v56 }
 0x284   :  { %2466 = vmatpush.msra.mxu2 %v2465_v7  ;;  %2571 = vmatpush.msrb.mxu0 %v2517_v0  ;;  %v2518_v26 = vand.u32 4294901760, %v2517_v0 }
 0x285   :  { %2617 = vmatpush.msrb.mxu1 %v2465_v7 }
 0x286   :  { %2468 = vmatpush.msra.mxu2 %v2467_v8  ;;  %2574 = vmatpush.msrb.mxu0 %v2523_v11  ;;  %v2519_v49 = vsub.f32 %v2517_v0, %v2518_v26 }
 0x287   :  { %2619 = vmatpush.msrb.mxu1 %v2467_v8 }
 0x288   :  { %2470 = vmatpush.msra.mxu2 %v2469_v21  ;;  %2577 = vmatpush.msrb.mxu0 %v2529_v12  ;;  %v2520_v47 = vand.u32 4294901760, %v2519_v49 }
 0x289   :  { %2621 = vmatpush.msrb.mxu1 %v2469_v21  ;;  %2476 = vmatmul.f32.vlgmr.msra.gmra.mxu2 %v4138_v38  ;;  %v5132_v38 = vld [vmem:[#allocation14_spill] sm:$0xff] }
 0x28a   :  { %2662 = vmatpush.msrb.mxu2 %v2518_v26  ;;  %2521 = vmatpush.msra.mxu3 %v2520_v47 }
 0x28b   :  { %2580 = vmatpush.msrb.mxu0 %v2535_v10  ;;  %2625 = vmatmul.f32.vlgmr.msrb.gmra.mxu1 %v4067_v40  ;;  %v5131_v40 = vld [vmem:[#allocation11_spill] sm:$0xff] }
 0x28c   :  { %2666 = vmatpush.msrb.mxu2 %v2524_v55  ;;  %2583 = vmatmul.f32.vlgmr.msrb.gmra.mxu0 %v4046_v57  ;;  %v5130_v57 = vld [vmem:[#allocation12_spill] sm:$0xff] }
 0x28d   :  { %2527 = vmatpush.msra.mxu3 %v2526_v31 }
 0x28e   :  { %2670 = vmatpush.msrb.mxu2 %v2530_v9 }
 0x28f   :  { %2533 = vmatpush.msra.mxu3 %v2532_v27 }
 0x290   :  { %2674 = vmatpush.msrb.mxu2 %v2536_v62 }
 0x291   :  { %2539 = vmatpush.msra.mxu3 %v2538_v5  ;;  %2484 = vmatmul.f32.gmra.mxu2 %v4156_v28  ;;  %v5135_v28 = vld [vmem:[#allocation13_spill] sm:$0xff] }
 0x292   :  { %2541 = vmatmul.f32.vlgmr.msra.gmra.mxu3 %v4022_v22 }
 0x293   :  { %2705 = vmatpush.msrb.mxu3 %v2463_v56  ;;  %2631 = vmatmul.f32.gmra.mxu1 %v4097_v3 }
 0x294   :  { %2588 = vmatmul.f32.gmra.mxu0 %v4081_v24  ;;  %v5133_v24 = vld [vmem:[#allocation16_spill] sm:$0xff] }
 0x295   :  { %2707 = vmatpush.msrb.mxu3 %v2465_v7 }
 0x297   :  { %2709 = vmatpush.msrb.mxu3 %v2467_v8 }
 0x299   :  { %2711 = vmatpush.msrb.mxu3 %v2469_v21  ;;  %2492 = vmatmul.f32.gmra.mxu2 %v4307_v1 }
 0x29a   :  { %2545 = vmatmul.f32.gmra.mxu3 %v4069_v35 }
 0x29b   :  { %2637 = vmatmul.f32.gmra.mxu1 %v5130_v57 }
 0x29c   :  { %2593 = vmatmul.f32.gmra.mxu0 %v4133_v46 }
 0x2a1   :  { %2500 = vmatmul.f32.gmra.mxu2 %v5133_v24 }
 0x2a2   :  { %2549 = vmatmul.f32.gmra.mxu3 %v5131_v40 }
 0x2a3   :  { %2643 = vmatmul.f32.gmra.mxu1 %v5134_v16 }
 0x2a4   :  { %2598 = vmatmul.f32.gmra.mxu0 %v5132_v38 }
 0x2a9   :  { %2676 = vmatmul.f32.vlgmr.msrb.gmra.mxu2 %v4022_v22 }
 0x2aa   :  { %2553 = vmatmul.f32.gmra.mxu3 %v5135_v28 }
 0x2b1   :  { %2680 = vmatmul.f32.gmra.mxu2 %v4069_v35 }
 0x2b2   :  { %2713 = vmatmul.f32.vlgmr.msrb.gmra.mxu3 %v4022_v22 }
 0x2b9   :  { %2684 = vmatmul.f32.gmra.mxu2 %v5131_v40 }
 0x2ba   :  { %2717 = vmatmul.f32.gmra.mxu3 %v4069_v35 }
 0x2c1   :  { %2688 = vmatmul.f32.gmra.mxu2 %v5135_v28 }
 0x2c2   :  { %2721 = vmatmul.f32.gmra.mxu3 %v5131_v40 }
 0x2ca   :  { %2725 = vmatmul.f32.gmra.mxu3 %v5135_v28 }
 0x308   :  { %v2626_v48 = vpop.f32.mrf.mxu1 }
 0x309   :  { %v2584_v50 = vpop.f32.mrf.mxu0 }
 0x30c   :  { %v2477_v3 = vpop.f32.mrf.mxu2 }
 0x30d   :  { %v2478_v22 = vadd.f32 %v2477_v3, %v4965_v17 }
 0x310   :  { %v2632_v14 = vpop.f32.mrf.mxu1 }
 0x311   :  { %v2589_v61 = vpop.f32.mrf.mxu0 }
 0x314   :  { %v2485_v1 = vpop.f32.mrf.mxu2 }
 0x315   :  { %v2542_v46 = vpop.f32.mrf.mxu3  ;;  %v2486_v15 = vadd.f32 %v2485_v1, %v4971_v29 }
 0x316   :  { %v2543_v35 = vadd.f32 %v2542_v46, %v2478_v22 }
 0x318   :  { %v2585_v33 = vadd.f32 %v2584_v50, %v2543_v35  ;;  %v2638_v18 = vpop.f32.mrf.mxu1 }
 0x319   :  { %v2594_v58 = vpop.f32.mrf.mxu0 }
 0x31a   :  { %v2627_v45 = vadd.f32 %v2626_v48, %v2585_v33 }
 0x31c   :  { %v2493_v43 = vpop.f32.mrf.mxu2 }
 0x31d   :  { %v2546_v34 = vpop.f32.mrf.mxu3  ;;  %v2494_v36 = vadd.f32 %v2493_v43, %v4974_v60 }
 0x31e   :  { %v2547_v25 = vadd.f32 %v2546_v34, %v2486_v15 }
 0x320   :  { %v2590_v4 = vadd.f32 %v2589_v61, %v2547_v25  ;;  %v2644_v47 = vpop.f32.mrf.mxu1 }
 0x321   :  { %v2599_v10 = vpop.f32.mrf.mxu0 }
 0x322   :  { %v2633_v32 = vadd.f32 %v2632_v14, %v2590_v4 }
 0x324   :  { %v2501_v54 = vpop.f32.mrf.mxu2 }
 0x325   :  { %v2550_v39 = vpop.f32.mrf.mxu3  ;;  %v2502_v41 = vadd.f32 %v2501_v54, %v4977_v23 }
 0x326   :  { %v2551_v19 = vadd.f32 %v2550_v39, %v2494_v36 }
 0x328   :  { %v2595_v21 = vadd.f32 %v2594_v58, %v2551_v19 }
 0x32a   :  { %v2639_v0 = vadd.f32 %v2638_v18, %v2595_v21 }
 0x32c   :  { %v2677_v59 = vpop.f32.mrf.mxu2 }
 0x32d   :  { %v2554_v52 = vpop.f32.mrf.mxu3  ;;  %v2678_v6 = vadd.f32 %v2677_v59, %v2627_v45 }
 0x32e   :  { %v2555_v56 = vadd.f32 %v2554_v52, %v2502_v41 }
 0x330   :  { %v2600_v62 = vadd.f32 %v2599_v10, %v2555_v56 }
 0x332   :  { %v2645_v40 = vadd.f32 %v2644_v47, %v2600_v62 }
 0x334   :  { %v2681_v17 = vpop.f32.mrf.mxu2 }
 0x335   :  { %v2714_v44 = vpop.f32.mrf.mxu3  ;;  %v2682_v29 = vadd.f32 %v2681_v17, %v2633_v32 }
 0x336   :  { %v2715_v30 = vadd.f32 %v2714_v44, %v2678_v6 }
 0x338   :  { %v2733_v63 = vmul.f32 0.044715, %v2715_v30  ;;  %v2729_v37 = vmul.f32 0.5, %v2715_v30 }
 0x33a   :  { %v2737_v13 = vmul.f32 %v2733_v63, %v2715_v30 }
 0x33c   :  { %v2741_v20 = vmul.f32 %v2737_v13, %v2715_v30  ;;  %v2685_v60 = vpop.f32.mrf.mxu2 }
 0x33d   :  { %v2718_v7 = vpop.f32.mrf.mxu3  ;;  %v2686_v26 = vadd.f32 %v2685_v60, %v2639_v0 }
 0x33e   :  { %v2745_v8 = vadd.f32 %v2741_v20, %v2715_v30  ;;  %v2719_v2 = vadd.f32 %v2718_v7, %v2682_v29 }
 0x340   :  { %v2749_v53 = vmul.f32 0.7978846, %v2745_v8  ;;  %v2734_v11 = vmul.f32 0.044715, %v2719_v2  ;;  %v2730_v39 = vmul.f32 0.5, %v2719_v2 }
 0x342   :  { %3106 = vtanh.f32 %v2749_v53  ;;  %v2738_v12 = vmul.f32 %v2734_v11, %v2719_v2 }
 0x344   :  { %v2742_v55 = vmul.f32 %v2738_v12, %v2719_v2  ;;  %v2689_v5 = vpop.f32.mrf.mxu2 }
 0x345   :  { %v2722_v9 = vpop.f32.mrf.mxu3  ;;  %v2690_v16 = vadd.f32 %v2689_v5, %v2645_v40 }
 0x346   :  { %v2746_v49 = vadd.f32 %v2742_v55, %v2719_v2  ;;  %v2723_v51 = vadd.f32 %v2722_v9, %v2686_v26 }
 0x348   :  { %v3107_v42 = vpop.eup %3106  ;;  %v2750_v23 = vmul.f32 0.7978846, %v2746_v49  ;;  %v2735_v31 = vmul.f32 0.044715, %v2723_v51  ;;  %v2731_v33 = vmul.f32 0.5, %v2723_v51 }
 0x349   :  { %v2757_v27 = vadd.f32 1.0, %v3107_v42 }
 0x34a   :  { %3108 = vtanh.f32 %v2750_v23  ;;  %v2739_v57 = vmul.f32 %v2735_v31, %v2723_v51 }
 0x34b   :  { %v2761_v38 = vmul.f32 %v2757_v27, %v2729_v37 }
 0x34c   :  { %v2743_v24 = vmul.f32 %v2739_v57, %v2723_v51 }
 0x34d   :  { %2766 = vst [vmem:[#allocation3 + $0x20] sm:$0xff] %v2761_v38  ;;  %v2726_v28 = vpop.f32.mrf.mxu3 }
 0x34e   :  { %v2747_v3 = vadd.f32 %v2743_v24, %v2723_v51  ;;  %v2727_v46 = vadd.f32 %v2726_v28, %v2690_v16 }
 0x350   :  { %v3109_v1 = vpop.eup %3108  ;;  %v2751_v34 = vmul.f32 0.7978846, %v2747_v3  ;;  %v2736_v43 = vmul.f32 0.044715, %v2727_v46  ;;  %v2732_v45 = vmul.f32 0.5, %v2727_v46 }
 0x351   :  { %v2758_v50 = vadd.f32 1.0, %v3109_v1 }
 0x352   :  { %3110 = vtanh.f32 %v2751_v34  ;;  %v2740_v22 = vmul.f32 %v2736_v43, %v2727_v46 }
 0x353   :  { %v2762_v54 = vmul.f32 %v2758_v50, %v2730_v39 }
 0x354   :  { %v2744_v48 = vmul.f32 %v2740_v22, %v2727_v46 }
 0x355   :  { %2767 = vst [vmem:[#allocation3 + $0x28] sm:$0xff] %v2762_v54 }
 0x356   :  { %v2748_v35 = vadd.f32 %v2744_v48, %v2727_v46 }
 0x358   :  { %v3111_v52 = vpop.eup %3110  ;;  %v2752_v15 = vmul.f32 0.7978846, %v2748_v35 }
 0x359   :  { %v2759_v61 = vadd.f32 1.0, %v3111_v52 }
 0x35a   :  { %3112 = vtanh.f32 %v2752_v15 }
 0x35b   :  { %v2763_v59 = vmul.f32 %v2759_v61, %v2731_v33 }
 0x35d   :  { %2768 = vst [vmem:[#allocation3 + $0x30] sm:$0xff] %v2763_v59 }
 0x360   :  { %v3113_v25 = vpop.eup %3112 }
 0x361   :  { %v2760_v14 = vadd.f32 1.0, %v3113_v25 }
 0x363   :  { %v2764_v6 = vmul.f32 %v2760_v14, %v2732_v45 }
 0x365   :  { %2769 = vst [vmem:[#allocation3 + $0x38] sm:$0xff] %v2764_v6 }
 0x366   :  { %2782 = dma.vmem_to_hbm [thread:$0]  %s2775_s11, 1024, %s2777_s13, [#allocation4], %s3145_s14, %s3145_s14, %s3146_s15  }
 0x367   :  { %3140 = dma.done.wait [#allocation4], 1024  }
 0x368   :  { %3141 = vsyncadd [#allocation4], 4294966272 }
 0x369   :  { %2787 = vsyncpa [#allocation4], 1 }

</bundles_post_ra>
